<compile_context>
chip_gen: v7x
topology: tpu7x:2x2x1
jax: 0.10.0
libtpu: 0.0.40
codegen_flags: <defaults>
</compile_context>

<pallas_src>
import jax
import jax.numpy as jnp
from jax.experimental import pallas as pl
from jax.experimental.pallas import tpu as pltpu

_LANES = 1024                 # lane-dense last dim (multiple of 128 -> unmasked stores)
_MAX_TILE_ROWS = 1024         # 4 MiB/buffer at f32
_SMALL_FALLBACK_ELEMS = 64 * 1024   # below this, plain jnp is faster than pallas_call


def _shifted_sigmoid_kernel(smooth_ref, x_ref, o_ref):
    # smooth_ref: (1, 1) scalar parameter in SMEM.
    # x_ref / o_ref: (tile_rows, _LANES) tile in VMEM.
    s = smooth_ref[0, 0]
    x = x_ref[...].astype(jnp.float32)           # f32 compute (v5e has no bf16 VPU/EUP)
    y = jax.nn.sigmoid(s * x - jnp.pi)           # VPU scale + EUP sigmoid, hidden under HBM BW
    o_ref[...] = y.astype(o_ref.dtype)


def _sublane_align(dtype) -> int:
    # Min sublane multiple by element width (f32: 8, bf16: 16, int8/fp8: 32).
    return {4: 8, 2: 16, 1: 32}.get(jnp.dtype(dtype).itemsize, 8)


def _run_slab(x2d: jax.Array, smooth: jax.Array, out_dtype) -> jax.Array:
    rows, lanes = x2d.shape
    align = _sublane_align(out_dtype)

    if rows <= _MAX_TILE_ROWS:
        # Aim for >= 2 grid steps so both TensorCores get work on v7x.
        half = -(-rows // 2)
        tile_rows = max(align, -(-half // align) * align)
    else:
        tile_rows = _MAX_TILE_ROWS
    num_tiles = -(-rows // tile_rows)            # ragged last block is masked by Pallas

    total = rows * lanes
    itemsize = jnp.dtype(out_dtype).itemsize
    cost = pl.CostEstimate(
        flops=2 * total,
        transcendentals=total,
        bytes_accessed=2 * total * itemsize,
    )

    return pl.pallas_call(
        _shifted_sigmoid_kernel,
        out_shape=jax.ShapeDtypeStruct((rows, lanes), out_dtype),
        grid_spec=pl.GridSpec(
            grid=(num_tiles,),
            in_specs=[
                pl.BlockSpec(memory_space=pltpu.SMEM),               # smoothness scalar
                pl.BlockSpec((tile_rows, lanes), lambda i: (i, 0)),  # streamed input tile
            ],
            out_specs=pl.BlockSpec((tile_rows, lanes), lambda i: (i, 0)),
        ),
        compiler_params=pltpu.CompilerParams(
            dimension_semantics=("parallel",),      # megacore / dual-TC sharding
            vmem_limit_bytes=32 * 1024 * 1024,      # headroom for 4 MiB tiles on v5e
        ),
        cost_estimate=cost,
    )(smooth, x2d)


def shifted_sigmoid(x: jax.Array, smoothness) -> jax.Array:
    """Pallas implementation of ShiftedSigmoid.forward: sigmoid(smoothness*x - pi)."""
    orig_shape = x.shape
    orig_dtype = x.dtype
    if not jnp.issubdtype(orig_dtype, jnp.floating):
        raise TypeError("shifted_sigmoid supports floating dtypes only, got %s" % orig_dtype)

    total = int(x.size)
    smooth_f32 = jnp.asarray(smoothness, dtype=jnp.float32)

    # ---- small-input fast path: skip pallas_call entirely --------------------
    if total == 0 or total < _SMALL_FALLBACK_ELEMS:
        y = jax.nn.sigmoid(smooth_f32 * x.astype(jnp.float32) - jnp.pi)
        return y.astype(orig_dtype)

    smooth = smooth_f32.reshape(1, 1)
    flat = x.reshape(-1)
    main_rows, rem = divmod(total, _LANES)

    if rem == 0:
        # Common case: pure reshape in/out, no pad, no slice.
        out2d = _run_slab(flat.reshape(main_rows, _LANES), smooth, orig_dtype)
        return out2d.reshape(orig_shape)

    # Ragged case: run the bulk through the kernel, compute the <1024-element
    # tail with plain jnp (cheaper than padding + re-slicing the whole slab).
    main_total = main_rows * _LANES
    main2d = flat[:main_total].reshape(main_rows, _LANES)
    tail = flat[main_total:]
    out_main = _run_slab(main2d, smooth, orig_dtype).reshape(-1)
    out_tail = jax.nn.sigmoid(smooth_f32 * tail.astype(jnp.float32) - jnp.pi).astype(orig_dtype)
    return jnp.concatenate([out_main, out_tail]).reshape(orig_shape)


if __name__ == "__main__":
    key = jax.random.PRNGKey(0)

    # Parameter init matching the PyTorch module:
    # self.smoothness = nn.Parameter(torch.tensor(1.5)); self.shift = pi
    smoothness = jnp.float32(1.5)

    # 1) Small NCHW input (fast path, no pallas_call).
    x_small = jax.random.normal(key, (2, 4, 16, 16), dtype=jnp.float32)
    y_small = jax.block_until_ready(shifted_sigmoid(x_small, smoothness))
    ref_small = jax.nn.sigmoid(smoothness * x_small - jnp.pi)
    assert y_small.shape == x_small.shape and y_small.dtype == x_small.dtype
    assert jnp.allclose(y_small, ref_small, atol=1e-6, rtol=1e-6)

    # 2) Larger NCHW input, size a multiple of 1024 -> exercises the Pallas
    #    kernel on the no-pad / no-slice path (512 rows, 2 tiles).
    x_big = jax.random.normal(jax.random.PRNGKey(0), (2, 16, 128, 128), dtype=jnp.float32)
    y_big = jax.block_until_ready(shifted_sigmoid(x_big, smoothness))
    ref_big = jax.nn.sigmoid(smoothness * x_big - jnp.pi)
    assert y_big.shape == x_big.shape and y_big.dtype == x_big.dtype
    assert jnp.allclose(y_big, ref_big, atol=1e-6, rtol=1e-6)

    # 3) Odd-sized input (75075 elements) -> exercises the ragged tail path and
    #    a masked partial last grid block inside the kernel.
    x_odd = jax.random.normal(jax.random.PRNGKey(0), (3, 5, 77, 65), dtype=jnp.float32)
    y_odd = jax.block_until_ready(shifted_sigmoid(x_odd, smoothness))
    ref_odd = jax.nn.sigmoid(smoothness * x_odd - jnp.pi)
    assert y_odd.shape == x_odd.shape and y_odd.dtype == x_odd.dtype
    assert jnp.allclose(y_odd, ref_odd, atol=1e-6, rtol=1e-6)

    print("KERNEL_OK")
</pallas_src>

<mosaic_0001>
module attributes {stable_mosaic.version = 11 : i64} {
  func.func @_shifted_sigmoid_kernel(%arg0: i32, %arg1: memref<1x1xf32, #tpu.memory_space<smem>>, %arg2: memref<256x1024xf32, #tpu.memory_space<vmem>>, %arg3: memref<256x1024xf32, #tpu.memory_space<vmem>>) attributes {dimension_semantics = [#tpu.dimension_semantics<parallel>], iteration_bounds = array<i64: 2>, scalar_prefetch = 0 : i64, scratch_operands = 0 : i64, tpu.core_type = #tpu.core_type<tc>, window_params = [{transform_indices = @transform_0, window_bounds = array<i64: 1, 1>}, {transform_indices = @transform_1, window_bounds = array<i64: 256, 1024>}, {transform_indices = @transform_2, window_bounds = array<i64: 256, 1024>}]} {
    %c0 = arith.constant 0 : index
    %c0_0 = arith.constant 0 : index
    %0 = memref.load %arg1[%c0, %c0_0] : memref<1x1xf32, #tpu.memory_space<smem>>
    %c0_1 = arith.constant 0 : index
    %c0_2 = arith.constant 0 : index
    %1 = vector.load %arg2[%c0_1, %c0_2] : memref<256x1024xf32, #tpu.memory_space<vmem>>, vector<256x1024xf32>
    %2 = vector.broadcast %0 : f32 to vector<256x1024xf32>
    %3 = arith.mulf %2, %1 : vector<256x1024xf32>
    %cst = arith.constant 3.14159274 : f32
    %4 = vector.broadcast %cst : f32 to vector<256x1024xf32>
    %5 = arith.subf %3, %4 : vector<256x1024xf32>
    %6 = arith.negf %5 : vector<256x1024xf32>
    %7 = math.exp %6 : vector<256x1024xf32>
    %cst_3 = arith.constant 1.000000e+00 : f32
    %8 = vector.broadcast %cst_3 : f32 to vector<256x1024xf32>
    %9 = arith.addf %8, %7 : vector<256x1024xf32>
    %10 = arith.divf %8, %9 : vector<256x1024xf32>
    %c0_4 = arith.constant 0 : index
    %c0_5 = arith.constant 0 : index
    %11 = vector.load %arg3[%c0_4, %c0_5] : memref<256x1024xf32, #tpu.memory_space<vmem>>, vector<256x1024xf32>
    tpu.vector_store %arg3[%c0_4, %c0_5], %10 {strides = array<i32>} : memref<256x1024xf32, #tpu.memory_space<vmem>>, vector<256x1024xf32>,
    return
  }
  func.func @transform_0(%arg0: i32) -> (i32, i32) {
    %c0_i32 = arith.constant 0 : i32
    %c0_i32_0 = arith.constant 0 : i32
    %c0_i32_1 = arith.constant 0 : i32
    return %c0_i32, %c0_i32_0 : i32, i32
  }
  func.func @transform_1(%arg0: i32) -> (i32, i32) {
    %c0_i32 = arith.constant 0 : i32
    %c0_i32_0 = arith.constant 0 : i32
    return %arg0, %c0_i32 : i32, i32
  }
  func.func @transform_2(%arg0: i32) -> (i32, i32) {
    %c0_i32 = arith.constant 0 : i32
    %c0_i32_0 = arith.constant 0 : i32
    return %arg0, %c0_i32 : i32, i32
  }
}

</mosaic_0001>

<bundles_post_ra>
// kernel: tpu_custom_call.1
= control target key start
LH: loop header
LB: loop body
LE: loop exit
PB: predicated region body
PF: predicated region fallthrough
CT: control target
= control target key end

     0   :  { %s5485_s0 = inlined_call_operand.<no memory space> [shape: f32[1,1], index: 0, kind: input, shape index: {}]   ;;  %s5486_s1 = inlined_call_operand.hbm [shape: f32[512,1024], index: 1, kind: input, shape index: {}]   ;;  %s5487_s2 = inlined_call_operand.hbm [shape: f32[512,1024], index: 2, kind: output, shape index: {}]  }
   0x1   :  { %7 = sst [smem:[#allocation2]] %s5485_s0 }
   0x2   :  { %8 = vsyncpa [#allocation4], 0 }
   0x3   :  { %10 = vsyncpa [#allocation4 + $0x1], 0 }
   0x4   :  { %11 = vsyncpa [#allocation5], 0 }
   0x5   :  { %13 = vsyncpa [#allocation5 + $0x1], 0  ;;  %s4544_s11 = smov 0   ;;  %s4546_s12 = smov 0  }
   0x6   :  { %s4548_s13 = smov 0   ;;  %s4550_s14 = smov 0  }
   0x7 LB: > { %s4565_s0 = sadd.s32 4294967295, %s4518_s14   ;;  %s2816_s15 = sadd.s32 4294967294, %s4518_s14   ;;  %s4518_s14 = sphi %s4550_s14, %s5500_s14   ;;  %s4514_s13 = sphi %s4548_s13, %s5499_s13   ;;  %s4510_s12 = sphi %s4546_s12, %s5498_s12   ;;  %s4506_s11 = sphi %s4544_s11, %s5497_s11  }
   0x8   : > { %s4569_s16 = sadd.s32 1, %s4518_s14   ;;  %s47_s17 = sadd.s32 1, %s4514_s13 }
   0x9   : > { %s44_s18 = ssub.s32 %s4518_s14, %s4569_s16  ;;  %p54_p0 = scmp.ne.s32.totalorder %s4514_s13, %s4510_s12 }
   0xa   : > { %p45_p1 = scmp.eq.s32.totalorder %s44_s18, 0  ;;  %p55_p2 = scmp.eq.s32.totalorder %s4518_s14, 0 }
   0xb   : > { %p60_p3 = scmp.ne.s32.totalorder %s4510_s12, %s4506_s11  ;;  %p61_p4 = scmp.eq.s32.totalorder %s4565_s0, 0 }
   0xc   : > { %s4581_s19 = scalar_select %p45_p1, %s4514_s13, %s47_s17  }
   0xd   : > { %p4583_p5 = por %p55_p2, %p54_p0  ;;  %p4587_p6 = por %p61_p4, %p60_p3 }
   0xe   : > { %p84_p7 = scmp.eq.s32.totalorder %s4565_s0, 1  ;;  %p90_p8 = scmp.eq.s32.totalorder %s2816_s15, 1 }
   0xf   : > { %p3360_p10 = scmp.lt.s32.totalorder %s4518_s14, 2  ;;  %s113_s24 = sand.u32 1, %s4514_s13  }
  0x10   : > { %p4594_p11 = por %p84_p7, %p54_p0  ;;  %p4598_p12 = por %p90_p8, %p60_p3 }
  0x11   : > { %s3345_s25 = sshll.u32 %s4518_s14, 15  ;;  %s2819_s26 = sshll.u32 %s113_s24, 11 }
  0x12   : > { %s5491_s22 = scalar_select %p4594_p11, 1, 0 }
  0x13   : > { %s5492_s23 = scalar_select %p4598_p12, 1, 0 }
  0x14   : > { %s4607_s29 = scalar_lea.hbm %s5486_s1, %s3345_s25  ;;  %s117_s30 = scalar_lea.vmem [#allocation3], %s2819_s26 }
  0x15   : > { %s125_s3 = sshll.u32 %s117_s30, 4  ;;  %p4611_p13 = pnand %p3360_p10, %p4583_p5  ;;  %s4615_s3 = int_to_ptr.vmem [resolvable:$true] %s125_s3 }
  0x16   : > { %s4617_s5 = scalar_lea.sflag [#allocation4], %s113_s24  ;;  %s4422_s6 = scalar_lea.hbm %s4607_s29, 32768 }
  0x17   : > { %p4423_p0 = scmp.ne.s32.totalorder %s4607_s29, %s4422_s6  ;;  %p4424_p1 = pneg %p4611_p13 }
  0x18   : > { %s4427_s9 = scalar_lea.hbm %s5486_s1, 65536  ;;  %p4428_p4 = scmp.lt.u32.totalorder %s4607_s29, %s5486_s1 }
  0x19   : > { %p4425_p2 = pnand %p4424_p1, %p4423_p0  ;;  %p4429_p5 = scmp.lt.u32.totalorder %s4427_s9, %s4422_s6 }
  0x1a   : > { %p4431_p8 = scmp.lt.u32.totalorder %s4422_s6, %s4607_s29 }
  0x1b   : > { %p4426_p3 = pneg %p4425_p2  ;;  %p4430_p7 = por %p4429_p5, %p4428_p4 }
  0x1d   : > { %p4432_p10 = por %p4431_p8, %p4430_p7 }
  0x1f   : > { %p4433_p9 = pnand %p4432_p10, %p4426_p3 }
  0x21   : > { %4436 = shalt.err (!%p4433_p9)
}
  0x22   : > { %s4437_s17 = scalar_lea.vmem %s4615_s3, 32768  ;;  %s4520_s18 = smov [#allocation3]  }
  0x23   : > { %p4438_p0 = scmp.ne.s32.totalorder %s4615_s3, %s4437_s17  ;;  %s4442_s20 = sshll.u32 %s4520_s18, 4  ;;  %s4443_s20 = int_to_ptr.vmem [resolvable:$false] %s4442_s20 }
  0x24   : > { %s4444_s24 = scalar_lea.vmem %s4443_s20, 65536  ;;  %p4445_p11 = scmp.lt.s32.totalorder %s4615_s3, %s4443_s20 }
  0x25   : > { %p4440_p2 = pnand %p4438_p0, %p4424_p1  ;;  %p4446_p4 = scmp.lt.s32.totalorder %s4444_s24, %s4437_s17 }
  0x27   : > { %p4441_p12 = pneg %p4440_p2  ;;  %p4447_p5 = por %p4446_p4, %p4445_p11 }
  0x29   : > { %p4448_p7 = pnand %p4447_p5, %p4441_p12 }
  0x2b   : > { %4451 = shalt.err (!%p4448_p7)
}
  0x2c   : > { %s4521_s25 = smov 1024   ;;  %s4522_s26 = smov 64  }
  0x2d   : > { %3355 = dma.hbm_to_vmem [thread:$0]  (!%p4611_p13), %s4607_s29, 32768, %s4615_s3, %s4617_s5, %s4521_s25, %s4521_s25, %s4522_s26  }
  0x2e   : > { %p2823_p9 = scmp.ge.s32.totalorder %s4518_s14, 1  ;;  %p133_p1 = scmp.lt.s32.totalorder %s4518_s14, 3 }
  0x30   : > { %p134_p3 = pnand %p2823_p9, %p133_p1 }
  0x31   : > { %s4648_s27 = sand.u32 (!%p134_p3), 1, %s4510_s12  }
  0x32   : > { %137 = sbr.rel (%p134_p3) target bundleno = 612 (0x264), region = 28  ;;  %s2824_s28 = sshll.u32 (!%p134_p3), %s4648_s27, 11 }
  0x33   : > { %s140_s30 = scalar_lea.sflag (!%p134_p3), [#allocation4], %s4648_s27  ;;  %s4654_s6 = scalar_lea.vmem (!%p134_p3), [#allocation3], %s2824_s28 }
  0x39   : > { %4497 = dma.done.wait (%p4587_p6), %s140_s30, 32768  }
  0x3a   : > { %4499 = vsyncadd (%p4587_p6), %s140_s30, 4294934528  ;;  %s166_s29 = sld [smem:[#allocation2]]  ;;  %v167_v0 = vld [vmem:[%s4654_s6] sm:$0xff]  ;;  %v168_v2 = vld [vmem:[%s4654_s6 + $0x8] sm:$0xff]  ;;  %s4713_s21 = scalar_lea.vmem [#allocation6], %s2824_s28 }
  0x3b   : > { %v169_v3 = vld [vmem:[%s4654_s6 + $0x10] sm:$0xff]  ;;  %v170_v7 = vld [vmem:[%s4654_s6 + $0x18] sm:$0xff]  ;;  %v171_v8 = vld [vmem:[%s4654_s6 + $0x20] sm:$0xff]  ;;  %s3347_s3 = sshll.u32 %s4565_s0, 15  ;;  %s2743_s4 = sshll.u32 %s4713_s21, 4  ;;  %s5438_s4 = int_to_ptr.vmem [resolvable:$true] %s2743_s4 }
  0x3c   : > { %v172_v9 = vld [vmem:[%s4654_s6 + $0x28] sm:$0xff]  ;;  %v173_v13 = vld [vmem:[%s4654_s6 + $0x30] sm:$0xff]  ;;  %v174_v14 = vld [vmem:[%s4654_s6 + $0x38] sm:$0xff]  ;;  %s5436_s8 = scalar_lea.hbm %s5487_s2, %s3347_s3  ;;  %s2729_s0 = scalar_lea.sflag [#allocation5], %s4648_s27 }
  0x3d   : > { %v175_v15 = vld [vmem:[%s4654_s6 + $0x40] sm:$0xff]  ;;  %v176_v34 = vld [vmem:[%s4654_s6 + $0x48] sm:$0xff]  ;;  %v177_v35 = vld [vmem:[%s4654_s6 + $0x50] sm:$0xff]  ;;  %s4452_s9 = scalar_lea.vmem %s5438_s4, 32768  ;;  %p5494_p11 = scmp.ne.s32.totalorder %s5491_s22, 0 }
  0x3e   : > { %v178_v36 = vld [vmem:[%s4654_s6 + $0x58] sm:$0xff]  ;;  %v179_v42 = vld [vmem:[%s4654_s6 + $0x60] sm:$0xff]  ;;  %v180_v49 = vld [vmem:[%s4654_s6 + $0x68] sm:$0xff]  ;;  %p4453_p6 = scmp.ne.s32.totalorder %s5438_s4, %s4452_s9  ;;  %s4523_s10 = smov [#allocation6]  }
  0x3f   : > { %v181_v54 = vld [vmem:[%s4654_s6 + $0x70] sm:$0xff]  ;;  %s4456_s15 = sshll.u32 %s4523_s10, 4  ;;  %s4457_s15 = int_to_ptr.vmem [resolvable:$false] %s4456_s15 }
  0x40   : > { %v4661_v1 = vstv %s166_s29  ;;  %p4454_p12 = pnand %p4453_p6, %p5494_p11  ;;  %s4458_s17 = scalar_lea.vmem %s4457_s15, 65536 }
  0x41   : > { %v424_v4 = vmul.f32 %v4661_v1, %v167_v0  ;;  %v425_v5 = vmul.f32 %v4661_v1, %v168_v2  ;;  %v426_v6 = vmul.f32 %v4661_v1, %v169_v3  ;;  %v427_v10 = vmul.f32 %v4661_v1, %v170_v7  ;;  %v182_v0 = vld [vmem:[%s4654_s6 + $0x78] sm:$0xff]  ;;  %p4459_p8 = scmp.lt.s32.totalorder %s5438_s4, %s4457_s15  ;;  %p4460_p10 = scmp.lt.s32.totalorder %s4458_s17, %s4452_s9 }
  0x42   : > { %v428_v11 = vmul.f32 %v4661_v1, %v171_v8  ;;  %v429_v12 = vmul.f32 %v4661_v1, %v172_v9  ;;  %v430_v19 = vmul.f32 %v4661_v1, %v173_v13  ;;  %v431_v23 = vmul.f32 %v4661_v1, %v174_v14  ;;  %v184_v9 = vld [vmem:[%s4654_s6 + $0x88] sm:$0xff]  ;;  %v185_v13 = vld [vmem:[%s4654_s6 + $0x90] sm:$0xff]  ;;  %p4455_p13 = pneg %p4454_p12 }
  0x43   : > { %v2826_v16 = vadd.f32 -3.1415927, %v424_v4  ;;  %v2827_v17 = vadd.f32 -3.1415927, %v425_v5  ;;  %v2828_v18 = vadd.f32 -3.1415927, %v426_v6  ;;  %v432_v27 = vmul.f32 %v4661_v1, %v175_v15  ;;  %p4461_p0 = por %p4460_p10, %p4459_p8 }
  0x44   : > { %v2829_v20 = vadd.f32 -3.1415927, %v427_v10  ;;  %v2830_v21 = vadd.f32 -3.1415927, %v428_v11  ;;  %v2831_v22 = vadd.f32 -3.1415927, %v429_v12  ;;  %v433_v39 = vmul.f32 %v4661_v1, %v176_v34 }
  0x45   : > { %v3082_v24 = vmul.f32 -1.442695, %v2826_v16  ;;  %v3083_v25 = vmul.f32 -1.442695, %v2827_v17  ;;  %v3084_v26 = vmul.f32 -1.442695, %v2828_v18  ;;  %v434_v40 = vmul.f32 %v4661_v1, %v177_v35  ;;  %p4462_p2 = pnand %p4461_p0, %p4455_p13 }
  0x46   : > { %v3085_v28 = vmul.f32 -1.442695, %v2829_v20  ;;  %v3086_v29 = vmul.f32 -1.442695, %v2830_v21  ;;  %v2832_v30 = vadd.f32 -3.1415927, %v430_v19  ;;  %v435_v41 = vmul.f32 %v4661_v1, %v178_v36 }
  0x47   : > { %3398 = vpow2.f32 %v3082_v24  ;;  %v2833_v31 = vadd.f32 -3.1415927, %v431_v23  ;;  %v2834_v32 = vadd.f32 -3.1415927, %v432_v27  ;;  %v3087_v33 = vmul.f32 -1.442695, %v2831_v22 }
  0x48   : > { %3400 = vpow2.f32 %v3083_v25  ;;  %v3088_v37 = vmul.f32 -1.442695, %v2832_v30  ;;  %v436_v44 = vmul.f32 %v4661_v1, %v179_v42  ;;  %v2835_v45 = vadd.f32 -3.1415927, %v433_v39  ;;  %v183_v5 = vld [vmem:[%s4654_s6 + $0x80] sm:$0xff]  ;;  %v186_v17 = vld [vmem:[%s4654_s6 + $0x98] sm:$0xff] }
  0x49   : > { %3402 = vpow2.f32 %v3084_v26  ;;  %v3089_v38 = vmul.f32 -1.442695, %v2833_v31  ;;  %v3090_v43 = vmul.f32 -1.442695, %v2834_v32  ;;  %v2836_v46 = vadd.f32 -3.1415927, %v434_v40 }
  0x4a   : > { %3404 = vpow2.f32 %v3085_v28  ;;  %v2837_v47 = vadd.f32 -3.1415927, %v435_v41  ;;  %v2838_v48 = vadd.f32 -3.1415927, %v436_v44  ;;  %v3091_v50 = vmul.f32 -1.442695, %v2835_v45 }
  0x4b   : > { %3406 = vpow2.f32 %v3086_v29  ;;  %v3092_v51 = vmul.f32 -1.442695, %v2836_v46  ;;  %v437_v56 = vmul.f32 %v4661_v1, %v180_v49  ;;  %v438_v59 = vmul.f32 %v4661_v1, %v181_v54  ;;  %v187_v22 = vld [vmem:[%s4654_s6 + $0xa0] sm:$0xff]  ;;  %v188_v27 = vld [vmem:[%s4654_s6 + $0xa8] sm:$0xff]  ;;  %v189_v32 = vld [vmem:[%s4654_s6 + $0xb0] sm:$0xff] }
  0x4c   : > { %3408 = vpow2.f32 %v3087_v33  ;;  %v3093_v52 = vmul.f32 -1.442695, %v2837_v47  ;;  %v3094_v53 = vmul.f32 -1.442695, %v2838_v48  ;;  %v439_v12 = vmul.f32 %v4661_v1, %v182_v0  ;;  %v191_v42 = vld [vmem:[%s4654_s6 + $0xc0] sm:$0xff]  ;;  %v192_v47 = vld [vmem:[%s4654_s6 + $0xc8] sm:$0xff] }
  0x4d   : > { %3410 = vpow2.f32 %v3088_v37  ;;  %v2839_v4 = vadd.f32 -3.1415927, %v437_v56  ;;  %v2840_v8 = vadd.f32 -3.1415927, %v438_v59  ;;  %v440_v16 = vmul.f32 %v4661_v1, %v183_v5  ;;  %v190_v37 = vld [vmem:[%s4654_s6 + $0xb8] sm:$0xff] }
  0x4e   : > { %3412 = vpow2.f32 %v3089_v38  ;;  %v441_v21 = vmul.f32 %v4661_v1, %v184_v9  ;;  %v442_v26 = vmul.f32 %v4661_v1, %v185_v13  ;;  %v2841_v30 = vadd.f32 -3.1415927, %v439_v12 }
  0x4f   : > { %3414 = vpow2.f32 %v3090_v43  ;;  %v3095_v20 = vmul.f32 -1.442695, %v2839_v4  ;;  %v3096_v25 = vmul.f32 -1.442695, %v2840_v8  ;;  %v443_v31 = vmul.f32 %v4661_v1, %v186_v17 }
  0x50   : > { %3416 = vpow2.f32 %v3091_v50  ;;  %v2842_v35 = vadd.f32 -3.1415927, %v440_v16  ;;  %v444_v36 = vmul.f32 %v4661_v1, %v187_v22  ;;  %v2843_v40 = vadd.f32 -3.1415927, %v441_v21 }
  0x51   : > { %v3399_v55 = vpop.eup %3398  ;;  %3418 = vpow2.f32 %v3092_v51  ;;  %v445_v41 = vmul.f32 %v4661_v1, %v188_v27  ;;  %v2844_v45 = vadd.f32 -3.1415927, %v442_v26  ;;  %v446_v46 = vmul.f32 %v4661_v1, %v189_v32  ;;  %v195_v26 = vld [vmem:[%s4654_s6 + $0xe0] sm:$0xff] }
  0x52   : > { %v3401_v57 = vpop.eup %3400  ;;  %v1704_v58 = vadd.f32 1.0, %v3399_v55  ;;  %3420 = vpow2.f32 %v3093_v52  ;;  %v3097_v49 = vmul.f32 -1.442695, %v2841_v30  ;;  %v2845_v50 = vadd.f32 -3.1415927, %v443_v31 }
  0x53   : > { %v3403_v60 = vpop.eup %3402  ;;  %v1705_v61 = vadd.f32 1.0, %v3401_v57  ;;  %3422 = vpow2.f32 %v3094_v53  ;;  %v447_v51 = vmul.f32 %v4661_v1, %v190_v37  ;;  %v3098_v53 = vmul.f32 -1.442695, %v2842_v35 }
  0x54   : > { %v3405_v62 = vpop.eup %3404  ;;  %3424 = vrcp.f32 %v1704_v58  ;;  %v1706_v63 = vadd.f32 1.0, %v3403_v60  ;;  %v2846_v54 = vadd.f32 -3.1415927, %v444_v36  ;;  %v448_v55 = vmul.f32 %v4661_v1, %v191_v42 }
  0x55   : > { %v3407_v2 = vpop.eup %3406  ;;  %3426 = vrcp.f32 %v1705_v61  ;;  %v1707_v3 = vadd.f32 1.0, %v3405_v62  ;;  %v3099_v57 = vmul.f32 -1.442695, %v2843_v40  ;;  %v2847_v58 = vadd.f32 -3.1415927, %v445_v41  ;;  %v198_v41 = vld [vmem:[%s4654_s6 + $0xf8] sm:$0xff] }
  0x56   : > { %v3409_v6 = vpop.eup %3408  ;;  %3428 = vrcp.f32 %v1706_v63  ;;  %v1708_v7 = vadd.f32 1.0, %v3407_v2  ;;  %v449_v59 = vmul.f32 %v4661_v1, %v192_v47  ;;  %v3100_v61 = vmul.f32 -1.442695, %v2844_v45  ;;  %v199_v45 = vld [vmem:[%s4654_s6 + $0x100] sm:$0xff] }
  0x57   : > { %v3411_v10 = vpop.eup %3410  ;;  %3430 = vrcp.f32 %v1707_v3  ;;  %v1709_v11 = vadd.f32 1.0, %v3409_v6  ;;  %v2848_v62 = vadd.f32 -3.1415927, %v446_v46  ;;  %v3101_v0 = vmul.f32 -1.442695, %v2845_v50  ;;  %v200_v50 = vld [vmem:[%s4654_s6 + $0x108] sm:$0xff] }
  0x58   : > { %v3413_v14 = vpop.eup %3412  ;;  %3432 = vrcp.f32 %v1708_v7  ;;  %v1710_v15 = vadd.f32 1.0, %v3411_v10  ;;  %v2849_v2 = vadd.f32 -3.1415927, %v447_v51  ;;  %v3102_v4 = vmul.f32 -1.442695, %v2846_v54 }
  0x59   : > { %v3415_v18 = vpop.eup %3414  ;;  %3434 = vrcp.f32 %v1709_v11  ;;  %v1711_v19 = vadd.f32 1.0, %v3413_v14  ;;  %v2850_v5 = vadd.f32 -3.1415927, %v448_v55  ;;  %v3103_v7 = vmul.f32 -1.442695, %v2847_v58  ;;  %v201_v55 = vld [vmem:[%s4654_s6 + $0x110] sm:$0xff] }
  0x5a   : > { %v3417_v23 = vpop.eup %3416  ;;  %3436 = vrcp.f32 %v1710_v15  ;;  %v1712_v24 = vadd.f32 1.0, %v3415_v18  ;;  %v2851_v8 = vadd.f32 -3.1415927, %v449_v59  ;;  %v3104_v10 = vmul.f32 -1.442695, %v2848_v62  ;;  %v193_v15 = vld [vmem:[%s4654_s6 + $0xd0] sm:$0xff] }
  0x5b   : > { %v3419_v28 = vpop.eup %3418  ;;  %3438 = vrcp.f32 %v1711_v19  ;;  %v1713_v29 = vadd.f32 1.0, %v3417_v23  ;;  %v3105_v12 = vmul.f32 -1.442695, %v2849_v2  ;;  %v3106_v14 = vmul.f32 -1.442695, %v2850_v5  ;;  %v194_v23 = vld [vmem:[%s4654_s6 + $0xd8] sm:$0xff] }
  0x5c   : > { %v3421_v33 = vpop.eup %3420  ;;  %3440 = vrcp.f32 %v1712_v24  ;;  %v1714_v34 = vadd.f32 1.0, %v3419_v28  ;;  %v3107_v17 = vmul.f32 -1.442695, %v2851_v8  ;;  %v452_v37 = vmul.f32 %v4661_v1, %v195_v26  ;;  %v203_v2 = vld [vmem:[%s4654_s6 + $0x120] sm:$0xff] }
  0x5d   : > { %v3423_v38 = vpop.eup %3422  ;;  %3442 = vrcp.f32 %v1713_v29  ;;  %v1715_v39 = vadd.f32 1.0, %v3421_v33  ;;  %v196_v29 = vld [vmem:[%s4654_s6 + $0xe8] sm:$0xff]  ;;  %v451_v33 = vmul.f32 %v4661_v1, %v194_v23  ;;  %v455_v54 = vmul.f32 %v4661_v1, %v198_v41 }
  0x5e   : > { %v3425_v43 = vpop.eup %3424  ;;  %3444 = vrcp.f32 %v1714_v34  ;;  %v1716_v44 = vadd.f32 1.0, %v3423_v38  ;;  %v197_v34 = vld [vmem:[%s4654_s6 + $0xf0] sm:$0xff]  ;;  %v453_v40 = vmul.f32 %v4661_v1, %v196_v29  ;;  %v456_v59 = vmul.f32 %v4661_v1, %v199_v45  ;;  %v206_v45 = vld [vmem:[%s4654_s6 + $0x138] sm:$0xff] }
  0x5f   : > { %v3427_v48 = vpop.eup %3426  ;;  %2472 = vst [vmem:[%s4713_s21] sm:$0xff] %v3425_v43  ;;  %3446 = vrcp.f32 %v1715_v39 }
  0x60   : > { %v3429_v52 = vpop.eup %3428  ;;  %2473 = vst [vmem:[%s4713_s21 + $0x8] sm:$0xff] %v3427_v48  ;;  %3448 = vrcp.f32 %v1716_v44  ;;  %v454_v44 = vmul.f32 %v4661_v1, %v197_v34  ;;  %v2855_v58 = vadd.f32 -3.1415927, %v453_v40 }
  0x61   : > { %v3431_v56 = vpop.eup %3430  ;;  %2474 = vst [vmem:[%s4713_s21 + $0x10] sm:$0xff] %v3429_v52  ;;  %3450 = vpow2.f32 %v3095_v20  ;;  %v450_v20 = vmul.f32 %v4661_v1, %v193_v15  ;;  %v2858_v15 = vadd.f32 -3.1415927, %v456_v59 }
  0x62   : > { %v3433_v60 = vpop.eup %3432  ;;  %2475 = vst [vmem:[%s4713_s21 + $0x18] sm:$0xff] %v3431_v56  ;;  %3452 = vpow2.f32 %v3096_v25 }
  0x63   : > { %v3435_v63 = vpop.eup %3434  ;;  %2476 = vst [vmem:[%s4713_s21 + $0x20] sm:$0xff] %v3433_v60  ;;  %3454 = vpow2.f32 %v3097_v49  ;;  %v2852_v32 = vadd.f32 -3.1415927, %v450_v20  ;;  %v2853_v49 = vadd.f32 -3.1415927, %v451_v33  ;;  %v202_v60 = vld [vmem:[%s4654_s6 + $0x118] sm:$0xff] }
  0x64   : > { %v3437_v3 = vpop.eup %3436  ;;  %2477 = vst [vmem:[%s4713_s21 + $0x28] sm:$0xff] %v3435_v63  ;;  %3456 = vpow2.f32 %v3098_v53  ;;  %v2854_v53 = vadd.f32 -3.1415927, %v452_v37  ;;  %v2856_v63 = vadd.f32 -3.1415927, %v454_v44 }
  0x65   : > { %v3439_v6 = vpop.eup %3438  ;;  %2478 = vst [vmem:[%s4713_s21 + $0x30] sm:$0xff] %v3437_v3  ;;  %3458 = vpow2.f32 %v3099_v57  ;;  %v3108_v48 = vmul.f32 -1.442695, %v2852_v32  ;;  %v3109_v5 = vmul.f32 -1.442695, %v2853_v49 }
  0x66   : > { %v3441_v9 = vpop.eup %3440  ;;  %2479 = vst [vmem:[%s4713_s21 + $0x38] sm:$0xff] %v3439_v6  ;;  %3460 = vpow2.f32 %v3100_v61  ;;  %v458_v6 = vmul.f32 %v4661_v1, %v201_v55  ;;  %v3114_v29 = vmul.f32 -1.442695, %v2858_v15  ;;  %v213_v15 = vld [vmem:[%s4654_s6 + $0x170] sm:$0xff] }
  0x67   : > { %v3443_v11 = vpop.eup %3442  ;;  %2480 = vst [vmem:[%s4713_s21 + $0x40] sm:$0xff] %v3441_v9  ;;  %3462 = vpow2.f32 %v3101_v0  ;;  %v457_v0 = vmul.f32 %v4661_v1, %v200_v50 }
  0x68   : > { %v3445_v13 = vpop.eup %3444  ;;  %2481 = vst [vmem:[%s4713_s21 + $0x48] sm:$0xff] %v3443_v11  ;;  %3464 = vpow2.f32 %v3102_v4  ;;  %v459_v11 = vmul.f32 %v4661_v1, %v202_v60  ;;  %v2860_v23 = vadd.f32 -3.1415927, %v458_v6  ;;  %v211_v6 = vld [vmem:[%s4654_s6 + $0x160] sm:$0xff] }
  0x69   : > { %v3447_v16 = vpop.eup %3446  ;;  %2482 = vst [vmem:[%s4713_s21 + $0x50] sm:$0xff] %v3445_v13  ;;  %3466 = vpow2.f32 %v3103_v7  ;;  %v204_v7 = vld [vmem:[%s4654_s6 + $0x128] sm:$0xff] }
  0x6a   : > { %v3449_v18 = vpop.eup %3448  ;;  %2483 = vst [vmem:[%s4713_s21 + $0x58] sm:$0xff] %v3447_v16  ;;  %3468 = vpow2.f32 %v3104_v10  ;;  %v2857_v10 = vadd.f32 -3.1415927, %v455_v54  ;;  %v460_v16 = vmul.f32 %v4661_v1, %v203_v2  ;;  %v461_v20 = vmul.f32 %v4661_v1, %v204_v7  ;;  %v210_v2 = vld [vmem:[%s4654_s6 + $0x158] sm:$0xff] }
  0x6b   : > { %v3451_v19 = vpop.eup %3450  ;;  %2484 = vst [vmem:[%s4713_s21 + $0x60] sm:$0xff] %v3449_v18  ;;  %3470 = vpow2.f32 %v3105_v12  ;;  %v205_v12 = vld [vmem:[%s4654_s6 + $0x130] sm:$0xff]  ;;  %v3111_v18 = vmul.f32 -1.442695, %v2855_v58 }
  0x6c   : > { %v3453_v21 = vpop.eup %3452  ;;  %v1717_v22 = vadd.f32 1.0, %v3451_v19  ;;  %3472 = vpow2.f32 %v3106_v14  ;;  %v3110_v14 = vmul.f32 -1.442695, %v2854_v53  ;;  %v2859_v19 = vadd.f32 -3.1415927, %v457_v0 }
  0x6d   : > { %v3455_v24 = vpop.eup %3454  ;;  %v1718_v25 = vadd.f32 1.0, %v3453_v21  ;;  %3474 = vpow2.f32 %v3107_v17  ;;  %v3113_v26 = vmul.f32 -1.442695, %v2857_v10  ;;  %v2863_v33 = vadd.f32 -3.1415927, %v461_v20  ;;  %v212_v10 = vld [vmem:[%s4654_s6 + $0x168] sm:$0xff] }
  0x6e   : > { %v3457_v27 = vpop.eup %3456  ;;  %3476 = vrcp.f32 %v1717_v22  ;;  %v1719_v28 = vadd.f32 1.0, %v3455_v24  ;;  %v3112_v22 = vmul.f32 -1.442695, %v2856_v63  ;;  %v462_v24 = vmul.f32 %v4661_v1, %v205_v12  ;;  %v214_v20 = vld [vmem:[%s4654_s6 + $0x178] sm:$0xff] }
  0x6f   : > { %v3459_v30 = vpop.eup %3458  ;;  %3478 = vrcp.f32 %v1718_v25  ;;  %v1720_v31 = vadd.f32 1.0, %v3457_v27  ;;  %v2861_v27 = vadd.f32 -3.1415927, %v459_v11  ;;  %v3115_v32 = vmul.f32 -1.442695, %v2859_v19 }
  0x70   : > { %v3461_v35 = vpop.eup %3460  ;;  %3480 = vrcp.f32 %v1719_v28  ;;  %v1721_v36 = vadd.f32 1.0, %v3459_v30  ;;  %v2862_v30 = vadd.f32 -3.1415927, %v460_v16  ;;  %v468_v19 = vmul.f32 %v4661_v1, %v211_v6 }
  0x71   : > { %v3463_v38 = vpop.eup %3462  ;;  %3482 = vrcp.f32 %v1720_v31  ;;  %v1722_v39 = vadd.f32 1.0, %v3461_v35  ;;  %v3116_v35 = vmul.f32 -1.442695, %v2860_v23 }
  0x72   : > { %v3465_v42 = vpop.eup %3464  ;;  %3484 = vrcp.f32 %v1721_v36  ;;  %v1723_v43 = vadd.f32 1.0, %v3463_v38  ;;  %v2864_v36 = vadd.f32 -3.1415927, %v462_v24  ;;  %v3117_v38 = vmul.f32 -1.442695, %v2861_v27 }
  0x73   : > { %v3467_v46 = vpop.eup %3466  ;;  %3486 = vrcp.f32 %v1722_v39  ;;  %v1724_v47 = vadd.f32 1.0, %v3465_v42  ;;  %v3118_v40 = vmul.f32 -1.442695, %v2862_v30  ;;  %v3119_v42 = vmul.f32 -1.442695, %v2863_v33  ;;  %v216_v30 = vld [vmem:[%s4654_s6 + $0x188] sm:$0xff] }
  0x74   : > { %v3469_v51 = vpop.eup %3468  ;;  %3488 = vrcp.f32 %v1723_v43  ;;  %v1725_v52 = vadd.f32 1.0, %v3467_v46  ;;  %v3120_v44 = vmul.f32 -1.442695, %v2864_v36  ;;  %v469_v24 = vmul.f32 %v4661_v1, %v212_v10 }
  0x75   : > { %v3471_v56 = vpop.eup %3470  ;;  %3490 = vrcp.f32 %v1724_v47  ;;  %v1726_v57 = vadd.f32 1.0, %v3469_v51  ;;  %v207_v47 = vld [vmem:[%s4654_s6 + $0x140] sm:$0xff]  ;;  %v463_v51 = vmul.f32 %v4661_v1, %v206_v45 }
  0x76   : > { %v3473_v61 = vpop.eup %3472  ;;  %3492 = vrcp.f32 %v1725_v52  ;;  %v1727_v62 = vadd.f32 1.0, %v3471_v56  ;;  %v208_v52 = vld [vmem:[%s4654_s6 + $0x148] sm:$0xff]  ;;  %v464_v55 = vmul.f32 %v4661_v1, %v207_v47 }
  0x77   : > { %v3475_v3 = vpop.eup %3474  ;;  %3494 = vrcp.f32 %v1726_v57  ;;  %v1728_v4 = vadd.f32 1.0, %v3473_v61  ;;  %v465_v60 = vmul.f32 %v4661_v1, %v208_v52  ;;  %v209_v61 = vld [vmem:[%s4654_s6 + $0x150] sm:$0xff]  ;;  %v2865_v0 = vadd.f32 -3.1415927, %v463_v51 }
  0x78   : > { %v3477_v8 = vpop.eup %3476  ;;  %3496 = vrcp.f32 %v1727_v62  ;;  %v1729_v9 = vadd.f32 1.0, %v3475_v3 }
  0x79   : > { %v3479_v13 = vpop.eup %3478  ;;  %2485 = vst [vmem:[%s4713_s21 + $0x68] sm:$0xff] %v3477_v8  ;;  %3498 = vrcp.f32 %v1728_v4 }
  0x7a   : > { %v3481_v17 = vpop.eup %3480  ;;  %2486 = vst [vmem:[%s4713_s21 + $0x70] sm:$0xff] %v3479_v13  ;;  %3500 = vrcp.f32 %v1729_v9  ;;  %v466_v9 = vmul.f32 %v4661_v1, %v209_v61  ;;  %v2867_v13 = vadd.f32 -3.1415927, %v465_v60 }
  0x7b   : > { %v3483_v21 = vpop.eup %3482  ;;  %2487 = vst [vmem:[%s4713_s21 + $0x78] sm:$0xff] %v3481_v17  ;;  %3502 = vpow2.f32 %v3108_v48 }
  0x7c   : > { %v3485_v25 = vpop.eup %3484  ;;  %2488 = vst [vmem:[%s4713_s21 + $0x80] sm:$0xff] %v3483_v21  ;;  %3504 = vpow2.f32 %v3109_v5  ;;  %v2866_v5 = vadd.f32 -3.1415927, %v464_v55 }
  0x7d   : > { %v3487_v28 = vpop.eup %3486  ;;  %2489 = vst [vmem:[%s4713_s21 + $0x88] sm:$0xff] %v3485_v25  ;;  %3506 = vpow2.f32 %v3110_v14  ;;  %v467_v14 = vmul.f32 %v4661_v1, %v210_v2  ;;  %v215_v25 = vld [vmem:[%s4654_s6 + $0x180] sm:$0xff] }
  0x7e   : > { %v3489_v31 = vpop.eup %3488  ;;  %2490 = vst [vmem:[%s4713_s21 + $0x90] sm:$0xff] %v3487_v28  ;;  %3508 = vpow2.f32 %v3111_v18  ;;  %v3121_v18 = vmul.f32 -1.442695, %v2865_v0  ;;  %v3122_v23 = vmul.f32 -1.442695, %v2866_v5 }
  0x7f   : > { %v3491_v34 = vpop.eup %3490  ;;  %2491 = vst [vmem:[%s4713_s21 + $0x98] sm:$0xff] %v3489_v31  ;;  %3510 = vpow2.f32 %v3112_v22  ;;  %v2868_v28 = vadd.f32 -3.1415927, %v466_v9  ;;  %v2869_v33 = vadd.f32 -3.1415927, %v467_v14 }
  0x80   : > { %v3493_v37 = vpop.eup %3492  ;;  %2492 = vst [vmem:[%s4713_s21 + $0xa0] sm:$0xff] %v3491_v34  ;;  %3512 = vpow2.f32 %v3113_v26  ;;  %v471_v34 = vmul.f32 %v4661_v1, %v214_v20 }
  0x81   : > { %v3495_v39 = vpop.eup %3494  ;;  %2493 = vst [vmem:[%s4713_s21 + $0xa8] sm:$0xff] %v3493_v37  ;;  %3514 = vpow2.f32 %v3114_v29  ;;  %v470_v29 = vmul.f32 %v4661_v1, %v213_v15 }
  0x82   : > { %v3497_v41 = vpop.eup %3496  ;;  %2494 = vst [vmem:[%s4713_s21 + $0xb0] sm:$0xff] %v3495_v39  ;;  %3516 = vpow2.f32 %v3115_v32  ;;  %v472_v39 = vmul.f32 %v4661_v1, %v215_v25  ;;  %v2873_v51 = vadd.f32 -3.1415927, %v471_v34  ;;  %v224_v34 = vld [vmem:[%s4654_s6 + $0x1c8] sm:$0xff] }
  0x83   : > { %v3499_v43 = vpop.eup %3498  ;;  %2495 = vst [vmem:[%s4713_s21 + $0xb8] sm:$0xff] %v3497_v41  ;;  %3518 = vpow2.f32 %v3116_v35  ;;  %v217_v35 = vld [vmem:[%s4654_s6 + $0x190] sm:$0xff]  ;;  %v2872_v47 = vadd.f32 -3.1415927, %v470_v29 }
  0x84   : > { %v3501_v46 = vpop.eup %3500  ;;  %2496 = vst [vmem:[%s4713_s21 + $0xc0] sm:$0xff] %v3499_v43  ;;  %3520 = vpow2.f32 %v3117_v38  ;;  %v2870_v38 = vadd.f32 -3.1415927, %v468_v19  ;;  %v2871_v43 = vadd.f32 -3.1415927, %v469_v24  ;;  %v221_v19 = vld [vmem:[%s4654_s6 + $0x1b0] sm:$0xff] }
  0x85   : > { %v3503_v48 = vpop.eup %3502  ;;  %2497 = vst [vmem:[%s4713_s21 + $0xc8] sm:$0xff] %v3501_v46  ;;  %3522 = vpow2.f32 %v3118_v40  ;;  %v218_v40 = vld [vmem:[%s4654_s6 + $0x198] sm:$0xff]  ;;  %v3124_v46 = vmul.f32 -1.442695, %v2868_v28  ;;  %v2874_v55 = vadd.f32 -3.1415927, %v472_v39 }
  0x86   : > { %v3505_v49 = vpop.eup %3504  ;;  %v1730_v50 = vadd.f32 1.0, %v3503_v48  ;;  %3524 = vpow2.f32 %v3119_v42  ;;  %v3123_v42 = vmul.f32 -1.442695, %v2867_v13  ;;  %v474_v48 = vmul.f32 %v4661_v1, %v217_v35 }
  0x87   : > { %v3507_v53 = vpop.eup %3506  ;;  %v1731_v54 = vadd.f32 1.0, %v3505_v49  ;;  %3526 = vpow2.f32 %v3120_v44  ;;  %v473_v44 = vmul.f32 %v4661_v1, %v216_v30  ;;  %v475_v52 = vmul.f32 %v4661_v1, %v218_v40 }
  0x88   : > { %v3509_v56 = vpop.eup %3508  ;;  %3528 = vrcp.f32 %v1730_v50  ;;  %v1732_v57 = vadd.f32 1.0, %v3507_v53  ;;  %v3125_v50 = vmul.f32 -1.442695, %v2869_v33  ;;  %v3128_v60 = vmul.f32 -1.442695, %v2872_v47 }
  0x89   : > { %v3511_v58 = vpop.eup %3510  ;;  %3530 = vrcp.f32 %v1731_v54  ;;  %v1733_v59 = vadd.f32 1.0, %v3509_v56  ;;  %v3126_v54 = vmul.f32 -1.442695, %v2870_v38  ;;  %v2876_v61 = vadd.f32 -3.1415927, %v474_v48  ;;  %v225_v38 = vld [vmem:[%s4654_s6 + $0x1d0] sm:$0xff] }
  0x8a   : > { %v3513_v62 = vpop.eup %3512  ;;  %3532 = vrcp.f32 %v1732_v57  ;;  %v1734_v63 = vadd.f32 1.0, %v3511_v58  ;;  %v3127_v57 = vmul.f32 -1.442695, %v2871_v43  ;;  %v2875_v58 = vadd.f32 -3.1415927, %v473_v44  ;;  %v226_v43 = vld [vmem:[%s4654_s6 + $0x1d8] sm:$0xff] }
  0x8b   : > { %v3515_v3 = vpop.eup %3514  ;;  %3534 = vrcp.f32 %v1733_v59  ;;  %v1735_v4 = vadd.f32 1.0, %v3513_v62  ;;  %v2877_v0 = vadd.f32 -3.1415927, %v475_v52  ;;  %v478_v30 = vmul.f32 %v4661_v1, %v221_v19  ;;  %v227_v48 = vld [vmem:[%s4654_s6 + $0x1e0] sm:$0xff] }
  0x8c   : > { %v3517_v7 = vpop.eup %3516  ;;  %3536 = vrcp.f32 %v1734_v63  ;;  %v1736_v8 = vadd.f32 1.0, %v3515_v3  ;;  %v3129_v63 = vmul.f32 -1.442695, %v2873_v51  ;;  %v3130_v3 = vmul.f32 -1.442695, %v2874_v55 }
  0x8d   : > { %v3519_v11 = vpop.eup %3518  ;;  %3538 = vrcp.f32 %v1735_v4  ;;  %v1737_v12 = vadd.f32 1.0, %v3517_v7  ;;  %v3131_v5 = vmul.f32 -1.442695, %v2875_v58  ;;  %v3132_v7 = vmul.f32 -1.442695, %v2876_v61  ;;  %v229_v58 = vld [vmem:[%s4654_s6 + $0x1f0] sm:$0xff] }
  0x8e   : > { %v3521_v16 = vpop.eup %3520  ;;  %3540 = vrcp.f32 %v1736_v8  ;;  %v1738_v17 = vadd.f32 1.0, %v3519_v11  ;;  %v219_v8 = vld [vmem:[%s4654_s6 + $0x1a0] sm:$0xff]  ;;  %v3133_v10 = vmul.f32 -1.442695, %v2877_v0  ;;  %v481_v47 = vmul.f32 %v4661_v1, %v224_v34 }
  0x8f   : > { %v3523_v21 = vpop.eup %3522  ;;  %3542 = vrcp.f32 %v1737_v12  ;;  %v1739_v22 = vadd.f32 1.0, %v3521_v16  ;;  %v476_v13 = vmul.f32 %v4661_v1, %v219_v8  ;;  %v220_v16 = vld [vmem:[%s4654_s6 + $0x1a8] sm:$0xff]  ;;  %v482_v52 = vmul.f32 %v4661_v1, %v225_v38 }
  0x90   : > { %v3525_v26 = vpop.eup %3524  ;;  %3544 = vrcp.f32 %v1738_v17  ;;  %v1740_v27 = vadd.f32 1.0, %v3523_v21 }
  0x91   : > { %v3527_v31 = vpop.eup %3526  ;;  %3546 = vrcp.f32 %v1739_v22  ;;  %v1741_v32 = vadd.f32 1.0, %v3525_v26  ;;  %v222_v22 = vld [vmem:[%s4654_s6 + $0x1b8] sm:$0xff]  ;;  %v2878_v25 = vadd.f32 -3.1415927, %v476_v13  ;;  %v477_v26 = vmul.f32 %v4661_v1, %v220_v16 }
  0x92   : > { %v3529_v36 = vpop.eup %3528  ;;  %3548 = vrcp.f32 %v1740_v27  ;;  %v1742_v37 = vadd.f32 1.0, %v3527_v31  ;;  %v223_v27 = vld [vmem:[%s4654_s6 + $0x1c0] sm:$0xff]  ;;  %v479_v33 = vmul.f32 %v4661_v1, %v222_v22  ;;  %v2884_v8 = vadd.f32 -3.1415927, %v482_v52 }
  0x93   : > { %v3531_v41 = vpop.eup %3530  ;;  %2498 = vst [vmem:[%s4713_s21 + $0xd0] sm:$0xff] %v3529_v36  ;;  %3550 = vrcp.f32 %v1741_v32 }
  0x94   : > { %v3533_v45 = vpop.eup %3532  ;;  %2499 = vst [vmem:[%s4713_s21 + $0xd8] sm:$0xff] %v3531_v41  ;;  %3552 = vrcp.f32 %v1742_v37  ;;  %v480_v37 = vmul.f32 %v4661_v1, %v223_v27  ;;  %v3134_v41 = vmul.f32 -1.442695, %v2878_v25  ;;  %v2881_v51 = vadd.f32 -3.1415927, %v479_v33 }
  0x95   : > { %v3535_v49 = vpop.eup %3534  ;;  %2500 = vst [vmem:[%s4713_s21 + $0xe0] sm:$0xff] %v3533_v45  ;;  %3554 = vpow2.f32 %v3121_v18  ;;  %v3140_v22 = vmul.f32 -1.442695, %v2884_v8  ;;  %v239_v8 = vld [vmem:[%s4654_s6 + $0x240] sm:$0xff] }
  0x96   : > { %v3537_v53 = vpop.eup %3536  ;;  %2501 = vst [vmem:[%s4713_s21 + $0xe8] sm:$0xff] %v3535_v49  ;;  %3556 = vpow2.f32 %v3122_v23 }
  0x97   : > { %v3539_v56 = vpop.eup %3538  ;;  %2502 = vst [vmem:[%s4713_s21 + $0xf0] sm:$0xff] %v3537_v53  ;;  %3558 = vpow2.f32 %v3123_v42  ;;  %v2879_v42 = vadd.f32 -3.1415927, %v477_v26  ;;  %v228_v53 = vld [vmem:[%s4654_s6 + $0x1e8] sm:$0xff] }
  0x98   : > { %v3541_v59 = vpop.eup %3540  ;;  %2503 = vst [vmem:[%s4713_s21 + $0xf8] sm:$0xff] %v3539_v56  ;;  %3560 = vpow2.f32 %v3124_v46  ;;  %v2880_v46 = vadd.f32 -3.1415927, %v478_v30  ;;  %v2882_v56 = vadd.f32 -3.1415927, %v480_v37 }
  0x99   : > { %v3543_v62 = vpop.eup %3542  ;;  %2504 = vst [vmem:[%s4713_s21 + $0x100] sm:$0xff] %v3541_v59  ;;  %3562 = vpow2.f32 %v3125_v50  ;;  %v3135_v61 = vmul.f32 -1.442695, %v2879_v42 }
  0x9a   : > { %v3545_v2 = vpop.eup %3544  ;;  %2505 = vst [vmem:[%s4713_s21 + $0x108] sm:$0xff] %v3543_v62  ;;  %3564 = vpow2.f32 %v3126_v54  ;;  %v484_v62 = vmul.f32 %v4661_v1, %v227_v48 }
  0x9b   : > { %v3547_v4 = vpop.eup %3546  ;;  %2506 = vst [vmem:[%s4713_s21 + $0x110] sm:$0xff] %v3545_v2  ;;  %3566 = vpow2.f32 %v3127_v57  ;;  %v483_v57 = vmul.f32 %v4661_v1, %v226_v43 }
  0x9c   : > { %v3549_v6 = vpop.eup %3548  ;;  %2507 = vst [vmem:[%s4713_s21 + $0x118] sm:$0xff] %v3547_v4  ;;  %3568 = vpow2.f32 %v3128_v60  ;;  %v485_v4 = vmul.f32 %v4661_v1, %v228_v53  ;;  %v2886_v16 = vadd.f32 -3.1415927, %v484_v62  ;;  %v237_v62 = vld [vmem:[%s4654_s6 + $0x230] sm:$0xff] }
  0x9d   : > { %v3551_v9 = vpop.eup %3550  ;;  %2508 = vst [vmem:[%s4713_s21 + $0x120] sm:$0xff] %v3549_v6  ;;  %3570 = vpow2.f32 %v3129_v63  ;;  %v230_v63 = vld [vmem:[%s4654_s6 + $0x1f8] sm:$0xff] }
  0x9e   : > { %v3553_v11 = vpop.eup %3552  ;;  %2509 = vst [vmem:[%s4713_s21 + $0x128] sm:$0xff] %v3551_v9  ;;  %3572 = vpow2.f32 %v3130_v3  ;;  %v2883_v3 = vadd.f32 -3.1415927, %v481_v47  ;;  %v486_v9 = vmul.f32 %v4661_v1, %v229_v58  ;;  %v487_v13 = vmul.f32 %v4661_v1, %v230_v63  ;;  %v236_v58 = vld [vmem:[%s4654_s6 + $0x228] sm:$0xff] }
  0x9f   : > { %v3555_v12 = vpop.eup %3554  ;;  %2510 = vst [vmem:[%s4713_s21 + $0x130] sm:$0xff] %v3553_v11  ;;  %3574 = vpow2.f32 %v3131_v5  ;;  %v231_v5 = vld [vmem:[%s4654_s6 + $0x200] sm:$0xff]  ;;  %v3137_v11 = vmul.f32 -1.442695, %v2881_v51 }
  0xa0   : > { %v3557_v14 = vpop.eup %3556  ;;  %v1743_v15 = vadd.f32 1.0, %v3555_v12  ;;  %3576 = vpow2.f32 %v3132_v7  ;;  %v3136_v7 = vmul.f32 -1.442695, %v2880_v46  ;;  %v2885_v12 = vadd.f32 -3.1415927, %v483_v57 }
  0xa1   : > { %v3559_v17 = vpop.eup %3558  ;;  %v1744_v18 = vadd.f32 1.0, %v3557_v14  ;;  %3578 = vpow2.f32 %v3133_v10  ;;  %v3139_v19 = vmul.f32 -1.442695, %v2883_v3  ;;  %v2889_v26 = vadd.f32 -3.1415927, %v487_v13  ;;  %v238_v3 = vld [vmem:[%s4654_s6 + $0x238] sm:$0xff] }
  0xa2   : > { %v3561_v20 = vpop.eup %3560  ;;  %3580 = vrcp.f32 %v1743_v15  ;;  %v1745_v21 = vadd.f32 1.0, %v3559_v17  ;;  %v3138_v15 = vmul.f32 -1.442695, %v2882_v56  ;;  %v488_v17 = vmul.f32 %v4661_v1, %v231_v5  ;;  %v240_v13 = vld [vmem:[%s4654_s6 + $0x248] sm:$0xff] }
  0xa3   : > { %v3563_v23 = vpop.eup %3562  ;;  %3582 = vrcp.f32 %v1744_v18  ;;  %v1746_v24 = vadd.f32 1.0, %v3561_v20  ;;  %v2887_v20 = vadd.f32 -3.1415927, %v485_v4  ;;  %v3141_v25 = vmul.f32 -1.442695, %v2885_v12 }
  0xa4   : > { %v3565_v28 = vpop.eup %3564  ;;  %3584 = vrcp.f32 %v1745_v21  ;;  %v1747_v29 = vadd.f32 1.0, %v3563_v23  ;;  %v2888_v23 = vadd.f32 -3.1415927, %v486_v9  ;;  %v494_v12 = vmul.f32 %v4661_v1, %v237_v62 }
  0xa5   : > { %v3567_v31 = vpop.eup %3566  ;;  %3586 = vrcp.f32 %v1746_v24  ;;  %v1748_v32 = vadd.f32 1.0, %v3565_v28  ;;  %v3142_v28 = vmul.f32 -1.442695, %v2886_v16 }
  0xa6   : > { %v3569_v35 = vpop.eup %3568  ;;  %3588 = vrcp.f32 %v1747_v29  ;;  %v1749_v36 = vadd.f32 1.0, %v3567_v31  ;;  %v2890_v29 = vadd.f32 -3.1415927, %v488_v17  ;;  %v3143_v31 = vmul.f32 -1.442695, %v2887_v20 }
  0xa7   : > { %v3571_v39 = vpop.eup %3570  ;;  %3590 = vrcp.f32 %v1748_v32  ;;  %v1750_v40 = vadd.f32 1.0, %v3569_v35  ;;  %v3144_v33 = vmul.f32 -1.442695, %v2888_v23  ;;  %v3145_v35 = vmul.f32 -1.442695, %v2889_v26  ;;  %v242_v23 = vld [vmem:[%s4654_s6 + $0x258] sm:$0xff] }
  0xa8   : > { %v3573_v44 = vpop.eup %3572  ;;  %3592 = vrcp.f32 %v1749_v36  ;;  %v1751_v45 = vadd.f32 1.0, %v3571_v39  ;;  %v232_v36 = vld [vmem:[%s4654_s6 + $0x208] sm:$0xff]  ;;  %v3146_v38 = vmul.f32 -1.442695, %v2890_v29  ;;  %v233_v39 = vld [vmem:[%s4654_s6 + $0x210] sm:$0xff]  ;;  %v495_v17 = vmul.f32 %v4661_v1, %v238_v3 }
  0xa9   : > { %v3575_v49 = vpop.eup %3574  ;;  %3594 = vrcp.f32 %v1750_v40  ;;  %v1752_v50 = vadd.f32 1.0, %v3573_v44  ;;  %v489_v42 = vmul.f32 %v4661_v1, %v232_v36 }
  0xaa   : > { %v3577_v54 = vpop.eup %3576  ;;  %3596 = vrcp.f32 %v1751_v45  ;;  %v1753_v55 = vadd.f32 1.0, %v3575_v49  ;;  %v490_v45 = vmul.f32 %v4661_v1, %v233_v39  ;;  %v2897_v36 = vadd.f32 -3.1415927, %v495_v17 }
  0xab   : > { %v3579_v59 = vpop.eup %3578  ;;  %3598 = vrcp.f32 %v1752_v50  ;;  %v1754_v60 = vadd.f32 1.0, %v3577_v54  ;;  %v234_v50 = vld [vmem:[%s4654_s6 + $0x218] sm:$0xff]  ;;  %v2891_v53 = vadd.f32 -3.1415927, %v489_v42  ;;  %v235_v54 = vld [vmem:[%s4654_s6 + $0x220] sm:$0xff] }
  0xac   : > { %v3581_v0 = vpop.eup %3580  ;;  %3600 = vrcp.f32 %v1753_v55  ;;  %v1755_v2 = vadd.f32 1.0, %v3579_v59  ;;  %v2892_v57 = vadd.f32 -3.1415927, %v490_v45 }
  0xad   : > { %v3583_v6 = vpop.eup %3582  ;;  %2511 = vst [vmem:[%s4713_s21 + $0x138] sm:$0xff] %v3581_v0  ;;  %3602 = vrcp.f32 %v1754_v60 }
  0xae   : > { %v3585_v10 = vpop.eup %3584  ;;  %2512 = vst [vmem:[%s4713_s21 + $0x140] sm:$0xff] %v3583_v6  ;;  %3604 = vrcp.f32 %v1755_v2  ;;  %v492_v2 = vmul.f32 %v4661_v1, %v235_v54  ;;  %v3147_v6 = vmul.f32 -1.442695, %v2891_v53 }
  0xaf   : > { %v3587_v14 = vpop.eup %3586  ;;  %2513 = vst [vmem:[%s4713_s21 + $0x148] sm:$0xff] %v3585_v10  ;;  %3606 = vpow2.f32 %v3134_v41 }
  0xb0   : > { %v3589_v18 = vpop.eup %3588  ;;  %2514 = vst [vmem:[%s4713_s21 + $0x150] sm:$0xff] %v3587_v14  ;;  %3608 = vpow2.f32 %v3135_v61  ;;  %v491_v61 = vmul.f32 %v4661_v1, %v234_v50  ;;  %v3153_v50 = vmul.f32 -1.442695, %v2897_v36  ;;  %v252_v36 = vld [vmem:[%s4654_s6 + $0x2a8] sm:$0xff] }
  0xb1   : > { %v3591_v21 = vpop.eup %3590  ;;  %2515 = vst [vmem:[%s4713_s21 + $0x158] sm:$0xff] %v3589_v18  ;;  %3610 = vpow2.f32 %v3136_v7  ;;  %v493_v7 = vmul.f32 %v4661_v1, %v236_v58  ;;  %v241_v18 = vld [vmem:[%s4654_s6 + $0x250] sm:$0xff] }
  0xb2   : > { %v3593_v24 = vpop.eup %3592  ;;  %2516 = vst [vmem:[%s4713_s21 + $0x160] sm:$0xff] %v3591_v21  ;;  %3612 = vpow2.f32 %v3137_v11  ;;  %v3148_v11 = vmul.f32 -1.442695, %v2892_v57  ;;  %v2893_v16 = vadd.f32 -3.1415927, %v491_v61 }
  0xb3   : > { %v3595_v27 = vpop.eup %3594  ;;  %2517 = vst [vmem:[%s4713_s21 + $0x168] sm:$0xff] %v3593_v24  ;;  %3614 = vpow2.f32 %v3138_v15  ;;  %v2894_v21 = vadd.f32 -3.1415927, %v492_v2  ;;  %v2895_v26 = vadd.f32 -3.1415927, %v493_v7 }
  0xb4   : > { %v3597_v30 = vpop.eup %3596  ;;  %2518 = vst [vmem:[%s4713_s21 + $0x170] sm:$0xff] %v3595_v27  ;;  %3616 = vpow2.f32 %v3139_v19  ;;  %v497_v27 = vmul.f32 %v4661_v1, %v240_v13 }
  0xb5   : > { %v3599_v32 = vpop.eup %3598  ;;  %2519 = vst [vmem:[%s4713_s21 + $0x178] sm:$0xff] %v3597_v30  ;;  %3618 = vpow2.f32 %v3140_v22  ;;  %v496_v22 = vmul.f32 %v4661_v1, %v239_v8  ;;  %v3150_v39 = vmul.f32 -1.442695, %v2894_v21 }
  0xb6   : > { %v3601_v34 = vpop.eup %3600  ;;  %2520 = vst [vmem:[%s4713_s21 + $0x180] sm:$0xff] %v3599_v32  ;;  %3620 = vpow2.f32 %v3141_v25  ;;  %v498_v32 = vmul.f32 %v4661_v1, %v241_v18 }
  0xb7   : > { %v3603_v37 = vpop.eup %3602  ;;  %2521 = vst [vmem:[%s4713_s21 + $0x188] sm:$0xff] %v3601_v34  ;;  %3622 = vpow2.f32 %v3142_v28  ;;  %v243_v28 = vld [vmem:[%s4654_s6 + $0x260] sm:$0xff] }
  0xb8   : > { %v3605_v40 = vpop.eup %3604  ;;  %2522 = vst [vmem:[%s4713_s21 + $0x190] sm:$0xff] %v3603_v37  ;;  %3624 = vpow2.f32 %v3143_v31  ;;  %v2896_v31 = vadd.f32 -3.1415927, %v494_v12  ;;  %v499_v37 = vmul.f32 %v4661_v1, %v242_v23  ;;  %v247_v12 = vld [vmem:[%s4654_s6 + $0x280] sm:$0xff] }
  0xb9   : > { %v3607_v41 = vpop.eup %3606  ;;  %2523 = vst [vmem:[%s4713_s21 + $0x198] sm:$0xff] %v3605_v40  ;;  %3626 = vpow2.f32 %v3144_v33  ;;  %v244_v33 = vld [vmem:[%s4654_s6 + $0x268] sm:$0xff]  ;;  %v2898_v40 = vadd.f32 -3.1415927, %v496_v22  ;;  %v504_v23 = vmul.f32 %v4661_v1, %v247_v12 }
  0xba   : > { %v3609_v43 = vpop.eup %3608  ;;  %v1756_v44 = vadd.f32 1.0, %v3607_v41  ;;  %3628 = vpow2.f32 %v3145_v35  ;;  %v3149_v35 = vmul.f32 -1.442695, %v2893_v16  ;;  %v500_v41 = vmul.f32 %v4661_v1, %v243_v28 }
  0xbb   : > { %v3611_v46 = vpop.eup %3610  ;;  %v1757_v47 = vadd.f32 1.0, %v3609_v43  ;;  %3630 = vpow2.f32 %v3146_v38  ;;  %v3151_v43 = vmul.f32 -1.442695, %v2895_v26  ;;  %v501_v45 = vmul.f32 %v4661_v1, %v244_v33 }
  0xbc   : > { %v3613_v48 = vpop.eup %3612  ;;  %3632 = vrcp.f32 %v1756_v44  ;;  %v1758_v49 = vadd.f32 1.0, %v3611_v46  ;;  %v2899_v44 = vadd.f32 -3.1415927, %v497_v27  ;;  %v3154_v53 = vmul.f32 -1.442695, %v2898_v40  ;;  %v250_v27 = vld [vmem:[%s4654_s6 + $0x298] sm:$0xff] }
  0xbd   : > { %v3615_v51 = vpop.eup %3614  ;;  %3634 = vrcp.f32 %v1757_v47  ;;  %v1759_v52 = vadd.f32 1.0, %v3613_v48  ;;  %v3152_v47 = vmul.f32 -1.442695, %v2896_v31  ;;  %v2900_v48 = vadd.f32 -3.1415927, %v498_v32  ;;  %v251_v31 = vld [vmem:[%s4654_s6 + $0x2a0] sm:$0xff] }
  0xbe   : > { %v3617_v55 = vpop.eup %3616  ;;  %3636 = vrcp.f32 %v1758_v49  ;;  %v1760_v56 = vadd.f32 1.0, %v3615_v51  ;;  %v2901_v51 = vadd.f32 -3.1415927, %v499_v37  ;;  %v2902_v54 = vadd.f32 -3.1415927, %v500_v41  ;;  %v253_v41 = vld [vmem:[%s4654_s6 + $0x2b0] sm:$0xff] }
  0xbf   : > { %v3619_v59 = vpop.eup %3618  ;;  %3638 = vrcp.f32 %v1759_v52  ;;  %v1761_v60 = vadd.f32 1.0, %v3617_v55  ;;  %v2903_v57 = vadd.f32 -3.1415927, %v501_v45  ;;  %v507_v40 = vmul.f32 %v4661_v1, %v250_v27 }
  0xc0   : > { %v3621_v63 = vpop.eup %3620  ;;  %3640 = vrcp.f32 %v1760_v56  ;;  %v1762_v0 = vadd.f32 1.0, %v3619_v59  ;;  %v3155_v56 = vmul.f32 -1.442695, %v2899_v44  ;;  %v3156_v59 = vmul.f32 -1.442695, %v2900_v48 }
  0xc1   : > { %v3623_v4 = vpop.eup %3622  ;;  %3642 = vrcp.f32 %v1761_v60  ;;  %v1763_v5 = vadd.f32 1.0, %v3621_v63  ;;  %v3157_v61 = vmul.f32 -1.442695, %v2901_v51  ;;  %v3158_v63 = vmul.f32 -1.442695, %v2902_v54  ;;  %v255_v51 = vld [vmem:[%s4654_s6 + $0x2c0] sm:$0xff] }
  0xc2   : > { %v3625_v9 = vpop.eup %3624  ;;  %3644 = vrcp.f32 %v1762_v0  ;;  %v1764_v10 = vadd.f32 1.0, %v3623_v4  ;;  %v245_v0 = vld [vmem:[%s4654_s6 + $0x270] sm:$0xff]  ;;  %v3159_v3 = vmul.f32 -1.442695, %v2903_v57  ;;  %v508_v45 = vmul.f32 %v4661_v1, %v251_v31  ;;  %v258_v31 = vld [vmem:[%s4654_s6 + $0x2d8] sm:$0xff] }
  0xc3   : > { %v3627_v14 = vpop.eup %3626  ;;  %3646 = vrcp.f32 %v1763_v5  ;;  %v1765_v15 = vadd.f32 1.0, %v3625_v9  ;;  %v246_v9 = vld [vmem:[%s4654_s6 + $0x278] sm:$0xff] }
  0xc4   : > { %v3629_v19 = vpop.eup %3628  ;;  %3648 = vrcp.f32 %v1764_v10  ;;  %v1766_v20 = vadd.f32 1.0, %v3627_v14 }
  0xc5   : > { %v3631_v24 = vpop.eup %3630  ;;  %3650 = vrcp.f32 %v1765_v15  ;;  %v1767_v25 = vadd.f32 1.0, %v3629_v19  ;;  %v248_v15 = vld [vmem:[%s4654_s6 + $0x288] sm:$0xff]  ;;  %v503_v19 = vmul.f32 %v4661_v1, %v246_v9 }
  0xc6   : > { %v3633_v29 = vpop.eup %3632  ;;  %3652 = vrcp.f32 %v1766_v20  ;;  %v1768_v30 = vadd.f32 1.0, %v3631_v24  ;;  %v249_v20 = vld [vmem:[%s4654_s6 + $0x290] sm:$0xff]  ;;  %v505_v26 = vmul.f32 %v4661_v1, %v248_v15 }
  0xc7   : > { %v3635_v34 = vpop.eup %3634  ;;  %2524 = vst [vmem:[%s4713_s21 + $0x1a0] sm:$0xff] %v3633_v29  ;;  %3654 = vrcp.f32 %v1767_v25 }
  0xc8   : > { %v3637_v38 = vpop.eup %3636  ;;  %2525 = vst [vmem:[%s4713_s21 + $0x1a8] sm:$0xff] %v3635_v34  ;;  %3656 = vrcp.f32 %v1768_v30  ;;  %v506_v30 = vmul.f32 %v4661_v1, %v249_v20  ;;  %v2907_v44 = vadd.f32 -3.1415927, %v505_v26 }
  0xc9   : > { %v3639_v42 = vpop.eup %3638  ;;  %2526 = vst [vmem:[%s4713_s21 + $0x1b0] sm:$0xff] %v3637_v38  ;;  %3658 = vpow2.f32 %v3147_v6  ;;  %v502_v6 = vmul.f32 %v4661_v1, %v245_v0  ;;  %v2910_v0 = vadd.f32 -3.1415927, %v508_v45 }
  0xca   : > { %v3641_v46 = vpop.eup %3640  ;;  %2527 = vst [vmem:[%s4713_s21 + $0x1b8] sm:$0xff] %v3639_v42  ;;  %3660 = vpow2.f32 %v3148_v11 }
  0xcb   : > { %v3643_v49 = vpop.eup %3642  ;;  %2528 = vst [vmem:[%s4713_s21 + $0x1c0] sm:$0xff] %v3641_v46  ;;  %3662 = vpow2.f32 %v3149_v35  ;;  %v2904_v18 = vadd.f32 -3.1415927, %v502_v6  ;;  %v2905_v35 = vadd.f32 -3.1415927, %v503_v19  ;;  %v254_v46 = vld [vmem:[%s4654_s6 + $0x2b8] sm:$0xff] }
  0xcc   : > { %v3645_v52 = vpop.eup %3644  ;;  %2529 = vst [vmem:[%s4713_s21 + $0x1c8] sm:$0xff] %v3643_v49  ;;  %3664 = vpow2.f32 %v3150_v39  ;;  %v2906_v39 = vadd.f32 -3.1415927, %v504_v23  ;;  %v2908_v49 = vadd.f32 -3.1415927, %v506_v30 }
  0xcd   : > { %v3647_v55 = vpop.eup %3646  ;;  %2530 = vst [vmem:[%s4713_s21 + $0x1d0] sm:$0xff] %v3645_v52  ;;  %3666 = vpow2.f32 %v3151_v43  ;;  %v3160_v34 = vmul.f32 -1.442695, %v2904_v18  ;;  %v3161_v54 = vmul.f32 -1.442695, %v2905_v35 }
  0xce   : > { %v3649_v58 = vpop.eup %3648  ;;  %2531 = vst [vmem:[%s4713_s21 + $0x1d8] sm:$0xff] %v3647_v55  ;;  %3668 = vpow2.f32 %v3152_v47  ;;  %v510_v55 = vmul.f32 %v4661_v1, %v253_v41  ;;  %v3166_v15 = vmul.f32 -1.442695, %v2910_v0  ;;  %v265_v0 = vld [vmem:[%s4654_s6 + $0x310] sm:$0xff] }
  0xcf   : > { %v3651_v60 = vpop.eup %3650  ;;  %2532 = vst [vmem:[%s4713_s21 + $0x1e0] sm:$0xff] %v3649_v58  ;;  %3670 = vpow2.f32 %v3153_v50  ;;  %v509_v50 = vmul.f32 %v4661_v1, %v252_v36 }
  0xd0   : > { %v3653_v62 = vpop.eup %3652  ;;  %2533 = vst [vmem:[%s4713_s21 + $0x1e8] sm:$0xff] %v3651_v60  ;;  %3672 = vpow2.f32 %v3154_v53  ;;  %v511_v60 = vmul.f32 %v4661_v1, %v254_v46  ;;  %v2912_v9 = vadd.f32 -3.1415927, %v510_v55 }
  0xd1   : > { %v3655_v2 = vpop.eup %3654  ;;  %2534 = vst [vmem:[%s4713_s21 + $0x1f0] sm:$0xff] %v3653_v62  ;;  %3674 = vpow2.f32 %v3155_v56  ;;  %v256_v56 = vld [vmem:[%s4654_s6 + $0x2c8] sm:$0xff] }
  0xd2   : > { %v3657_v4 = vpop.eup %3656  ;;  %2535 = vst [vmem:[%s4713_s21 + $0x1f8] sm:$0xff] %v3655_v2  ;;  %3676 = vpow2.f32 %v3156_v59  ;;  %v2909_v59 = vadd.f32 -3.1415927, %v507_v40  ;;  %v512_v2 = vmul.f32 %v4661_v1, %v255_v51  ;;  %v513_v6 = vmul.f32 %v4661_v1, %v256_v56  ;;  %v260_v40 = vld [vmem:[%s4654_s6 + $0x2e8] sm:$0xff]  ;;  %v262_v51 = vld [vmem:[%s4654_s6 + $0x2f8] sm:$0xff] }
  0xd3   : > { %v3659_v5 = vpop.eup %3658  ;;  %2536 = vst [vmem:[%s4713_s21 + $0x200] sm:$0xff] %v3657_v4  ;;  %3678 = vpow2.f32 %v3157_v61  ;;  %v257_v61 = vld [vmem:[%s4654_s6 + $0x2d0] sm:$0xff]  ;;  %v3163_v4 = vmul.f32 -1.442695, %v2907_v44 }
  0xd4   : > { %v3661_v7 = vpop.eup %3660  ;;  %v1769_v8 = vadd.f32 1.0, %v3659_v5  ;;  %3680 = vpow2.f32 %v3158_v63  ;;  %v3162_v63 = vmul.f32 -1.442695, %v2906_v39  ;;  %v2911_v5 = vadd.f32 -3.1415927, %v509_v50  ;;  %v261_v44 = vld [vmem:[%s4654_s6 + $0x2f0] sm:$0xff] }
  0xd5   : > { %v3663_v10 = vpop.eup %3662  ;;  %v1770_v11 = vadd.f32 1.0, %v3661_v7  ;;  %3682 = vpow2.f32 %v3159_v3  ;;  %v3165_v12 = vmul.f32 -1.442695, %v2909_v59  ;;  %v2915_v19 = vadd.f32 -3.1415927, %v513_v6  ;;  %v264_v59 = vld [vmem:[%s4654_s6 + $0x308] sm:$0xff] }
  0xd6   : > { %v3665_v13 = vpop.eup %3664  ;;  %3684 = vrcp.f32 %v1769_v8  ;;  %v1771_v14 = vadd.f32 1.0, %v3663_v10  ;;  %v3164_v8 = vmul.f32 -1.442695, %v2908_v49  ;;  %v514_v10 = vmul.f32 %v4661_v1, %v257_v61  ;;  %v266_v6 = vld [vmem:[%s4654_s6 + $0x318] sm:$0xff] }
  0xd7   : > { %v3667_v16 = vpop.eup %3666  ;;  %3686 = vrcp.f32 %v1770_v11  ;;  %v1772_v17 = vadd.f32 1.0, %v3665_v13  ;;  %v2913_v13 = vadd.f32 -3.1415927, %v511_v60  ;;  %v3167_v18 = vmul.f32 -1.442695, %v2911_v5 }
  0xd8   : > { %v3669_v21 = vpop.eup %3668  ;;  %3688 = vrcp.f32 %v1771_v14  ;;  %v1773_v22 = vadd.f32 1.0, %v3667_v16  ;;  %v2914_v16 = vadd.f32 -3.1415927, %v512_v2  ;;  %v517_v50 = vmul.f32 %v4661_v1, %v260_v40 }
  0xd9   : > { %v3671_v24 = vpop.eup %3670  ;;  %3690 = vrcp.f32 %v1772_v17  ;;  %v1774_v25 = vadd.f32 1.0, %v3669_v21  ;;  %v3168_v21 = vmul.f32 -1.442695, %v2912_v9  ;;  %v518_v55 = vmul.f32 %v4661_v1, %v261_v44 }
  0xda   : > { %v3673_v28 = vpop.eup %3672  ;;  %3692 = vrcp.f32 %v1773_v22  ;;  %v1775_v29 = vadd.f32 1.0, %v3671_v24  ;;  %v2916_v22 = vadd.f32 -3.1415927, %v514_v10  ;;  %v3169_v24 = vmul.f32 -1.442695, %v2913_v13 }
  0xdb   : > { %v3675_v32 = vpop.eup %3674  ;;  %3694 = vrcp.f32 %v1774_v25  ;;  %v1776_v33 = vadd.f32 1.0, %v3673_v28  ;;  %v3170_v26 = vmul.f32 -1.442695, %v2914_v16  ;;  %v3171_v28 = vmul.f32 -1.442695, %v2915_v19  ;;  %v268_v16 = vld [vmem:[%s4654_s6 + $0x328] sm:$0xff] }
  0xdc   : > { %v3677_v37 = vpop.eup %3676  ;;  %3696 = vrcp.f32 %v1775_v29  ;;  %v1777_v38 = vadd.f32 1.0, %v3675_v32  ;;  %v3172_v30 = vmul.f32 -1.442695, %v2916_v22  ;;  %v2919_v5 = vadd.f32 -3.1415927, %v517_v50 }
  0xdd   : > { %v3679_v42 = vpop.eup %3678  ;;  %3698 = vrcp.f32 %v1776_v33  ;;  %v1778_v43 = vadd.f32 1.0, %v3677_v37  ;;  %v515_v37 = vmul.f32 %v4661_v1, %v258_v31  ;;  %v2920_v9 = vadd.f32 -3.1415927, %v518_v55 }
  0xde   : > { %v3681_v47 = vpop.eup %3680  ;;  %3700 = vrcp.f32 %v1777_v38  ;;  %v1779_v48 = vadd.f32 1.0, %v3679_v42  ;;  %v521_v10 = vmul.f32 %v4661_v1, %v264_v59 }
  0xdf   : > { %v3683_v52 = vpop.eup %3682  ;;  %3702 = vrcp.f32 %v1778_v43  ;;  %v1780_v53 = vadd.f32 1.0, %v3681_v47  ;;  %v2917_v49 = vadd.f32 -3.1415927, %v515_v37 }
  0xe0   : > { %v3685_v57 = vpop.eup %3684  ;;  %3704 = vrcp.f32 %v1779_v48  ;;  %v1781_v58 = vadd.f32 1.0, %v3683_v52  ;;  %v263_v52 = vld [vmem:[%s4654_s6 + $0x300] sm:$0xff] }
  0xe1   : > { %v3687_v62 = vpop.eup %3686  ;;  %2537 = vst [vmem:[%s4713_s21 + $0x208] sm:$0xff] %v3685_v57  ;;  %3706 = vrcp.f32 %v1780_v53 }
  0xe2   : > { %v3689_v3 = vpop.eup %3688  ;;  %2538 = vst [vmem:[%s4713_s21 + $0x210] sm:$0xff] %v3687_v62  ;;  %3708 = vrcp.f32 %v1781_v58  ;;  %v519_v62 = vmul.f32 %v4661_v1, %v262_v51 }
  0xe3   : > { %v3691_v7 = vpop.eup %3690  ;;  %2539 = vst [vmem:[%s4713_s21 + $0x218] sm:$0xff] %v3689_v3  ;;  %3710 = vpow2.f32 %v3160_v34  ;;  %v259_v34 = vld [vmem:[%s4654_s6 + $0x2e0] sm:$0xff] }
  0xe4   : > { %v3693_v11 = vpop.eup %3692  ;;  %2540 = vst [vmem:[%s4713_s21 + $0x220] sm:$0xff] %v3691_v7  ;;  %3712 = vpow2.f32 %v3161_v54  ;;  %v516_v43 = vmul.f32 %v4661_v1, %v259_v34  ;;  %v2921_v19 = vadd.f32 -3.1415927, %v519_v62 }
  0xe5   : > { %v3695_v14 = vpop.eup %3694  ;;  %2541 = vst [vmem:[%s4713_s21 + $0x228] sm:$0xff] %v3693_v11  ;;  %3714 = vpow2.f32 %v3162_v63  ;;  %v520_v63 = vmul.f32 %v4661_v1, %v263_v52  ;;  %v267_v11 = vld [vmem:[%s4654_s6 + $0x320] sm:$0xff] }
  0xe6   : > { %v3697_v17 = vpop.eup %3696  ;;  %2542 = vst [vmem:[%s4713_s21 + $0x230] sm:$0xff] %v3695_v14  ;;  %3716 = vpow2.f32 %v3163_v4  ;;  %v2918_v58 = vadd.f32 -3.1415927, %v516_v43  ;;  %v3173_v4 = vmul.f32 -1.442695, %v2917_v49 }
  0xe7   : > { %v3699_v20 = vpop.eup %3698  ;;  %2543 = vst [vmem:[%s4713_s21 + $0x238] sm:$0xff] %v3697_v17  ;;  %3718 = vpow2.f32 %v3164_v8 }
  0xe8   : > { %v3701_v23 = vpop.eup %3700  ;;  %2544 = vst [vmem:[%s4713_s21 + $0x240] sm:$0xff] %v3699_v20  ;;  %3720 = vpow2.f32 %v3165_v12  ;;  %v3174_v14 = vmul.f32 -1.442695, %v2918_v58  ;;  %v523_v20 = vmul.f32 %v4661_v1, %v266_v6  ;;  %v273_v6 = vld [vmem:[%s4654_s6 + $0x350] sm:$0xff] }
  0xe9   : > { %v3703_v25 = vpop.eup %3702  ;;  %2545 = vst [vmem:[%s4713_s21 + $0x248] sm:$0xff] %v3701_v23  ;;  %3722 = vpow2.f32 %v3166_v15  ;;  %v522_v15 = vmul.f32 %v4661_v1, %v265_v0 }
  0xea   : > { %v3705_v27 = vpop.eup %3704  ;;  %2546 = vst [vmem:[%s4713_s21 + $0x250] sm:$0xff] %v3703_v25  ;;  %3724 = vpow2.f32 %v3167_v18  ;;  %v524_v25 = vmul.f32 %v4661_v1, %v267_v11  ;;  %v2925_v37 = vadd.f32 -3.1415927, %v523_v20  ;;  %v276_v20 = vld [vmem:[%s4654_s6 + $0x368] sm:$0xff] }
  0xeb   : > { %v3707_v29 = vpop.eup %3706  ;;  %2547 = vst [vmem:[%s4713_s21 + $0x258] sm:$0xff] %v3705_v27  ;;  %3726 = vpow2.f32 %v3168_v21  ;;  %v269_v21 = vld [vmem:[%s4654_s6 + $0x330] sm:$0xff] }
  0xec   : > { %v3709_v32 = vpop.eup %3708  ;;  %2548 = vst [vmem:[%s4713_s21 + $0x260] sm:$0xff] %v3707_v29  ;;  %3728 = vpow2.f32 %v3169_v24  ;;  %v2922_v24 = vadd.f32 -3.1415927, %v520_v63  ;;  %v2923_v29 = vadd.f32 -3.1415927, %v521_v10  ;;  %v526_v34 = vmul.f32 %v4661_v1, %v269_v21 }
  0xed   : > { %v3711_v33 = vpop.eup %3710  ;;  %2549 = vst [vmem:[%s4713_s21 + $0x268] sm:$0xff] %v3709_v32  ;;  %3730 = vpow2.f32 %v3170_v26  ;;  %v270_v26 = vld [vmem:[%s4654_s6 + $0x338] sm:$0xff]  ;;  %v3176_v32 = vmul.f32 -1.442695, %v2920_v9  ;;  %v3181_v49 = vmul.f32 -1.442695, %v2925_v37 }
  0xee   : > { %v3713_v35 = vpop.eup %3712  ;;  %v1782_v36 = vadd.f32 1.0, %v3711_v33  ;;  %3732 = vpow2.f32 %v3171_v28  ;;  %v3175_v28 = vmul.f32 -1.442695, %v2919_v5  ;;  %v2924_v33 = vadd.f32 -3.1415927, %v522_v15 }
  0xef   : > { %v3715_v38 = vpop.eup %3714  ;;  %v1783_v39 = vadd.f32 1.0, %v3713_v35  ;;  %3734 = vpow2.f32 %v3172_v30  ;;  %v525_v30 = vmul.f32 %v4661_v1, %v268_v16  ;;  %v3178_v40 = vmul.f32 -1.442695, %v2922_v24  ;;  %v275_v16 = vld [vmem:[%s4654_s6 + $0x360] sm:$0xff]  ;;  %v277_v24 = vld [vmem:[%s4654_s6 + $0x370] sm:$0xff] }
  0xf0   : > { %v3717_v41 = vpop.eup %3716  ;;  %3736 = vrcp.f32 %v1782_v36  ;;  %v1784_v42 = vadd.f32 1.0, %v3715_v38  ;;  %v3177_v36 = vmul.f32 -1.442695, %v2921_v19  ;;  %v527_v38 = vmul.f32 %v4661_v1, %v270_v26 }
  0xf1   : > { %v3719_v45 = vpop.eup %3718  ;;  %3738 = vrcp.f32 %v1783_v39  ;;  %v1785_v46 = vadd.f32 1.0, %v3717_v41  ;;  %v2926_v41 = vadd.f32 -3.1415927, %v524_v25  ;;  %v3179_v43 = vmul.f32 -1.442695, %v2923_v29  ;;  %v278_v29 = vld [vmem:[%s4654_s6 + $0x378] sm:$0xff] }
  0xf2   : > { %v3721_v47 = vpop.eup %3720  ;;  %3740 = vrcp.f32 %v1784_v42  ;;  %v1786_v48 = vadd.f32 1.0, %v3719_v45  ;;  %v2927_v44 = vadd.f32 -3.1415927, %v525_v30  ;;  %v2929_v50 = vadd.f32 -3.1415927, %v527_v38 }
  0xf3   : > { %v3723_v53 = vpop.eup %3722  ;;  %3742 = vrcp.f32 %v1785_v46  ;;  %v1787_v54 = vadd.f32 1.0, %v3721_v47  ;;  %v3180_v46 = vmul.f32 -1.442695, %v2924_v33  ;;  %v2928_v47 = vadd.f32 -3.1415927, %v526_v34  ;;  %v279_v34 = vld [vmem:[%s4654_s6 + $0x380] sm:$0xff] }
  0xf4   : > { %v3725_v56 = vpop.eup %3724  ;;  %3744 = vrcp.f32 %v1786_v48  ;;  %v1788_v57 = vadd.f32 1.0, %v3723_v53  ;;  %v3182_v52 = vmul.f32 -1.442695, %v2926_v41  ;;  %v3185_v59 = vmul.f32 -1.442695, %v2929_v50 }
  0xf5   : > { %v3727_v60 = vpop.eup %3726  ;;  %3746 = vrcp.f32 %v1787_v54  ;;  %v1789_v61 = vadd.f32 1.0, %v3725_v56  ;;  %v3183_v54 = vmul.f32 -1.442695, %v2927_v44  ;;  %v3184_v56 = vmul.f32 -1.442695, %v2928_v47  ;;  %v281_v44 = vld [vmem:[%s4654_s6 + $0x390] sm:$0xff] }
  0xf6   : > { %v3729_v2 = vpop.eup %3728  ;;  %3748 = vrcp.f32 %v1788_v57  ;;  %v1790_v3 = vadd.f32 1.0, %v3727_v60  ;;  %v271_v57 = vld [vmem:[%s4654_s6 + $0x340] sm:$0xff]  ;;  %v530_v15 = vmul.f32 %v4661_v1, %v273_v6  ;;  %v533_v33 = vmul.f32 %v4661_v1, %v276_v20 }
  0xf7   : > { %v3731_v7 = vpop.eup %3730  ;;  %3750 = vrcp.f32 %v1789_v61  ;;  %v1791_v8 = vadd.f32 1.0, %v3729_v2  ;;  %v272_v61 = vld [vmem:[%s4654_s6 + $0x348] sm:$0xff]  ;;  %v528_v63 = vmul.f32 %v4661_v1, %v271_v57  ;;  %v534_v38 = vmul.f32 %v4661_v1, %v277_v24 }
  0xf8   : > { %v3733_v12 = vpop.eup %3732  ;;  %3752 = vrcp.f32 %v1790_v3  ;;  %v1792_v13 = vadd.f32 1.0, %v3731_v7  ;;  %v529_v5 = vmul.f32 %v4661_v1, %v272_v61 }
  0xf9   : > { %v3735_v17 = vpop.eup %3734  ;;  %3754 = vrcp.f32 %v1791_v8  ;;  %v1793_v18 = vadd.f32 1.0, %v3733_v12  ;;  %v2930_v11 = vadd.f32 -3.1415927, %v528_v63  ;;  %v274_v12 = vld [vmem:[%s4654_s6 + $0x358] sm:$0xff]  ;;  %v2936_v57 = vadd.f32 -3.1415927, %v534_v38 }
  0xfa   : > { %v3737_v22 = vpop.eup %3736  ;;  %3756 = vrcp.f32 %v1792_v13  ;;  %v1794_v23 = vadd.f32 1.0, %v3735_v17  ;;  %v2931_v19 = vadd.f32 -3.1415927, %v529_v5 }
  0xfb   : > { %v3739_v27 = vpop.eup %3738  ;;  %2550 = vst [vmem:[%s4713_s21 + $0x270] sm:$0xff] %v3737_v22  ;;  %3758 = vrcp.f32 %v1793_v18 }
  0xfc   : > { %v3741_v31 = vpop.eup %3740  ;;  %2551 = vst [vmem:[%s4713_s21 + $0x278] sm:$0xff] %v3739_v27  ;;  %3760 = vrcp.f32 %v1794_v23  ;;  %v531_v23 = vmul.f32 %v4661_v1, %v274_v12  ;;  %v3186_v27 = vmul.f32 -1.442695, %v2930_v11  ;;  %v3187_v37 = vmul.f32 -1.442695, %v2931_v19 }
  0xfd   : > { %v3743_v35 = vpop.eup %3742  ;;  %2552 = vst [vmem:[%s4713_s21 + $0x280] sm:$0xff] %v3741_v31  ;;  %3762 = vpow2.f32 %v3173_v4 }
  0xfe   : > { %v3745_v39 = vpop.eup %3744  ;;  %2553 = vst [vmem:[%s4713_s21 + $0x288] sm:$0xff] %v3743_v35  ;;  %3764 = vpow2.f32 %v3174_v14 }
  0xff   : > { %v3747_v42 = vpop.eup %3746  ;;  %2554 = vst [vmem:[%s4713_s21 + $0x290] sm:$0xff] %v3745_v39  ;;  %3766 = vpow2.f32 %v3175_v28  ;;  %v532_v28 = vmul.f32 %v4661_v1, %v275_v16  ;;  %v280_v39 = vld [vmem:[%s4654_s6 + $0x388] sm:$0xff] }
 0x100   : > { %v3749_v45 = vpop.eup %3748  ;;  %2555 = vst [vmem:[%s4713_s21 + $0x298] sm:$0xff] %v3747_v42  ;;  %3768 = vpow2.f32 %v3176_v32  ;;  %v2932_v32 = vadd.f32 -3.1415927, %v530_v15  ;;  %v2933_v42 = vadd.f32 -3.1415927, %v531_v23 }
 0x101   : > { %v3751_v48 = vpop.eup %3750  ;;  %2556 = vst [vmem:[%s4713_s21 + $0x2a0] sm:$0xff] %v3749_v45  ;;  %3770 = vpow2.f32 %v3177_v36  ;;  %v2934_v47 = vadd.f32 -3.1415927, %v532_v28 }
 0x102   : > { %v3753_v51 = vpop.eup %3752  ;;  %2557 = vst [vmem:[%s4713_s21 + $0x2a8] sm:$0xff] %v3751_v48  ;;  %3772 = vpow2.f32 %v3178_v40  ;;  %v536_v48 = vmul.f32 %v4661_v1, %v279_v34  ;;  %v286_v34 = vld [vmem:[%s4654_s6 + $0x3b8] sm:$0xff] }
 0x103   : > { %v3755_v53 = vpop.eup %3754  ;;  %2558 = vst [vmem:[%s4713_s21 + $0x2b0] sm:$0xff] %v3753_v51  ;;  %3774 = vpow2.f32 %v3179_v43  ;;  %v535_v43 = vmul.f32 %v4661_v1, %v278_v29 }
 0x104   : > { %v3757_v55 = vpop.eup %3756  ;;  %2559 = vst [vmem:[%s4713_s21 + $0x2b8] sm:$0xff] %v3755_v53  ;;  %3776 = vpow2.f32 %v3180_v46  ;;  %v537_v53 = vmul.f32 %v4661_v1, %v280_v39 }
 0x105   : > { %v3759_v58 = vpop.eup %3758  ;;  %2560 = vst [vmem:[%s4713_s21 + $0x2c0] sm:$0xff] %v3757_v55  ;;  %3778 = vpow2.f32 %v3181_v49  ;;  %v282_v49 = vld [vmem:[%s4654_s6 + $0x398] sm:$0xff]  ;;  %v2937_v61 = vadd.f32 -3.1415927, %v535_v43  ;;  %v543_v43 = vmul.f32 %v4661_v1, %v286_v34 }
 0x106   : > { %v3761_v60 = vpop.eup %3760  ;;  %2561 = vst [vmem:[%s4713_s21 + $0x2c8] sm:$0xff] %v3759_v58  ;;  %3780 = vpow2.f32 %v3182_v52  ;;  %v2935_v52 = vadd.f32 -3.1415927, %v533_v33  ;;  %v538_v58 = vmul.f32 %v4661_v1, %v281_v44  ;;  %v2939_v6 = vadd.f32 -3.1415927, %v537_v53  ;;  %v288_v44 = vld [vmem:[%s4654_s6 + $0x3c8] sm:$0xff] }
 0x107   : > { %v3763_v62 = vpop.eup %3762  ;;  %2562 = vst [vmem:[%s4713_s21 + $0x2d0] sm:$0xff] %v3761_v60  ;;  %3782 = vpow2.f32 %v3183_v54  ;;  %v283_v54 = vld [vmem:[%s4654_s6 + $0x3a0] sm:$0xff]  ;;  %v3189_v60 = vmul.f32 -1.442695, %v2933_v42  ;;  %v3193_v11 = vmul.f32 -1.442695, %v2937_v61 }
 0x108   : > { %v3765_v0 = vpop.eup %3764  ;;  %v1795_v2 = vadd.f32 1.0, %v3763_v62  ;;  %3784 = vpow2.f32 %v3184_v56  ;;  %v3188_v56 = vmul.f32 -1.442695, %v2932_v32  ;;  %v539_v62 = vmul.f32 %v4661_v1, %v282_v49 }
 0x109   : > { %v3767_v3 = vpop.eup %3766  ;;  %v1796_v4 = vadd.f32 1.0, %v3765_v0  ;;  %3786 = vpow2.f32 %v3185_v59  ;;  %v3190_v0 = vmul.f32 -1.442695, %v2934_v47  ;;  %v3191_v5 = vmul.f32 -1.442695, %v2935_v52  ;;  %v290_v52 = vld [vmem:[%s4654_s6 + $0x3d8] sm:$0xff] }
 0x10a   : > { %v3769_v7 = vpop.eup %3768  ;;  %3788 = vrcp.f32 %v1795_v2  ;;  %v1797_v8 = vadd.f32 1.0, %v3767_v3  ;;  %v2938_v2 = vadd.f32 -3.1415927, %v536_v48  ;;  %v540_v3 = vmul.f32 %v4661_v1, %v283_v54  ;;  %v289_v48 = vld [vmem:[%s4654_s6 + $0x3d0] sm:$0xff] }
 0x10b   : > { %v3771_v9 = vpop.eup %3770  ;;  %3790 = vrcp.f32 %v1796_v4  ;;  %v1798_v10 = vadd.f32 1.0, %v3769_v7  ;;  %v2941_v12 = vadd.f32 -3.1415927, %v539_v62  ;;  %v546_v61 = vmul.f32 %v4661_v1, %v289_v48  ;;  %v292_v62 = vld [vmem:[%s4654_s6 + $0x3e8] sm:$0xff] }
 0x10c   : > { %v3773_v13 = vpop.eup %3772  ;;  %3792 = vrcp.f32 %v1797_v8  ;;  %v1799_v14 = vadd.f32 1.0, %v3771_v9  ;;  %v3192_v8 = vmul.f32 -1.442695, %v2936_v57  ;;  %v2940_v9 = vadd.f32 -3.1415927, %v538_v58  ;;  %v291_v57 = vld [vmem:[%s4654_s6 + $0x3e0] sm:$0xff] }
 0x10d   : > { %v3775_v17 = vpop.eup %3774  ;;  %3794 = vrcp.f32 %v1798_v10  ;;  %v1800_v18 = vadd.f32 1.0, %v3773_v13  ;;  %v2942_v15 = vadd.f32 -3.1415927, %v540_v3  ;;  %v547_v3 = vmul.f32 %v4661_v1, %v290_v52 }
 0x10e   : > { %v3777_v21 = vpop.eup %3776  ;;  %3796 = vrcp.f32 %v1799_v14  ;;  %v1801_v22 = vadd.f32 1.0, %v3775_v17  ;;  %v3194_v14 = vmul.f32 -1.442695, %v2938_v2  ;;  %v3195_v17 = vmul.f32 -1.442695, %v2939_v6 }
 0x10f   : > { %v3779_v25 = vpop.eup %3778  ;;  %3798 = vrcp.f32 %v1800_v18  ;;  %v1802_v26 = vadd.f32 1.0, %v3777_v21  ;;  %v3196_v19 = vmul.f32 -1.442695, %v2940_v9  ;;  %v3197_v21 = vmul.f32 -1.442695, %v2941_v12  ;;  %v294_v9 = vld [vmem:[%s4654_s6 + $0x3f8] sm:$0xff] }
 0x110   : > { %v3781_v30 = vpop.eup %3780  ;;  %3800 = vrcp.f32 %v1801_v22  ;;  %v1803_v31 = vadd.f32 1.0, %v3779_v25  ;;  %v284_v22 = vld [vmem:[%s4654_s6 + $0x3a8] sm:$0xff]  ;;  %v3198_v24 = vmul.f32 -1.442695, %v2942_v15 }
 0x111   : > { %v3783_v35 = vpop.eup %3782  ;;  %3802 = vrcp.f32 %v1802_v26  ;;  %v1804_v36 = vadd.f32 1.0, %v3781_v30  ;;  %v285_v26 = vld [vmem:[%s4654_s6 + $0x3b0] sm:$0xff]  ;;  %v541_v28 = vmul.f32 %v4661_v1, %v284_v22  ;;  %v2949_v22 = vadd.f32 -3.1415927, %v547_v3 }
 0x112   : > { %v3785_v40 = vpop.eup %3784  ;;  %3804 = vrcp.f32 %v1803_v31  ;;  %v1805_v41 = vadd.f32 1.0, %v3783_v35  ;;  %v542_v33 = vmul.f32 %v4661_v1, %v285_v26 }
 0x113   : > { %v3787_v45 = vpop.eup %3786  ;;  %3806 = vrcp.f32 %v1804_v36  ;;  %v1806_v46 = vadd.f32 1.0, %v3785_v40  ;;  %v2943_v39 = vadd.f32 -3.1415927, %v541_v28  ;;  %v287_v40 = vld [vmem:[%s4654_s6 + $0x3c0] sm:$0xff] }
 0x114   : > { %v3789_v50 = vpop.eup %3788  ;;  %3808 = vrcp.f32 %v1805_v41  ;;  %v1807_v51 = vadd.f32 1.0, %v3787_v45  ;;  %v2944_v47 = vadd.f32 -3.1415927, %v542_v33 }
 0x115   : > { %v3791_v55 = vpop.eup %3790  ;;  %2563 = vst [vmem:[%s4713_s21 + $0x2d8] sm:$0xff] %v3789_v50  ;;  %3810 = vrcp.f32 %v1806_v46 }
 0x116   : > { %v3793_v59 = vpop.eup %3792  ;;  %2564 = vst [vmem:[%s4713_s21 + $0x2e0] sm:$0xff] %v3791_v55  ;;  %3812 = vrcp.f32 %v1807_v51  ;;  %v544_v51 = vmul.f32 %v4661_v1, %v287_v40  ;;  %v3199_v55 = vmul.f32 -1.442695, %v2943_v39  ;;  %v3200_v2 = vmul.f32 -1.442695, %v2944_v47 }
 0x117   : > { %v3795_v63 = vpop.eup %3794  ;;  %2565 = vst [vmem:[%s4713_s21 + $0x2e8] sm:$0xff] %v3793_v59  ;;  %3814 = vpow2.f32 %v3186_v27 }
 0x118   : > { %v3797_v4 = vpop.eup %3796  ;;  %2566 = vst [vmem:[%s4713_s21 + $0x2f0] sm:$0xff] %v3795_v63  ;;  %3816 = vpow2.f32 %v3187_v37 }
 0x119   : > { %v3799_v7 = vpop.eup %3798  ;;  %2567 = vst [vmem:[%s4713_s21 + $0x2f8] sm:$0xff] %v3797_v4  ;;  %3818 = vpow2.f32 %v3188_v56  ;;  %v545_v56 = vmul.f32 %v4661_v1, %v288_v44  ;;  %v293_v4 = vld [vmem:[%s4654_s6 + $0x3f0] sm:$0xff] }
 0x11a   : > { %v3801_v10 = vpop.eup %3800  ;;  %2568 = vst [vmem:[%s4713_s21 + $0x300] sm:$0xff] %v3799_v7  ;;  %3820 = vpow2.f32 %v3189_v60  ;;  %v2945_v60 = vadd.f32 -3.1415927, %v543_v43  ;;  %v2946_v7 = vadd.f32 -3.1415927, %v544_v51 }
 0x11b   : > { %v3803_v13 = vpop.eup %3802  ;;  %2569 = vst [vmem:[%s4713_s21 + $0x308] sm:$0xff] %v3801_v10  ;;  %3822 = vpow2.f32 %v3190_v0  ;;  %v2947_v12 = vadd.f32 -3.1415927, %v545_v56 }
 0x11c   : > { %v3805_v16 = vpop.eup %3804  ;;  %2570 = vst [vmem:[%s4713_s21 + $0x310] sm:$0xff] %v3803_v13  ;;  %3824 = vpow2.f32 %v3191_v5  ;;  %v549_v13 = vmul.f32 %v4661_v1, %v292_v62 }
 0x11d   : > { %v3807_v18 = vpop.eup %3806  ;;  %2571 = vst [vmem:[%s4713_s21 + $0x318] sm:$0xff] %v3805_v16  ;;  %3826 = vpow2.f32 %v3192_v8  ;;  %v548_v8 = vmul.f32 %v4661_v1, %v291_v57 }
 0x11e   : > { %v3809_v20 = vpop.eup %3808  ;;  %2572 = vst [vmem:[%s4713_s21 + $0x320] sm:$0xff] %v3807_v18  ;;  %3828 = vpow2.f32 %v3193_v11  ;;  %v550_v18 = vmul.f32 %v4661_v1, %v293_v4 }
 0x11f   : > { %v3811_v23 = vpop.eup %3810  ;;  %2573 = vst [vmem:[%s4713_s21 + $0x328] sm:$0xff] %v3809_v20  ;;  %3830 = vpow2.f32 %v3194_v14  ;;  %v295_v14 = vld [vmem:[%s4654_s6 + $0x400] sm:$0xff]  ;;  %v2950_v26 = vadd.f32 -3.1415927, %v548_v8 }
 0x120   : > { %v3813_v25 = vpop.eup %3812  ;;  %2574 = vst [vmem:[%s4713_s21 + $0x330] sm:$0xff] %v3811_v23  ;;  %3832 = vpow2.f32 %v3195_v17  ;;  %v2948_v17 = vadd.f32 -3.1415927, %v546_v61  ;;  %v551_v23 = vmul.f32 %v4661_v1, %v294_v9  ;;  %v2952_v34 = vadd.f32 -3.1415927, %v550_v18  ;;  %v301_v9 = vld [vmem:[%s4654_s6 + $0x430] sm:$0xff] }
 0x121   : > { %v3815_v27 = vpop.eup %3814  ;;  %2575 = vst [vmem:[%s4713_s21 + $0x338] sm:$0xff] %v3813_v25  ;;  %3834 = vpow2.f32 %v3196_v19  ;;  %v296_v19 = vld [vmem:[%s4654_s6 + $0x408] sm:$0xff]  ;;  %v3202_v25 = vmul.f32 -1.442695, %v2946_v7  ;;  %v3206_v39 = vmul.f32 -1.442695, %v2950_v26 }
 0x122   : > { %v3817_v29 = vpop.eup %3816  ;;  %v1808_v30 = vadd.f32 1.0, %v3815_v27  ;;  %3836 = vpow2.f32 %v3197_v21  ;;  %v3201_v21 = vmul.f32 -1.442695, %v2945_v60  ;;  %v552_v27 = vmul.f32 %v4661_v1, %v295_v14 }
 0x123   : > { %v3819_v31 = vpop.eup %3818  ;;  %v1809_v32 = vadd.f32 1.0, %v3817_v29  ;;  %3838 = vpow2.f32 %v3198_v24  ;;  %v3203_v29 = vmul.f32 -1.442695, %v2947_v12  ;;  %v3204_v33 = vmul.f32 -1.442695, %v2948_v17  ;;  %v303_v17 = vld [vmem:[%s4654_s6 + $0x440] sm:$0xff] }
 0x124   : > { %v3821_v35 = vpop.eup %3820  ;;  %3840 = vrcp.f32 %v1808_v30  ;;  %v1810_v36 = vadd.f32 1.0, %v3819_v31  ;;  %v2951_v30 = vadd.f32 -3.1415927, %v549_v13  ;;  %v553_v31 = vmul.f32 %v4661_v1, %v296_v19  ;;  %v302_v13 = vld [vmem:[%s4654_s6 + $0x438] sm:$0xff] }
 0x125   : > { %v3823_v37 = vpop.eup %3822  ;;  %3842 = vrcp.f32 %v1809_v32  ;;  %v1811_v38 = vadd.f32 1.0, %v3821_v35  ;;  %v2954_v40 = vadd.f32 -3.1415927, %v552_v27  ;;  %v559_v26 = vmul.f32 %v4661_v1, %v302_v13  ;;  %v305_v27 = vld [vmem:[%s4654_s6 + $0x450] sm:$0xff] }
 0x126   : > { %v3825_v41 = vpop.eup %3824  ;;  %3844 = vrcp.f32 %v1810_v36  ;;  %v1812_v42 = vadd.f32 1.0, %v3823_v37  ;;  %v3205_v36 = vmul.f32 -1.442695, %v2949_v22  ;;  %v2953_v37 = vadd.f32 -3.1415927, %v551_v23  ;;  %v304_v22 = vld [vmem:[%s4654_s6 + $0x448] sm:$0xff] }
 0x127   : > { %v3827_v45 = vpop.eup %3826  ;;  %3846 = vrcp.f32 %v1811_v38  ;;  %v1813_v46 = vadd.f32 1.0, %v3825_v41  ;;  %v2955_v43 = vadd.f32 -3.1415927, %v553_v31  ;;  %v560_v31 = vmul.f32 %v4661_v1, %v303_v17 }
 0x128   : > { %v3829_v49 = vpop.eup %3828  ;;  %3848 = vrcp.f32 %v1812_v42  ;;  %v1814_v50 = vadd.f32 1.0, %v3827_v45  ;;  %v3207_v42 = vmul.f32 -1.442695, %v2951_v30  ;;  %v3208_v45 = vmul.f32 -1.442695, %v2952_v34 }
 0x129   : > { %v3831_v53 = vpop.eup %3830  ;;  %3850 = vrcp.f32 %v1813_v46  ;;  %v1815_v54 = vadd.f32 1.0, %v3829_v49  ;;  %v3209_v47 = vmul.f32 -1.442695, %v2953_v37  ;;  %v3210_v49 = vmul.f32 -1.442695, %v2954_v40  ;;  %v307_v37 = vld [vmem:[%s4654_s6 + $0x460] sm:$0xff] }
 0x12a   : > { %v3833_v58 = vpop.eup %3832  ;;  %3852 = vrcp.f32 %v1814_v50  ;;  %v1816_v59 = vadd.f32 1.0, %v3831_v53  ;;  %v297_v50 = vld [vmem:[%s4654_s6 + $0x410] sm:$0xff]  ;;  %v3211_v52 = vmul.f32 -1.442695, %v2955_v43  ;;  %v298_v53 = vld [vmem:[%s4654_s6 + $0x418] sm:$0xff] }
 0x12b   : > { %v3835_v63 = vpop.eup %3834  ;;  %3854 = vrcp.f32 %v1815_v54  ;;  %v1817_v0 = vadd.f32 1.0, %v3833_v58  ;;  %v554_v56 = vmul.f32 %v4661_v1, %v297_v50  ;;  %v2962_v50 = vadd.f32 -3.1415927, %v560_v31 }
 0x12c   : > { %v3837_v5 = vpop.eup %3836  ;;  %3856 = vrcp.f32 %v1816_v59  ;;  %v1818_v6 = vadd.f32 1.0, %v3835_v63  ;;  %v555_v59 = vmul.f32 %v4661_v1, %v298_v53 }
 0x12d   : > { %v3839_v10 = vpop.eup %3838  ;;  %3858 = vrcp.f32 %v1817_v0  ;;  %v1819_v11 = vadd.f32 1.0, %v3837_v5  ;;  %v299_v0 = vld [vmem:[%s4654_s6 + $0x420] sm:$0xff]  ;;  %v2956_v4 = vadd.f32 -3.1415927, %v554_v56  ;;  %v300_v5 = vld [vmem:[%s4654_s6 + $0x428] sm:$0xff] }
 0x12e   : > { %v3841_v15 = vpop.eup %3840  ;;  %3860 = vrcp.f32 %v1818_v6  ;;  %v1820_v16 = vadd.f32 1.0, %v3839_v10  ;;  %v2957_v8 = vadd.f32 -3.1415927, %v555_v59  ;;  %v556_v12 = vmul.f32 %v4661_v1, %v299_v0 }
 0x12f   : > { %v3843_v20 = vpop.eup %3842  ;;  %2576 = vst [vmem:[%s4713_s21 + $0x340] sm:$0xff] %v3841_v15  ;;  %3862 = vrcp.f32 %v1819_v11  ;;  %v3218_v0 = vmul.f32 -1.442695, %v2962_v50  ;;  %v317_v50 = vld [vmem:[%s4654_s6 + $0x4b0] sm:$0xff] }
 0x130   : > { %v3845_v24 = vpop.eup %3844  ;;  %2577 = vst [vmem:[%s4713_s21 + $0x348] sm:$0xff] %v3843_v20  ;;  %3864 = vrcp.f32 %v1820_v16  ;;  %v557_v16 = vmul.f32 %v4661_v1, %v300_v5  ;;  %v3212_v20 = vmul.f32 -1.442695, %v2956_v4  ;;  %v2958_v30 = vadd.f32 -3.1415927, %v556_v12 }
 0x131   : > { %v3847_v28 = vpop.eup %3846  ;;  %2578 = vst [vmem:[%s4713_s21 + $0x350] sm:$0xff] %v3845_v24  ;;  %3866 = vpow2.f32 %v3199_v55 }
 0x132   : > { %v3849_v32 = vpop.eup %3848  ;;  %2579 = vst [vmem:[%s4713_s21 + $0x358] sm:$0xff] %v3847_v28  ;;  %3868 = vpow2.f32 %v3200_v2 }
 0x133   : > { %v3851_v35 = vpop.eup %3850  ;;  %2580 = vst [vmem:[%s4713_s21 + $0x360] sm:$0xff] %v3849_v32  ;;  %3870 = vpow2.f32 %v3201_v21  ;;  %v558_v21 = vmul.f32 %v4661_v1, %v301_v9  ;;  %v306_v32 = vld [vmem:[%s4654_s6 + $0x458] sm:$0xff] }
 0x134   : > { %v3853_v38 = vpop.eup %3852  ;;  %2581 = vst [vmem:[%s4713_s21 + $0x368] sm:$0xff] %v3851_v35  ;;  %3872 = vpow2.f32 %v3202_v25  ;;  %v3213_v25 = vmul.f32 -1.442695, %v2957_v8  ;;  %v2959_v35 = vadd.f32 -3.1415927, %v557_v16 }
 0x135   : > { %v3855_v41 = vpop.eup %3854  ;;  %2582 = vst [vmem:[%s4713_s21 + $0x370] sm:$0xff] %v3853_v38  ;;  %3874 = vpow2.f32 %v3203_v29  ;;  %v2960_v40 = vadd.f32 -3.1415927, %v558_v21 }
 0x136   : > { %v3857_v44 = vpop.eup %3856  ;;  %2583 = vst [vmem:[%s4713_s21 + $0x378] sm:$0xff] %v3855_v41  ;;  %3876 = vpow2.f32 %v3204_v33  ;;  %v562_v41 = vmul.f32 %v4661_v1, %v305_v27  ;;  %v3215_v53 = vmul.f32 -1.442695, %v2959_v35  ;;  %v312_v27 = vld [vmem:[%s4654_s6 + $0x488] sm:$0xff] }
 0x137   : > { %v3859_v46 = vpop.eup %3858  ;;  %2584 = vst [vmem:[%s4713_s21 + $0x380] sm:$0xff] %v3857_v44  ;;  %3878 = vpow2.f32 %v3205_v36  ;;  %v561_v36 = vmul.f32 %v4661_v1, %v304_v22 }
 0x138   : > { %v3861_v48 = vpop.eup %3860  ;;  %2585 = vst [vmem:[%s4713_s21 + $0x388] sm:$0xff] %v3859_v46  ;;  %3880 = vpow2.f32 %v3206_v39  ;;  %v563_v46 = vmul.f32 %v4661_v1, %v306_v32 }
 0x139   : > { %v3863_v51 = vpop.eup %3862  ;;  %2586 = vst [vmem:[%s4713_s21 + $0x390] sm:$0xff] %v3861_v48  ;;  %3882 = vpow2.f32 %v3207_v42  ;;  %v308_v42 = vld [vmem:[%s4654_s6 + $0x468] sm:$0xff] }
 0x13a   : > { %v3865_v54 = vpop.eup %3864  ;;  %2587 = vst [vmem:[%s4713_s21 + $0x398] sm:$0xff] %v3863_v51  ;;  %3884 = vpow2.f32 %v3208_v45  ;;  %v2961_v45 = vadd.f32 -3.1415927, %v559_v26  ;;  %v564_v51 = vmul.f32 %v4661_v1, %v307_v37  ;;  %v314_v37 = vld [vmem:[%s4654_s6 + $0x498] sm:$0xff] }
 0x13b   : > { %v3867_v55 = vpop.eup %3866  ;;  %2588 = vst [vmem:[%s4713_s21 + $0x3a0] sm:$0xff] %v3865_v54  ;;  %3886 = vpow2.f32 %v3209_v47  ;;  %v309_v47 = vld [vmem:[%s4654_s6 + $0x470] sm:$0xff]  ;;  %v2963_v54 = vadd.f32 -3.1415927, %v561_v36  ;;  %v569_v36 = vmul.f32 %v4661_v1, %v312_v27 }
 0x13c   : > { %v3869_v57 = vpop.eup %3868  ;;  %v1821_v58 = vadd.f32 1.0, %v3867_v55  ;;  %3888 = vpow2.f32 %v3210_v49  ;;  %v3214_v49 = vmul.f32 -1.442695, %v2958_v30  ;;  %v565_v55 = vmul.f32 %v4661_v1, %v308_v42 }
 0x13d   : > { %v3871_v60 = vpop.eup %3870  ;;  %v1822_v61 = vadd.f32 1.0, %v3869_v57  ;;  %3890 = vpow2.f32 %v3211_v52  ;;  %v3216_v57 = vmul.f32 -1.442695, %v2960_v40  ;;  %v566_v59 = vmul.f32 %v4661_v1, %v309_v47 }
 0x13e   : > { %v3873_v62 = vpop.eup %3872  ;;  %3892 = vrcp.f32 %v1821_v58  ;;  %v1823_v63 = vadd.f32 1.0, %v3871_v60  ;;  %v2964_v58 = vadd.f32 -3.1415927, %v562_v41  ;;  %v3219_v4 = vmul.f32 -1.442695, %v2963_v54  ;;  %v315_v41 = vld [vmem:[%s4654_s6 + $0x4a0] sm:$0xff] }
 0x13f   : > { %v3875_v2 = vpop.eup %3874  ;;  %3894 = vrcp.f32 %v1822_v61  ;;  %v1824_v3 = vadd.f32 1.0, %v3873_v62  ;;  %v3217_v61 = vmul.f32 -1.442695, %v2961_v45  ;;  %v2965_v62 = vadd.f32 -3.1415927, %v563_v46  ;;  %v316_v45 = vld [vmem:[%s4654_s6 + $0x4a8] sm:$0xff] }
 0x140   : > { %v3877_v6 = vpop.eup %3876  ;;  %3896 = vrcp.f32 %v1823_v63  ;;  %v1825_v7 = vadd.f32 1.0, %v3875_v2  ;;  %v2966_v2 = vadd.f32 -3.1415927, %v564_v51  ;;  %v2967_v5 = vadd.f32 -3.1415927, %v565_v55  ;;  %v318_v55 = vld [vmem:[%s4654_s6 + $0x4b8] sm:$0xff] }
 0x141   : > { %v3879_v10 = vpop.eup %3878  ;;  %3898 = vrcp.f32 %v1824_v3  ;;  %v1826_v11 = vadd.f32 1.0, %v3877_v6  ;;  %v2968_v8 = vadd.f32 -3.1415927, %v566_v59  ;;  %v572_v54 = vmul.f32 %v4661_v1, %v315_v41 }
 0x142   : > { %v3881_v14 = vpop.eup %3880  ;;  %3900 = vrcp.f32 %v1825_v7  ;;  %v1827_v15 = vadd.f32 1.0, %v3879_v10  ;;  %v3220_v7 = vmul.f32 -1.442695, %v2964_v58  ;;  %v3221_v10 = vmul.f32 -1.442695, %v2965_v62 }
 0x143   : > { %v3883_v18 = vpop.eup %3882  ;;  %3902 = vrcp.f32 %v1826_v11  ;;  %v1828_v19 = vadd.f32 1.0, %v3881_v14  ;;  %v3222_v12 = vmul.f32 -1.442695, %v2966_v2  ;;  %v3223_v14 = vmul.f32 -1.442695, %v2967_v5  ;;  %v320_v2 = vld [vmem:[%s4654_s6 + $0x4c8] sm:$0xff] }
 0x144   : > { %v3885_v23 = vpop.eup %3884  ;;  %3904 = vrcp.f32 %v1827_v15  ;;  %v1829_v24 = vadd.f32 1.0, %v3883_v18  ;;  %v310_v15 = vld [vmem:[%s4654_s6 + $0x478] sm:$0xff]  ;;  %v3224_v17 = vmul.f32 -1.442695, %v2968_v8  ;;  %v573_v59 = vmul.f32 %v4661_v1, %v316_v45 }
 0x145   : > { %v3887_v28 = vpop.eup %3886  ;;  %3906 = vrcp.f32 %v1828_v19  ;;  %v1830_v29 = vadd.f32 1.0, %v3885_v23  ;;  %v311_v19 = vld [vmem:[%s4654_s6 + $0x480] sm:$0xff]  ;;  %v567_v21 = vmul.f32 %v4661_v1, %v310_v15 }
 0x146   : > { %v3889_v33 = vpop.eup %3888  ;;  %3908 = vrcp.f32 %v1829_v24  ;;  %v1831_v34 = vadd.f32 1.0, %v3887_v28  ;;  %v568_v26 = vmul.f32 %v4661_v1, %v311_v19  ;;  %v2975_v15 = vadd.f32 -3.1415927, %v573_v59 }
 0x147   : > { %v3891_v38 = vpop.eup %3890  ;;  %3910 = vrcp.f32 %v1830_v29  ;;  %v1832_v39 = vadd.f32 1.0, %v3889_v33  ;;  %v2969_v32 = vadd.f32 -3.1415927, %v567_v21  ;;  %v313_v33 = vld [vmem:[%s4654_s6 + $0x490] sm:$0xff] }
 0x148   : > { %v3893_v43 = vpop.eup %3892  ;;  %3912 = vrcp.f32 %v1831_v34  ;;  %v1833_v44 = vadd.f32 1.0, %v3891_v38  ;;  %v2970_v40 = vadd.f32 -3.1415927, %v568_v26 }
 0x149   : > { %v3895_v48 = vpop.eup %3894  ;;  %2589 = vst [vmem:[%s4713_s21 + $0x3a8] sm:$0xff] %v3893_v43  ;;  %3914 = vrcp.f32 %v1832_v39 }
 0x14a   : > { %v3897_v52 = vpop.eup %3896  ;;  %2590 = vst [vmem:[%s4713_s21 + $0x3b0] sm:$0xff] %v3895_v48  ;;  %3916 = vrcp.f32 %v1833_v44  ;;  %v570_v44 = vmul.f32 %v4661_v1, %v313_v33  ;;  %v3225_v48 = vmul.f32 -1.442695, %v2969_v32  ;;  %v3226_v58 = vmul.f32 -1.442695, %v2970_v40 }
 0x14b   : > { %v3899_v56 = vpop.eup %3898  ;;  %2591 = vst [vmem:[%s4713_s21 + $0x3b8] sm:$0xff] %v3897_v52  ;;  %3918 = vpow2.f32 %v3212_v20 }
 0x14c   : > { %v3901_v60 = vpop.eup %3900  ;;  %2592 = vst [vmem:[%s4713_s21 + $0x3c0] sm:$0xff] %v3899_v56  ;;  %3920 = vpow2.f32 %v3213_v25 }
 0x14d   : > { %v3903_v63 = vpop.eup %3902  ;;  %2593 = vst [vmem:[%s4713_s21 + $0x3c8] sm:$0xff] %v3901_v60  ;;  %3922 = vpow2.f32 %v3214_v49  ;;  %v571_v49 = vmul.f32 %v4661_v1, %v314_v37  ;;  %v319_v60 = vld [vmem:[%s4654_s6 + $0x4c0] sm:$0xff] }
 0x14e   : > { %v3905_v3 = vpop.eup %3904  ;;  %2594 = vst [vmem:[%s4713_s21 + $0x3d0] sm:$0xff] %v3903_v63  ;;  %3924 = vpow2.f32 %v3215_v53  ;;  %v2971_v53 = vadd.f32 -3.1415927, %v569_v36  ;;  %v2972_v63 = vadd.f32 -3.1415927, %v570_v44 }
 0x14f   : > { %v3907_v6 = vpop.eup %3906  ;;  %2595 = vst [vmem:[%s4713_s21 + $0x3d8] sm:$0xff] %v3905_v3  ;;  %3926 = vpow2.f32 %v3216_v57  ;;  %v2973_v5 = vadd.f32 -3.1415927, %v571_v49  ;;  %v324_v49 = vld [vmem:[%s4654_s6 + $0x4e8] sm:$0xff] }
 0x150   : > { %v3909_v9 = vpop.eup %3908  ;;  %2596 = vst [vmem:[%s4713_s21 + $0x3e0] sm:$0xff] %v3907_v6  ;;  %3928 = vpow2.f32 %v3217_v61  ;;  %v575_v6 = vmul.f32 %v4661_v1, %v318_v55 }
 0x151   : > { %v3911_v11 = vpop.eup %3910  ;;  %2597 = vst [vmem:[%s4713_s21 + $0x3e8] sm:$0xff] %v3909_v9  ;;  %3930 = vpow2.f32 %v3218_v0  ;;  %v574_v0 = vmul.f32 %v4661_v1, %v317_v50 }
 0x152   : > { %v3913_v13 = vpop.eup %3912  ;;  %2598 = vst [vmem:[%s4713_s21 + $0x3f0] sm:$0xff] %v3911_v11  ;;  %3932 = vpow2.f32 %v3219_v4  ;;  %v576_v11 = vmul.f32 %v4661_v1, %v319_v60 }
 0x153   : > { %v3915_v16 = vpop.eup %3914  ;;  %2599 = vst [vmem:[%s4713_s21 + $0x3f8] sm:$0xff] %v3913_v13  ;;  %3934 = vpow2.f32 %v3220_v7  ;;  %v321_v7 = vld [vmem:[%s4654_s6 + $0x4d0] sm:$0xff]  ;;  %v2976_v19 = vadd.f32 -3.1415927, %v574_v0 }
 0x154   : > { %v3917_v18 = vpop.eup %3916  ;;  %2600 = vst [vmem:[%s4713_s21 + $0x400] sm:$0xff] %v3915_v16  ;;  %3936 = vpow2.f32 %v3221_v10  ;;  %v2974_v10 = vadd.f32 -3.1415927, %v572_v54  ;;  %v577_v16 = vmul.f32 %v4661_v1, %v320_v2  ;;  %v2978_v27 = vadd.f32 -3.1415927, %v576_v11  ;;  %v325_v54 = vld [vmem:[%s4654_s6 + $0x4f0] sm:$0xff] }
 0x155   : > { %v3919_v20 = vpop.eup %3918  ;;  %2601 = vst [vmem:[%s4713_s21 + $0x408] sm:$0xff] %v3917_v18  ;;  %3938 = vpow2.f32 %v3222_v12  ;;  %v322_v12 = vld [vmem:[%s4654_s6 + $0x4d8] sm:$0xff]  ;;  %v3228_v18 = vmul.f32 -1.442695, %v2972_v63  ;;  %v3232_v32 = vmul.f32 -1.442695, %v2976_v19  ;;  %v582_v0 = vmul.f32 %v4661_v1, %v325_v54 }
 0x156   : > { %v3921_v22 = vpop.eup %3920  ;;  %v1834_v23 = vadd.f32 1.0, %v3919_v20  ;;  %3940 = vpow2.f32 %v3223_v14  ;;  %v3227_v14 = vmul.f32 -1.442695, %v2971_v53  ;;  %v578_v20 = vmul.f32 %v4661_v1, %v321_v7  ;;  %v327_v2 = vld [vmem:[%s4654_s6 + $0x500] sm:$0xff] }
 0x157   : > { %v3923_v24 = vpop.eup %3922  ;;  %v1835_v25 = vadd.f32 1.0, %v3921_v22  ;;  %3942 = vpow2.f32 %v3224_v17  ;;  %v3229_v22 = vmul.f32 -1.442695, %v2973_v5  ;;  %v3230_v26 = vmul.f32 -1.442695, %v2974_v10  ;;  %v329_v10 = vld [vmem:[%s4654_s6 + $0x510] sm:$0xff] }
 0x158   : > { %v3925_v28 = vpop.eup %3924  ;;  %3944 = vrcp.f32 %v1834_v23  ;;  %v1836_v29 = vadd.f32 1.0, %v3923_v24  ;;  %v2977_v23 = vadd.f32 -3.1415927, %v575_v6  ;;  %v579_v24 = vmul.f32 %v4661_v1, %v322_v12  ;;  %v328_v6 = vld [vmem:[%s4654_s6 + $0x508] sm:$0xff] }
 0x159   : > { %v3927_v30 = vpop.eup %3926  ;;  %3946 = vrcp.f32 %v1835_v25  ;;  %v1837_v31 = vadd.f32 1.0, %v3925_v28  ;;  %v2980_v33 = vadd.f32 -3.1415927, %v578_v20  ;;  %v585_v19 = vmul.f32 %v4661_v1, %v328_v6  ;;  %v331_v20 = vld [vmem:[%s4654_s6 + $0x520] sm:$0xff] }
 0x15a   : > { %v3929_v34 = vpop.eup %3928  ;;  %3948 = vrcp.f32 %v1836_v29  ;;  %v1838_v35 = vadd.f32 1.0, %v3927_v30  ;;  %v3231_v29 = vmul.f32 -1.442695, %v2975_v15  ;;  %v2979_v30 = vadd.f32 -3.1415927, %v577_v16  ;;  %v330_v15 = vld [vmem:[%s4654_s6 + $0x518] sm:$0xff] }
 0x15b   : > { %v3931_v38 = vpop.eup %3930  ;;  %3950 = vrcp.f32 %v1837_v31  ;;  %v1839_v39 = vadd.f32 1.0, %v3929_v34  ;;  %v2981_v36 = vadd.f32 -3.1415927, %v579_v24  ;;  %v586_v24 = vmul.f32 %v4661_v1, %v329_v10 }
 0x15c   : > { %v3933_v42 = vpop.eup %3932  ;;  %3952 = vrcp.f32 %v1838_v35  ;;  %v1840_v43 = vadd.f32 1.0, %v3931_v38  ;;  %v3233_v35 = vmul.f32 -1.442695, %v2977_v23  ;;  %v3234_v38 = vmul.f32 -1.442695, %v2978_v27 }
 0x15d   : > { %v3935_v46 = vpop.eup %3934  ;;  %3954 = vrcp.f32 %v1839_v39  ;;  %v1841_v47 = vadd.f32 1.0, %v3933_v42  ;;  %v3235_v40 = vmul.f32 -1.442695, %v2979_v30  ;;  %v3236_v42 = vmul.f32 -1.442695, %v2980_v33  ;;  %v333_v30 = vld [vmem:[%s4654_s6 + $0x530] sm:$0xff] }
 0x15e   : > { %v3937_v51 = vpop.eup %3936  ;;  %3956 = vrcp.f32 %v1840_v43  ;;  %v1842_v52 = vadd.f32 1.0, %v3935_v46  ;;  %v323_v43 = vld [vmem:[%s4654_s6 + $0x4e0] sm:$0xff]  ;;  %v3237_v45 = vmul.f32 -1.442695, %v2981_v36 }
 0x15f   : > { %v3939_v56 = vpop.eup %3938  ;;  %3958 = vrcp.f32 %v1841_v47  ;;  %v1843_v57 = vadd.f32 1.0, %v3937_v51 }
 0x160   : > { %v3941_v61 = vpop.eup %3940  ;;  %3960 = vrcp.f32 %v1842_v52  ;;  %v1844_v62 = vadd.f32 1.0, %v3939_v56 }
 0x161   : > { %v3943_v3 = vpop.eup %3942  ;;  %3962 = vrcp.f32 %v1843_v57  ;;  %v1845_v4 = vadd.f32 1.0, %v3941_v61  ;;  %v581_v57 = vmul.f32 %v4661_v1, %v324_v49 }
 0x162   : > { %v3945_v8 = vpop.eup %3944  ;;  %3964 = vrcp.f32 %v1844_v62  ;;  %v1846_v9 = vadd.f32 1.0, %v3943_v3 }
 0x163   : > { %v3947_v13 = vpop.eup %3946  ;;  %2602 = vst [vmem:[%s4713_s21 + $0x410] sm:$0xff] %v3945_v8  ;;  %3966 = vrcp.f32 %v1845_v4 }
 0x164   : > { %v3949_v17 = vpop.eup %3948  ;;  %2603 = vst [vmem:[%s4713_s21 + $0x418] sm:$0xff] %v3947_v13  ;;  %3968 = vrcp.f32 %v1846_v9  ;;  %v2983_v9 = vadd.f32 -3.1415927, %v581_v57 }
 0x165   : > { %v3951_v21 = vpop.eup %3950  ;;  %2604 = vst [vmem:[%s4713_s21 + $0x420] sm:$0xff] %v3949_v17  ;;  %3970 = vpow2.f32 %v3225_v48  ;;  %v580_v48 = vmul.f32 %v4661_v1, %v323_v43  ;;  %v2988_v43 = vadd.f32 -3.1415927, %v586_v24 }
 0x166   : > { %v3953_v25 = vpop.eup %3952  ;;  %2605 = vst [vmem:[%s4713_s21 + $0x428] sm:$0xff] %v3951_v21  ;;  %3972 = vpow2.f32 %v3226_v58  ;;  %v326_v58 = vld [vmem:[%s4654_s6 + $0x4f8] sm:$0xff] }
 0x167   : > { %v3955_v28 = vpop.eup %3954  ;;  %2606 = vst [vmem:[%s4713_s21 + $0x430] sm:$0xff] %v3953_v25  ;;  %3974 = vpow2.f32 %v3227_v14  ;;  %v2982_v61 = vadd.f32 -3.1415927, %v580_v48  ;;  %v583_v5 = vmul.f32 %v4661_v1, %v326_v58  ;;  %v584_v14 = vmul.f32 %v4661_v1, %v327_v2  ;;  %v332_v25 = vld [vmem:[%s4654_s6 + $0x528] sm:$0xff] }
 0x168   : > { %v3957_v31 = vpop.eup %3956  ;;  %2607 = vst [vmem:[%s4713_s21 + $0x438] sm:$0xff] %v3955_v28  ;;  %3976 = vpow2.f32 %v3228_v18  ;;  %v2984_v18 = vadd.f32 -3.1415927, %v582_v0  ;;  %v3239_v28 = vmul.f32 -1.442695, %v2983_v9 }
 0x169   : > { %v3959_v34 = vpop.eup %3958  ;;  %2608 = vst [vmem:[%s4713_s21 + $0x440] sm:$0xff] %v3957_v31  ;;  %3978 = vpow2.f32 %v3229_v22  ;;  %v3238_v13 = vmul.f32 -1.442695, %v2982_v61  ;;  %v2985_v23 = vadd.f32 -3.1415927, %v583_v5 }
 0x16a   : > { %v3961_v37 = vpop.eup %3960  ;;  %2609 = vst [vmem:[%s4713_s21 + $0x448] sm:$0xff] %v3959_v34  ;;  %3980 = vpow2.f32 %v3230_v26  ;;  %v2986_v33 = vadd.f32 -3.1415927, %v584_v14  ;;  %v588_v34 = vmul.f32 %v4661_v1, %v331_v20  ;;  %v3244_v57 = vmul.f32 -1.442695, %v2988_v43  ;;  %v338_v20 = vld [vmem:[%s4654_s6 + $0x558] sm:$0xff] }
 0x16b   : > { %v3963_v39 = vpop.eup %3962  ;;  %2610 = vst [vmem:[%s4713_s21 + $0x450] sm:$0xff] %v3961_v37  ;;  %3982 = vpow2.f32 %v3231_v29  ;;  %v587_v29 = vmul.f32 %v4661_v1, %v330_v15  ;;  %v343_v43 = vld [vmem:[%s4654_s6 + $0x580] sm:$0xff] }
 0x16c   : > { %v3965_v41 = vpop.eup %3964  ;;  %2611 = vst [vmem:[%s4713_s21 + $0x458] sm:$0xff] %v3963_v39  ;;  %3984 = vpow2.f32 %v3232_v32  ;;  %v589_v39 = vmul.f32 %v4661_v1, %v332_v25 }
 0x16d   : > { %v3967_v44 = vpop.eup %3966  ;;  %2612 = vst [vmem:[%s4713_s21 + $0x460] sm:$0xff] %v3965_v41  ;;  %3986 = vpow2.f32 %v3233_v35  ;;  %v334_v35 = vld [vmem:[%s4654_s6 + $0x538] sm:$0xff] }
 0x16e   : > { %v3969_v46 = vpop.eup %3968  ;;  %2613 = vst [vmem:[%s4713_s21 + $0x468] sm:$0xff] %v3967_v44  ;;  %3988 = vpow2.f32 %v3234_v38  ;;  %v2987_v38 = vadd.f32 -3.1415927, %v585_v19  ;;  %v590_v44 = vmul.f32 %v4661_v1, %v333_v30  ;;  %v591_v48 = vmul.f32 %v4661_v1, %v334_v35  ;;  %v340_v30 = vld [vmem:[%s4654_s6 + $0x568] sm:$0xff] }
 0x16f   : > { %v3971_v47 = vpop.eup %3970  ;;  %2614 = vst [vmem:[%s4713_s21 + $0x470] sm:$0xff] %v3969_v46  ;;  %3990 = vpow2.f32 %v3235_v40  ;;  %v335_v40 = vld [vmem:[%s4654_s6 + $0x540] sm:$0xff]  ;;  %v3241_v46 = vmul.f32 -1.442695, %v2985_v23 }
 0x170   : > { %v3973_v50 = vpop.eup %3972  ;;  %v1847_v51 = vadd.f32 1.0, %v3971_v47  ;;  %3992 = vpow2.f32 %v3236_v42  ;;  %v3240_v42 = vmul.f32 -1.442695, %v2984_v18  ;;  %v2989_v47 = vadd.f32 -3.1415927, %v587_v29 }
 0x171   : > { %v3975_v52 = vpop.eup %3974  ;;  %v1848_v53 = vadd.f32 1.0, %v3973_v50  ;;  %3994 = vpow2.f32 %v3237_v45  ;;  %v3242_v50 = vmul.f32 -1.442695, %v2986_v33  ;;  %v3243_v54 = vmul.f32 -1.442695, %v2987_v38  ;;  %v342_v38 = vld [vmem:[%s4654_s6 + $0x578] sm:$0xff] }
 0x172   : > { %v3977_v55 = vpop.eup %3976  ;;  %3996 = vrcp.f32 %v1847_v51  ;;  %v1849_v56 = vadd.f32 1.0, %v3975_v52  ;;  %v2990_v51 = vadd.f32 -3.1415927, %v588_v34  ;;  %v592_v52 = vmul.f32 %v4661_v1, %v335_v40  ;;  %v341_v34 = vld [vmem:[%s4654_s6 + $0x570] sm:$0xff] }
 0x173   : > { %v3979_v59 = vpop.eup %3978  ;;  %3998 = vrcp.f32 %v1848_v53  ;;  %v1850_v60 = vadd.f32 1.0, %v3977_v55  ;;  %v2991_v55 = vadd.f32 -3.1415927, %v589_v39  ;;  %v2992_v58 = vadd.f32 -3.1415927, %v590_v44 }
 0x174   : > { %v3981_v62 = vpop.eup %3980  ;;  %4000 = vrcp.f32 %v1849_v56  ;;  %v1851_v63 = vadd.f32 1.0, %v3979_v59  ;;  %v2993_v61 = vadd.f32 -3.1415927, %v591_v48  ;;  %v2994_v0 = vadd.f32 -3.1415927, %v592_v52  ;;  %v344_v48 = vld [vmem:[%s4654_s6 + $0x588] sm:$0xff] }
 0x175   : > { %v3983_v3 = vpop.eup %3982  ;;  %4002 = vrcp.f32 %v1850_v60  ;;  %v1852_v4 = vadd.f32 1.0, %v3981_v62  ;;  %v3245_v60 = vmul.f32 -1.442695, %v2989_v47  ;;  %v3248_v5 = vmul.f32 -1.442695, %v2992_v58  ;;  %v346_v58 = vld [vmem:[%s4654_s6 + $0x598] sm:$0xff] }
 0x176   : > { %v3985_v7 = vpop.eup %3984  ;;  %4004 = vrcp.f32 %v1851_v63  ;;  %v1853_v8 = vadd.f32 1.0, %v3983_v3  ;;  %v3246_v63 = vmul.f32 -1.442695, %v2990_v51  ;;  %v3247_v3 = vmul.f32 -1.442695, %v2991_v55 }
 0x177   : > { %v3987_v11 = vpop.eup %3986  ;;  %4006 = vrcp.f32 %v1852_v4  ;;  %v1854_v12 = vadd.f32 1.0, %v3985_v7  ;;  %v3249_v7 = vmul.f32 -1.442695, %v2993_v61  ;;  %v3250_v10 = vmul.f32 -1.442695, %v2994_v0 }
 0x178   : > { %v3989_v16 = vpop.eup %3988  ;;  %4008 = vrcp.f32 %v1853_v8  ;;  %v1855_v17 = vadd.f32 1.0, %v3987_v11  ;;  %v336_v8 = vld [vmem:[%s4654_s6 + $0x548] sm:$0xff]  ;;  %v595_v29 = vmul.f32 %v4661_v1, %v338_v20  ;;  %v598_v47 = vmul.f32 %v4661_v1, %v341_v34 }
 0x179   : > { %v3991_v21 = vpop.eup %3990  ;;  %4010 = vrcp.f32 %v1854_v12  ;;  %v1856_v22 = vadd.f32 1.0, %v3989_v16  ;;  %v337_v12 = vld [vmem:[%s4654_s6 + $0x550] sm:$0xff]  ;;  %v593_v14 = vmul.f32 %v4661_v1, %v336_v8  ;;  %v599_v52 = vmul.f32 %v4661_v1, %v342_v38 }
 0x17a   : > { %v3993_v26 = vpop.eup %3992  ;;  %4012 = vrcp.f32 %v1855_v17  ;;  %v1857_v27 = vadd.f32 1.0, %v3991_v21  ;;  %v594_v19 = vmul.f32 %v4661_v1, %v337_v12 }
 0x17b   : > { %v3995_v31 = vpop.eup %3994  ;;  %4014 = vrcp.f32 %v1856_v22  ;;  %v1858_v32 = vadd.f32 1.0, %v3993_v26  ;;  %v2995_v25 = vadd.f32 -3.1415927, %v593_v14  ;;  %v339_v26 = vld [vmem:[%s4654_s6 + $0x560] sm:$0xff]  ;;  %v3001_v8 = vadd.f32 -3.1415927, %v599_v52 }
 0x17c   : > { %v3997_v36 = vpop.eup %3996  ;;  %4016 = vrcp.f32 %v1857_v27  ;;  %v1859_v37 = vadd.f32 1.0, %v3995_v31  ;;  %v2996_v33 = vadd.f32 -3.1415927, %v594_v19 }
 0x17d   : > { %v3999_v41 = vpop.eup %3998  ;;  %2615 = vst [vmem:[%s4713_s21 + $0x478] sm:$0xff] %v3997_v36  ;;  %4018 = vrcp.f32 %v1858_v32 }
 0x17e   : > { %v4001_v45 = vpop.eup %4000  ;;  %2616 = vst [vmem:[%s4713_s21 + $0x480] sm:$0xff] %v3999_v41  ;;  %4020 = vrcp.f32 %v1859_v37  ;;  %v596_v37 = vmul.f32 %v4661_v1, %v339_v26  ;;  %v3251_v41 = vmul.f32 -1.442695, %v2995_v25  ;;  %v3252_v51 = vmul.f32 -1.442695, %v2996_v33 }
 0x17f   : > { %v4003_v49 = vpop.eup %4002  ;;  %2617 = vst [vmem:[%s4713_s21 + $0x488] sm:$0xff] %v4001_v45  ;;  %4022 = vpow2.f32 %v3238_v13 }
 0x180   : > { %v4005_v53 = vpop.eup %4004  ;;  %2618 = vst [vmem:[%s4713_s21 + $0x490] sm:$0xff] %v4003_v49  ;;  %4024 = vpow2.f32 %v3239_v28 }
 0x181   : > { %v4007_v56 = vpop.eup %4006  ;;  %2619 = vst [vmem:[%s4713_s21 + $0x498] sm:$0xff] %v4005_v53  ;;  %4026 = vpow2.f32 %v3240_v42  ;;  %v597_v42 = vmul.f32 %v4661_v1, %v340_v30  ;;  %v345_v53 = vld [vmem:[%s4654_s6 + $0x590] sm:$0xff] }
 0x182   : > { %v4009_v59 = vpop.eup %4008  ;;  %2620 = vst [vmem:[%s4713_s21 + $0x4a0] sm:$0xff] %v4007_v56  ;;  %4028 = vpow2.f32 %v3241_v46  ;;  %v2997_v46 = vadd.f32 -3.1415927, %v595_v29  ;;  %v2998_v56 = vadd.f32 -3.1415927, %v596_v37 }
 0x183   : > { %v4011_v62 = vpop.eup %4010  ;;  %2621 = vst [vmem:[%s4713_s21 + $0x4a8] sm:$0xff] %v4009_v59  ;;  %4030 = vpow2.f32 %v3242_v50  ;;  %v2999_v61 = vadd.f32 -3.1415927, %v597_v42 }
 0x184   : > { %v4013_v2 = vpop.eup %4012  ;;  %2622 = vst [vmem:[%s4713_s21 + $0x4b0] sm:$0xff] %v4011_v62  ;;  %4032 = vpow2.f32 %v3243_v54  ;;  %v601_v62 = vmul.f32 %v4661_v1, %v344_v48  ;;  %v351_v48 = vld [vmem:[%s4654_s6 + $0x5c0] sm:$0xff] }
 0x185   : > { %v4015_v4 = vpop.eup %4014  ;;  %2623 = vst [vmem:[%s4713_s21 + $0x4b8] sm:$0xff] %v4013_v2  ;;  %4034 = vpow2.f32 %v3244_v57  ;;  %v600_v57 = vmul.f32 %v4661_v1, %v343_v43 }
 0x186   : > { %v4017_v6 = vpop.eup %4016  ;;  %2624 = vst [vmem:[%s4713_s21 + $0x4c0] sm:$0xff] %v4015_v4  ;;  %4036 = vpow2.f32 %v3245_v60  ;;  %v602_v4 = vmul.f32 %v4661_v1, %v345_v53 }
 0x187   : > { %v4019_v9 = vpop.eup %4018  ;;  %2625 = vst [vmem:[%s4713_s21 + $0x4c8] sm:$0xff] %v4017_v6  ;;  %4038 = vpow2.f32 %v3246_v63  ;;  %v347_v63 = vld [vmem:[%s4654_s6 + $0x5a0] sm:$0xff]  ;;  %v3002_v12 = vadd.f32 -3.1415927, %v600_v57  ;;  %v608_v57 = vmul.f32 %v4661_v1, %v351_v48 }
 0x188   : > { %v4021_v11 = vpop.eup %4020  ;;  %2626 = vst [vmem:[%s4713_s21 + $0x4d0] sm:$0xff] %v4019_v9  ;;  %4040 = vpow2.f32 %v3247_v3  ;;  %v3000_v3 = vadd.f32 -3.1415927, %v598_v47  ;;  %v603_v9 = vmul.f32 %v4661_v1, %v346_v58  ;;  %v3004_v20 = vadd.f32 -3.1415927, %v602_v4  ;;  %v353_v58 = vld [vmem:[%s4654_s6 + $0x5d0] sm:$0xff] }
 0x189   : > { %v4023_v13 = vpop.eup %4022  ;;  %2627 = vst [vmem:[%s4713_s21 + $0x4d8] sm:$0xff] %v4021_v11  ;;  %4042 = vpow2.f32 %v3248_v5  ;;  %v348_v5 = vld [vmem:[%s4654_s6 + $0x5a8] sm:$0xff]  ;;  %v3254_v11 = vmul.f32 -1.442695, %v2998_v56  ;;  %v3258_v25 = vmul.f32 -1.442695, %v3002_v12 }
 0x18a   : > { %v4025_v15 = vpop.eup %4024  ;;  %v1860_v16 = vadd.f32 1.0, %v4023_v13  ;;  %4044 = vpow2.f32 %v3249_v7  ;;  %v3253_v7 = vmul.f32 -1.442695, %v2997_v46  ;;  %v604_v13 = vmul.f32 %v4661_v1, %v347_v63 }
 0x18b   : > { %v4027_v17 = vpop.eup %4026  ;;  %v1861_v18 = vadd.f32 1.0, %v4025_v15  ;;  %4046 = vpow2.f32 %v3250_v10  ;;  %v3255_v15 = vmul.f32 -1.442695, %v2999_v61  ;;  %v3256_v19 = vmul.f32 -1.442695, %v3000_v3  ;;  %v355_v3 = vld [vmem:[%s4654_s6 + $0x5e0] sm:$0xff] }
 0x18c   : > { %v4029_v21 = vpop.eup %4028  ;;  %4048 = vrcp.f32 %v1860_v16  ;;  %v1862_v22 = vadd.f32 1.0, %v4027_v17  ;;  %v3003_v16 = vadd.f32 -3.1415927, %v601_v62  ;;  %v605_v17 = vmul.f32 %v4661_v1, %v348_v5  ;;  %v354_v62 = vld [vmem:[%s4654_s6 + $0x5d8] sm:$0xff] }
 0x18d   : > { %v4031_v23 = vpop.eup %4030  ;;  %4050 = vrcp.f32 %v1861_v18  ;;  %v1863_v24 = vadd.f32 1.0, %v4029_v21  ;;  %v3006_v26 = vadd.f32 -3.1415927, %v604_v13  ;;  %v611_v12 = vmul.f32 %v4661_v1, %v354_v62  ;;  %v357_v13 = vld [vmem:[%s4654_s6 + $0x5f0] sm:$0xff] }
 0x18e   : > { %v4033_v27 = vpop.eup %4032  ;;  %4052 = vrcp.f32 %v1862_v22  ;;  %v1864_v28 = vadd.f32 1.0, %v4031_v23  ;;  %v3257_v22 = vmul.f32 -1.442695, %v3001_v8  ;;  %v3005_v23 = vadd.f32 -3.1415927, %v603_v9  ;;  %v356_v8 = vld [vmem:[%s4654_s6 + $0x5e8] sm:$0xff] }
 0x18f   : > { %v4035_v31 = vpop.eup %4034  ;;  %4054 = vrcp.f32 %v1863_v24  ;;  %v1865_v32 = vadd.f32 1.0, %v4033_v27  ;;  %v3007_v29 = vadd.f32 -3.1415927, %v605_v17  ;;  %v612_v17 = vmul.f32 %v4661_v1, %v355_v3 }
 0x190   : > { %v4037_v35 = vpop.eup %4036  ;;  %4056 = vrcp.f32 %v1864_v28  ;;  %v1866_v36 = vadd.f32 1.0, %v4035_v31  ;;  %v3259_v28 = vmul.f32 -1.442695, %v3003_v16  ;;  %v3260_v31 = vmul.f32 -1.442695, %v3004_v20 }
 0x191   : > { %v4039_v39 = vpop.eup %4038  ;;  %4058 = vrcp.f32 %v1865_v32  ;;  %v1867_v40 = vadd.f32 1.0, %v4037_v35  ;;  %v3261_v33 = vmul.f32 -1.442695, %v3005_v23  ;;  %v3262_v35 = vmul.f32 -1.442695, %v3006_v26  ;;  %v359_v23 = vld [vmem:[%s4654_s6 + $0x600] sm:$0xff] }
 0x192   : > { %v4041_v44 = vpop.eup %4040  ;;  %4060 = vrcp.f32 %v1866_v36  ;;  %v1868_v45 = vadd.f32 1.0, %v4039_v39  ;;  %v349_v36 = vld [vmem:[%s4654_s6 + $0x5b0] sm:$0xff]  ;;  %v3263_v38 = vmul.f32 -1.442695, %v3007_v29 }
 0x193   : > { %v4043_v49 = vpop.eup %4042  ;;  %4062 = vrcp.f32 %v1867_v40  ;;  %v1869_v50 = vadd.f32 1.0, %v4041_v44  ;;  %v350_v40 = vld [vmem:[%s4654_s6 + $0x5b8] sm:$0xff]  ;;  %v606_v42 = vmul.f32 %v4661_v1, %v349_v36  ;;  %v3014_v36 = vadd.f32 -3.1415927, %v612_v17 }
 0x194   : > { %v4045_v54 = vpop.eup %4044  ;;  %4064 = vrcp.f32 %v1868_v45  ;;  %v1870_v55 = vadd.f32 1.0, %v4043_v49  ;;  %v607_v47 = vmul.f32 %v4661_v1, %v350_v40 }
 0x195   : > { %v4047_v59 = vpop.eup %4046  ;;  %4066 = vrcp.f32 %v1869_v50  ;;  %v1871_v60 = vadd.f32 1.0, %v4045_v54  ;;  %v3008_v53 = vadd.f32 -3.1415927, %v606_v42  ;;  %v352_v54 = vld [vmem:[%s4654_s6 + $0x5c8] sm:$0xff] }
 0x196   : > { %v4049_v0 = vpop.eup %4048  ;;  %4068 = vrcp.f32 %v1870_v55  ;;  %v1872_v2 = vadd.f32 1.0, %v4047_v59  ;;  %v3009_v61 = vadd.f32 -3.1415927, %v607_v47 }
 0x197   : > { %v4051_v6 = vpop.eup %4050  ;;  %2628 = vst [vmem:[%s4713_s21 + $0x4e0] sm:$0xff] %v4049_v0  ;;  %4070 = vrcp.f32 %v1871_v60 }
 0x198   : > { %v4053_v10 = vpop.eup %4052  ;;  %2629 = vst [vmem:[%s4713_s21 + $0x4e8] sm:$0xff] %v4051_v6  ;;  %4072 = vrcp.f32 %v1872_v2  ;;  %v609_v2 = vmul.f32 %v4661_v1, %v352_v54  ;;  %v3264_v6 = vmul.f32 -1.442695, %v3008_v53  ;;  %v3265_v16 = vmul.f32 -1.442695, %v3009_v61 }
 0x199   : > { %v4055_v14 = vpop.eup %4054  ;;  %2630 = vst [vmem:[%s4713_s21 + $0x4f0] sm:$0xff] %v4053_v10  ;;  %4074 = vpow2.f32 %v3251_v41 }
 0x19a   : > { %v4057_v18 = vpop.eup %4056  ;;  %2631 = vst [vmem:[%s4713_s21 + $0x4f8] sm:$0xff] %v4055_v14  ;;  %4076 = vpow2.f32 %v3252_v51 }
 0x19b   : > { %v4059_v21 = vpop.eup %4058  ;;  %2632 = vst [vmem:[%s4713_s21 + $0x500] sm:$0xff] %v4057_v18  ;;  %4078 = vpow2.f32 %v3253_v7  ;;  %v610_v7 = vmul.f32 %v4661_v1, %v353_v58  ;;  %v358_v18 = vld [vmem:[%s4654_s6 + $0x5f8] sm:$0xff] }
 0x19c   : > { %v4061_v24 = vpop.eup %4060  ;;  %2633 = vst [vmem:[%s4713_s21 + $0x508] sm:$0xff] %v4059_v21  ;;  %4080 = vpow2.f32 %v3254_v11  ;;  %v3010_v11 = vadd.f32 -3.1415927, %v608_v57  ;;  %v3011_v21 = vadd.f32 -3.1415927, %v609_v2 }
 0x19d   : > { %v4063_v27 = vpop.eup %4062  ;;  %2634 = vst [vmem:[%s4713_s21 + $0x510] sm:$0xff] %v4061_v24  ;;  %4082 = vpow2.f32 %v3255_v15  ;;  %v3012_v26 = vadd.f32 -3.1415927, %v610_v7 }
 0x19e   : > { %v4065_v30 = vpop.eup %4064  ;;  %2635 = vst [vmem:[%s4713_s21 + $0x518] sm:$0xff] %v4063_v27  ;;  %4084 = vpow2.f32 %v3256_v19  ;;  %v614_v27 = vmul.f32 %v4661_v1, %v357_v13  ;;  %v364_v13 = vld [vmem:[%s4654_s6 + $0x628] sm:$0xff] }
 0x19f   : > { %v4067_v32 = vpop.eup %4066  ;;  %2636 = vst [vmem:[%s4713_s21 + $0x520] sm:$0xff] %v4065_v30  ;;  %4086 = vpow2.f32 %v3257_v22  ;;  %v613_v22 = vmul.f32 %v4661_v1, %v356_v8 }
 0x1a0   : > { %v4069_v34 = vpop.eup %4068  ;;  %2637 = vst [vmem:[%s4713_s21 + $0x528] sm:$0xff] %v4067_v32  ;;  %4088 = vpow2.f32 %v3258_v25  ;;  %v615_v32 = vmul.f32 %v4661_v1, %v358_v18 }
 0x1a1   : > { %v4071_v37 = vpop.eup %4070  ;;  %2638 = vst [vmem:[%s4713_s21 + $0x530] sm:$0xff] %v4069_v34  ;;  %4090 = vpow2.f32 %v3259_v28  ;;  %v360_v28 = vld [vmem:[%s4654_s6 + $0x608] sm:$0xff]  ;;  %v3015_v40 = vadd.f32 -3.1415927, %v613_v22  ;;  %v621_v22 = vmul.f32 %v4661_v1, %v364_v13 }
 0x1a2   : > { %v4073_v39 = vpop.eup %4072  ;;  %2639 = vst [vmem:[%s4713_s21 + $0x538] sm:$0xff] %v4071_v37  ;;  %4092 = vpow2.f32 %v3260_v31  ;;  %v3013_v31 = vadd.f32 -3.1415927, %v611_v12  ;;  %v616_v37 = vmul.f32 %v4661_v1, %v359_v23  ;;  %v3017_v48 = vadd.f32 -3.1415927, %v615_v32  ;;  %v366_v23 = vld [vmem:[%s4654_s6 + $0x638] sm:$0xff] }
 0x1a3   : > { %v4075_v41 = vpop.eup %4074  ;;  %2640 = vst [vmem:[%s4713_s21 + $0x540] sm:$0xff] %v4073_v39  ;;  %4094 = vpow2.f32 %v3261_v33  ;;  %v361_v33 = vld [vmem:[%s4654_s6 + $0x610] sm:$0xff]  ;;  %v3267_v39 = vmul.f32 -1.442695, %v3011_v21  ;;  %v3271_v53 = vmul.f32 -1.442695, %v3015_v40 }
 0x1a4   : > { %v4077_v43 = vpop.eup %4076  ;;  %v1873_v44 = vadd.f32 1.0, %v4075_v41  ;;  %4096 = vpow2.f32 %v3262_v35  ;;  %v3266_v35 = vmul.f32 -1.442695, %v3010_v11  ;;  %v617_v41 = vmul.f32 %v4661_v1, %v360_v28 }
 0x1a5   : > { %v4079_v45 = vpop.eup %4078  ;;  %v1874_v46 = vadd.f32 1.0, %v4077_v43  ;;  %4098 = vpow2.f32 %v3263_v38  ;;  %v3268_v43 = vmul.f32 -1.442695, %v3012_v26  ;;  %v3269_v47 = vmul.f32 -1.442695, %v3013_v31  ;;  %v368_v31 = vld [vmem:[%s4654_s6 + $0x648] sm:$0xff] }
 0x1a6   : > { %v4081_v49 = vpop.eup %4080  ;;  %4100 = vrcp.f32 %v1873_v44  ;;  %v1875_v50 = vadd.f32 1.0, %v4079_v45  ;;  %v3016_v44 = vadd.f32 -3.1415927, %v614_v27  ;;  %v618_v45 = vmul.f32 %v4661_v1, %v361_v33  ;;  %v367_v27 = vld [vmem:[%s4654_s6 + $0x640] sm:$0xff] }
 0x1a7   : > { %v4083_v51 = vpop.eup %4082  ;;  %4102 = vrcp.f32 %v1874_v46  ;;  %v1876_v52 = vadd.f32 1.0, %v4081_v49  ;;  %v3019_v54 = vadd.f32 -3.1415927, %v617_v41  ;;  %v624_v40 = vmul.f32 %v4661_v1, %v367_v27  ;;  %v370_v41 = vld [vmem:[%s4654_s6 + $0x658] sm:$0xff] }
 0x1a8   : > { %v4085_v55 = vpop.eup %4084  ;;  %4104 = vrcp.f32 %v1875_v50  ;;  %v1877_v56 = vadd.f32 1.0, %v4083_v51  ;;  %v3270_v50 = vmul.f32 -1.442695, %v3014_v36  ;;  %v3018_v51 = vadd.f32 -3.1415927, %v616_v37  ;;  %v369_v36 = vld [vmem:[%s4654_s6 + $0x650] sm:$0xff] }
 0x1a9   : > { %v4087_v59 = vpop.eup %4086  ;;  %4106 = vrcp.f32 %v1876_v52  ;;  %v1878_v60 = vadd.f32 1.0, %v4085_v55  ;;  %v3020_v57 = vadd.f32 -3.1415927, %v618_v45  ;;  %v625_v45 = vmul.f32 %v4661_v1, %v368_v31 }
 0x1aa   : > { %v4089_v63 = vpop.eup %4088  ;;  %4108 = vrcp.f32 %v1877_v56  ;;  %v1879_v0 = vadd.f32 1.0, %v4087_v59  ;;  %v3272_v56 = vmul.f32 -1.442695, %v3016_v44  ;;  %v3273_v59 = vmul.f32 -1.442695, %v3017_v48 }
 0x1ab   : > { %v4091_v4 = vpop.eup %4090  ;;  %4110 = vrcp.f32 %v1878_v60  ;;  %v1880_v5 = vadd.f32 1.0, %v4089_v63  ;;  %v3274_v61 = vmul.f32 -1.442695, %v3018_v51  ;;  %v3275_v63 = vmul.f32 -1.442695, %v3019_v54  ;;  %v372_v51 = vld [vmem:[%s4654_s6 + $0x668] sm:$0xff] }
 0x1ac   : > { %v4093_v9 = vpop.eup %4092  ;;  %4112 = vrcp.f32 %v1879_v0  ;;  %v1881_v10 = vadd.f32 1.0, %v4091_v4  ;;  %v362_v0 = vld [vmem:[%s4654_s6 + $0x618] sm:$0xff]  ;;  %v3276_v3 = vmul.f32 -1.442695, %v3020_v57 }
 0x1ad   : > { %v4095_v14 = vpop.eup %4094  ;;  %4114 = vrcp.f32 %v1880_v5  ;;  %v1882_v15 = vadd.f32 1.0, %v4093_v9  ;;  %v363_v5 = vld [vmem:[%s4654_s6 + $0x620] sm:$0xff]  ;;  %v619_v7 = vmul.f32 %v4661_v1, %v362_v0  ;;  %v3027_v0 = vadd.f32 -3.1415927, %v625_v45 }
 0x1ae   : > { %v4097_v19 = vpop.eup %4096  ;;  %4116 = vrcp.f32 %v1881_v10  ;;  %v1883_v20 = vadd.f32 1.0, %v4095_v14  ;;  %v620_v12 = vmul.f32 %v4661_v1, %v363_v5 }
 0x1af   : > { %v4099_v24 = vpop.eup %4098  ;;  %4118 = vrcp.f32 %v1882_v15  ;;  %v1884_v25 = vadd.f32 1.0, %v4097_v19  ;;  %v3021_v18 = vadd.f32 -3.1415927, %v619_v7  ;;  %v365_v19 = vld [vmem:[%s4654_s6 + $0x630] sm:$0xff] }
 0x1b0   : > { %v4101_v29 = vpop.eup %4100  ;;  %4120 = vrcp.f32 %v1883_v20  ;;  %v1885_v30 = vadd.f32 1.0, %v4099_v24  ;;  %v3022_v26 = vadd.f32 -3.1415927, %v620_v12 }
 0x1b1   : > { %v4103_v34 = vpop.eup %4102  ;;  %2641 = vst [vmem:[%s4713_s21 + $0x548] sm:$0xff] %v4101_v29  ;;  %4122 = vrcp.f32 %v1884_v25 }
 0x1b2   : > { %v4105_v38 = vpop.eup %4104  ;;  %2642 = vst [vmem:[%s4713_s21 + $0x550] sm:$0xff] %v4103_v34  ;;  %4124 = vrcp.f32 %v1885_v30  ;;  %v622_v30 = vmul.f32 %v4661_v1, %v365_v19  ;;  %v3277_v34 = vmul.f32 -1.442695, %v3021_v18  ;;  %v3278_v44 = vmul.f32 -1.442695, %v3022_v26 }
 0x1b3   : > { %v4107_v42 = vpop.eup %4106  ;;  %2643 = vst [vmem:[%s4713_s21 + $0x558] sm:$0xff] %v4105_v38  ;;  %4126 = vpow2.f32 %v3264_v6 }
 0x1b4   : > { %v4109_v46 = vpop.eup %4108  ;;  %2644 = vst [vmem:[%s4713_s21 + $0x560] sm:$0xff] %v4107_v42  ;;  %4128 = vpow2.f32 %v3265_v16 }
 0x1b5   : > { %v4111_v49 = vpop.eup %4110  ;;  %2645 = vst [vmem:[%s4713_s21 + $0x568] sm:$0xff] %v4109_v46  ;;  %4130 = vpow2.f32 %v3266_v35  ;;  %v623_v35 = vmul.f32 %v4661_v1, %v366_v23  ;;  %v371_v46 = vld [vmem:[%s4654_s6 + $0x660] sm:$0xff] }
 0x1b6   : > { %v4113_v52 = vpop.eup %4112  ;;  %2646 = vst [vmem:[%s4713_s21 + $0x570] sm:$0xff] %v4111_v49  ;;  %4132 = vpow2.f32 %v3267_v39  ;;  %v3023_v39 = vadd.f32 -3.1415927, %v621_v22  ;;  %v3024_v49 = vadd.f32 -3.1415927, %v622_v30 }
 0x1b7   : > { %v4115_v55 = vpop.eup %4114  ;;  %2647 = vst [vmem:[%s4713_s21 + $0x578] sm:$0xff] %v4113_v52  ;;  %4134 = vpow2.f32 %v3268_v43  ;;  %v3025_v54 = vadd.f32 -3.1415927, %v623_v35 }
 0x1b8   : > { %v4117_v58 = vpop.eup %4116  ;;  %2648 = vst [vmem:[%s4713_s21 + $0x580] sm:$0xff] %v4115_v55  ;;  %4136 = vpow2.f32 %v3269_v47  ;;  %v627_v55 = vmul.f32 %v4661_v1, %v370_v41  ;;  %v377_v41 = vld [vmem:[%s4654_s6 + $0x690] sm:$0xff] }
 0x1b9   : > { %v4119_v60 = vpop.eup %4118  ;;  %2649 = vst [vmem:[%s4713_s21 + $0x588] sm:$0xff] %v4117_v58  ;;  %4138 = vpow2.f32 %v3270_v50  ;;  %v626_v50 = vmul.f32 %v4661_v1, %v369_v36 }
 0x1ba   : > { %v4121_v62 = vpop.eup %4120  ;;  %2650 = vst [vmem:[%s4713_s21 + $0x590] sm:$0xff] %v4119_v60  ;;  %4140 = vpow2.f32 %v3271_v53  ;;  %v628_v60 = vmul.f32 %v4661_v1, %v371_v46 }
 0x1bb   : > { %v4123_v2 = vpop.eup %4122  ;;  %2651 = vst [vmem:[%s4713_s21 + $0x598] sm:$0xff] %v4121_v62  ;;  %4142 = vpow2.f32 %v3272_v56  ;;  %v373_v56 = vld [vmem:[%s4654_s6 + $0x670] sm:$0xff]  ;;  %v3028_v5 = vadd.f32 -3.1415927, %v626_v50  ;;  %v634_v50 = vmul.f32 %v4661_v1, %v377_v41 }
 0x1bc   : > { %v4125_v4 = vpop.eup %4124  ;;  %2652 = vst [vmem:[%s4713_s21 + $0x5a0] sm:$0xff] %v4123_v2  ;;  %4144 = vpow2.f32 %v3273_v59  ;;  %v3026_v59 = vadd.f32 -3.1415927, %v624_v40  ;;  %v629_v2 = vmul.f32 %v4661_v1, %v372_v51  ;;  %v3030_v13 = vadd.f32 -3.1415927, %v628_v60  ;;  %v379_v51 = vld [vmem:[%s4654_s6 + $0x6a0] sm:$0xff] }
 0x1bd   : > { %v4127_v6 = vpop.eup %4126  ;;  %2653 = vst [vmem:[%s4713_s21 + $0x5a8] sm:$0xff] %v4125_v4  ;;  %4146 = vpow2.f32 %v3274_v61  ;;  %v374_v61 = vld [vmem:[%s4654_s6 + $0x678] sm:$0xff]  ;;  %v3280_v4 = vmul.f32 -1.442695, %v3024_v49  ;;  %v3284_v18 = vmul.f32 -1.442695, %v3028_v5 }
 0x1be   : > { %v4129_v8 = vpop.eup %4128  ;;  %v1886_v9 = vadd.f32 1.0, %v4127_v6  ;;  %4148 = vpow2.f32 %v3275_v63  ;;  %v3279_v63 = vmul.f32 -1.442695, %v3023_v39  ;;  %v630_v6 = vmul.f32 %v4661_v1, %v373_v56 }
 0x1bf   : > { %v4131_v10 = vpop.eup %4130  ;;  %v1887_v11 = vadd.f32 1.0, %v4129_v8  ;;  %4150 = vpow2.f32 %v3276_v3  ;;  %v3281_v8 = vmul.f32 -1.442695, %v3025_v54  ;;  %v3282_v12 = vmul.f32 -1.442695, %v3026_v59  ;;  %v381_v59 = vld [vmem:[%s4654_s6 + $0x6b0] sm:$0xff] }
 0x1c0   : > { %v4133_v14 = vpop.eup %4132  ;;  %4152 = vrcp.f32 %v1886_v9  ;;  %v1888_v15 = vadd.f32 1.0, %v4131_v10  ;;  %v3029_v9 = vadd.f32 -3.1415927, %v627_v55  ;;  %v631_v10 = vmul.f32 %v4661_v1, %v374_v61  ;;  %v380_v55 = vld [vmem:[%s4654_s6 + $0x6a8] sm:$0xff] }
 0x1c1   : > { %v4135_v16 = vpop.eup %4134  ;;  %4154 = vrcp.f32 %v1887_v11  ;;  %v1889_v17 = vadd.f32 1.0, %v4133_v14  ;;  %v3032_v19 = vadd.f32 -3.1415927, %v630_v6  ;;  %v637_v5 = vmul.f32 %v4661_v1, %v380_v55  ;;  %v383_v6 = vld [vmem:[%s4654_s6 + $0x6c0] sm:$0xff] }
 0x1c2   : > { %v4137_v20 = vpop.eup %4136  ;;  %4156 = vrcp.f32 %v1888_v15  ;;  %v1890_v21 = vadd.f32 1.0, %v4135_v16  ;;  %v3283_v15 = vmul.f32 -1.442695, %v3027_v0  ;;  %v3031_v16 = vadd.f32 -3.1415927, %v629_v2  ;;  %v382_v0 = vld [vmem:[%s4654_s6 + $0x6b8] sm:$0xff] }
 0x1c3   : > { %v4139_v24 = vpop.eup %4138  ;;  %4158 = vrcp.f32 %v1889_v17  ;;  %v1891_v25 = vadd.f32 1.0, %v4137_v20  ;;  %v3033_v22 = vadd.f32 -3.1415927, %v631_v10  ;;  %v638_v10 = vmul.f32 %v4661_v1, %v381_v59 }
 0x1c4   : > { %v4141_v28 = vpop.eup %4140  ;;  %4160 = vrcp.f32 %v1890_v21  ;;  %v1892_v29 = vadd.f32 1.0, %v4139_v24  ;;  %v3285_v21 = vmul.f32 -1.442695, %v3029_v9  ;;  %v3286_v24 = vmul.f32 -1.442695, %v3030_v13 }
 0x1c5   : > { %v4143_v32 = vpop.eup %4142  ;;  %4162 = vrcp.f32 %v1891_v25  ;;  %v1893_v33 = vadd.f32 1.0, %v4141_v28  ;;  %v3287_v26 = vmul.f32 -1.442695, %v3031_v16  ;;  %v3288_v28 = vmul.f32 -1.442695, %v3032_v19  ;;  %v385_v16 = vld [vmem:[%s4654_s6 + $0x6d0] sm:$0xff] }
 0x1c6   : > { %v4145_v37 = vpop.eup %4144  ;;  %4164 = vrcp.f32 %v1892_v29  ;;  %v1894_v38 = vadd.f32 1.0, %v4143_v32  ;;  %v375_v29 = vld [vmem:[%s4654_s6 + $0x680] sm:$0xff]  ;;  %v3289_v31 = vmul.f32 -1.442695, %v3033_v22 }
 0x1c7   : > { %v4147_v42 = vpop.eup %4146  ;;  %4166 = vrcp.f32 %v1893_v33  ;;  %v1895_v43 = vadd.f32 1.0, %v4145_v37  ;;  %v376_v33 = vld [vmem:[%s4654_s6 + $0x688] sm:$0xff]  ;;  %v632_v35 = vmul.f32 %v4661_v1, %v375_v29  ;;  %v3040_v29 = vadd.f32 -3.1415927, %v638_v10 }
 0x1c8   : > { %v4149_v47 = vpop.eup %4148  ;;  %4168 = vrcp.f32 %v1894_v38  ;;  %v1896_v48 = vadd.f32 1.0, %v4147_v42  ;;  %v633_v40 = vmul.f32 %v4661_v1, %v376_v33 }
 0x1c9   : > { %v4151_v52 = vpop.eup %4150  ;;  %4170 = vrcp.f32 %v1895_v43  ;;  %v1897_v53 = vadd.f32 1.0, %v4149_v47  ;;  %v3034_v46 = vadd.f32 -3.1415927, %v632_v35  ;;  %v378_v47 = vld [vmem:[%s4654_s6 + $0x698] sm:$0xff] }
 0x1ca   : > { %v4153_v57 = vpop.eup %4152  ;;  %4172 = vrcp.f32 %v1896_v48  ;;  %v1898_v58 = vadd.f32 1.0, %v4151_v52  ;;  %v3035_v54 = vadd.f32 -3.1415927, %v633_v40 }
 0x1cb   : > { %v4155_v62 = vpop.eup %4154  ;;  %2654 = vst [vmem:[%s4713_s21 + $0x5b0] sm:$0xff] %v4153_v57  ;;  %4174 = vrcp.f32 %v1897_v53 }
 0x1cc   : > { %v4157_v3 = vpop.eup %4156  ;;  %2655 = vst [vmem:[%s4713_s21 + $0x5b8] sm:$0xff] %v4155_v62  ;;  %4176 = vrcp.f32 %v1898_v58  ;;  %v635_v58 = vmul.f32 %v4661_v1, %v378_v47  ;;  %v3290_v62 = vmul.f32 -1.442695, %v3034_v46  ;;  %v3291_v9 = vmul.f32 -1.442695, %v3035_v54 }
 0x1cd   : > { %v4159_v7 = vpop.eup %4158  ;;  %2656 = vst [vmem:[%s4713_s21 + $0x5c0] sm:$0xff] %v4157_v3  ;;  %4178 = vpow2.f32 %v3277_v34 }
 0x1ce   : > { %v4161_v11 = vpop.eup %4160  ;;  %2657 = vst [vmem:[%s4713_s21 + $0x5c8] sm:$0xff] %v4159_v7  ;;  %4180 = vpow2.f32 %v3278_v44 }
 0x1cf   : > { %v4163_v14 = vpop.eup %4162  ;;  %2658 = vst [vmem:[%s4713_s21 + $0x5d0] sm:$0xff] %v4161_v11  ;;  %4182 = vpow2.f32 %v3279_v63  ;;  %v636_v63 = vmul.f32 %v4661_v1, %v379_v51  ;;  %v384_v11 = vld [vmem:[%s4654_s6 + $0x6c8] sm:$0xff] }
 0x1d0   : > { %v4165_v17 = vpop.eup %4164  ;;  %2659 = vst [vmem:[%s4713_s21 + $0x5d8] sm:$0xff] %v4163_v14  ;;  %4184 = vpow2.f32 %v3280_v4  ;;  %v3036_v4 = vadd.f32 -3.1415927, %v634_v50  ;;  %v3037_v14 = vadd.f32 -3.1415927, %v635_v58 }
 0x1d1   : > { %v4167_v20 = vpop.eup %4166  ;;  %2660 = vst [vmem:[%s4713_s21 + $0x5e0] sm:$0xff] %v4165_v17  ;;  %4186 = vpow2.f32 %v3281_v8  ;;  %v3038_v19 = vadd.f32 -3.1415927, %v636_v63 }
 0x1d2   : > { %v4169_v23 = vpop.eup %4168  ;;  %2661 = vst [vmem:[%s4713_s21 + $0x5e8] sm:$0xff] %v4167_v20  ;;  %4188 = vpow2.f32 %v3282_v12  ;;  %v640_v20 = vmul.f32 %v4661_v1, %v383_v6  ;;  %v390_v6 = vld [vmem:[%s4654_s6 + $0x6f8] sm:$0xff] }
 0x1d3   : > { %v4171_v25 = vpop.eup %4170  ;;  %2662 = vst [vmem:[%s4713_s21 + $0x5f0] sm:$0xff] %v4169_v23  ;;  %4190 = vpow2.f32 %v3283_v15  ;;  %v639_v15 = vmul.f32 %v4661_v1, %v382_v0 }
 0x1d4   : > { %v4173_v27 = vpop.eup %4172  ;;  %2663 = vst [vmem:[%s4713_s21 + $0x5f8] sm:$0xff] %v4171_v25  ;;  %4192 = vpow2.f32 %v3284_v18  ;;  %v641_v25 = vmul.f32 %v4661_v1, %v384_v11 }
 0x1d5   : > { %v4175_v30 = vpop.eup %4174  ;;  %2664 = vst [vmem:[%s4713_s21 + $0x600] sm:$0xff] %v4173_v27  ;;  %4194 = vpow2.f32 %v3285_v21  ;;  %v386_v21 = vld [vmem:[%s4654_s6 + $0x6d8] sm:$0xff]  ;;  %v3041_v33 = vadd.f32 -3.1415927, %v639_v15  ;;  %v647_v15 = vmul.f32 %v4661_v1, %v390_v6 }
 0x1d6   : > { %v4177_v32 = vpop.eup %4176  ;;  %2665 = vst [vmem:[%s4713_s21 + $0x608] sm:$0xff] %v4175_v30  ;;  %4196 = vpow2.f32 %v3286_v24  ;;  %v3039_v24 = vadd.f32 -3.1415927, %v637_v5  ;;  %v642_v30 = vmul.f32 %v4661_v1, %v385_v16  ;;  %v3043_v41 = vadd.f32 -3.1415927, %v641_v25  ;;  %v392_v16 = vld [vmem:[%s4654_s6 + $0x708] sm:$0xff] }
 0x1d7   : > { %v4179_v34 = vpop.eup %4178  ;;  %2666 = vst [vmem:[%s4713_s21 + $0x610] sm:$0xff] %v4177_v32  ;;  %4198 = vpow2.f32 %v3287_v26  ;;  %v387_v26 = vld [vmem:[%s4654_s6 + $0x6e0] sm:$0xff]  ;;  %v3293_v32 = vmul.f32 -1.442695, %v3037_v14  ;;  %v3297_v46 = vmul.f32 -1.442695, %v3041_v33 }
 0x1d8   : > { %v4181_v36 = vpop.eup %4180  ;;  %v1899_v37 = vadd.f32 1.0, %v4179_v34  ;;  %4200 = vpow2.f32 %v3288_v28  ;;  %v3292_v28 = vmul.f32 -1.442695, %v3036_v4  ;;  %v643_v34 = vmul.f32 %v4661_v1, %v386_v21 }
 0x1d9   : > { %v4183_v38 = vpop.eup %4182  ;;  %v1900_v39 = vadd.f32 1.0, %v4181_v36  ;;  %4202 = vpow2.f32 %v3289_v31  ;;  %v3294_v36 = vmul.f32 -1.442695, %v3038_v19  ;;  %v3295_v40 = vmul.f32 -1.442695, %v3039_v24  ;;  %v394_v24 = vld [vmem:[%s4654_s6 + $0x718] sm:$0xff] }
 0x1da   : > { %v4185_v42 = vpop.eup %4184  ;;  %4204 = vrcp.f32 %v1899_v37  ;;  %v1901_v43 = vadd.f32 1.0, %v4183_v38  ;;  %v3042_v37 = vadd.f32 -3.1415927, %v640_v20  ;;  %v644_v38 = vmul.f32 %v4661_v1, %v387_v26  ;;  %v393_v20 = vld [vmem:[%s4654_s6 + $0x710] sm:$0xff] }
 0x1db   : > { %v4187_v44 = vpop.eup %4186  ;;  %4206 = vrcp.f32 %v1900_v39  ;;  %v1902_v45 = vadd.f32 1.0, %v4185_v42  ;;  %v3045_v47 = vadd.f32 -3.1415927, %v643_v34  ;;  %v650_v33 = vmul.f32 %v4661_v1, %v393_v20  ;;  %v396_v34 = vld [vmem:[%s4654_s6 + $0x728] sm:$0xff] }
 0x1dc   : > { %v4189_v48 = vpop.eup %4188  ;;  %4208 = vrcp.f32 %v1901_v43  ;;  %v1903_v49 = vadd.f32 1.0, %v4187_v44  ;;  %v3296_v43 = vmul.f32 -1.442695, %v3040_v29  ;;  %v3044_v44 = vadd.f32 -3.1415927, %v642_v30  ;;  %v395_v29 = vld [vmem:[%s4654_s6 + $0x720] sm:$0xff] }
 0x1dd   : > { %v4191_v52 = vpop.eup %4190  ;;  %4210 = vrcp.f32 %v1902_v45  ;;  %v1904_v53 = vadd.f32 1.0, %v4189_v48  ;;  %v3046_v50 = vadd.f32 -3.1415927, %v644_v38  ;;  %v651_v38 = vmul.f32 %v4661_v1, %v394_v24 }
 0x1de   : > { %v4193_v56 = vpop.eup %4192  ;;  %4212 = vrcp.f32 %v1903_v49  ;;  %v1905_v57 = vadd.f32 1.0, %v4191_v52  ;;  %v3298_v49 = vmul.f32 -1.442695, %v3042_v37  ;;  %v3299_v52 = vmul.f32 -1.442695, %v3043_v41 }
 0x1df   : > { %v4195_v60 = vpop.eup %4194  ;;  %4214 = vrcp.f32 %v1904_v53  ;;  %v1906_v61 = vadd.f32 1.0, %v4193_v56  ;;  %v3300_v54 = vmul.f32 -1.442695, %v3044_v44  ;;  %v3301_v56 = vmul.f32 -1.442695, %v3045_v47  ;;  %v398_v44 = vld [vmem:[%s4654_s6 + $0x738] sm:$0xff] }
 0x1e0   : > { %v4197_v2 = vpop.eup %4196  ;;  %4216 = vrcp.f32 %v1905_v57  ;;  %v1907_v3 = vadd.f32 1.0, %v4195_v60  ;;  %v388_v57 = vld [vmem:[%s4654_s6 + $0x6e8] sm:$0xff]  ;;  %v3302_v59 = vmul.f32 -1.442695, %v3046_v50 }
 0x1e1   : > { %v4199_v7 = vpop.eup %4198  ;;  %4218 = vrcp.f32 %v1906_v61  ;;  %v1908_v8 = vadd.f32 1.0, %v4197_v2  ;;  %v389_v61 = vld [vmem:[%s4654_s6 + $0x6f0] sm:$0xff]  ;;  %v645_v63 = vmul.f32 %v4661_v1, %v388_v57  ;;  %v3053_v57 = vadd.f32 -3.1415927, %v651_v38 }
 0x1e2   : > { %v4201_v12 = vpop.eup %4200  ;;  %4220 = vrcp.f32 %v1907_v3  ;;  %v1909_v13 = vadd.f32 1.0, %v4199_v7  ;;  %v646_v5 = vmul.f32 %v4661_v1, %v389_v61 }
 0x1e3   : > { %v4203_v17 = vpop.eup %4202  ;;  %4222 = vrcp.f32 %v1908_v8  ;;  %v1910_v18 = vadd.f32 1.0, %v4201_v12  ;;  %v3047_v11 = vadd.f32 -3.1415927, %v645_v63  ;;  %v391_v12 = vld [vmem:[%s4654_s6 + $0x700] sm:$0xff] }
 0x1e4   : > { %v4205_v22 = vpop.eup %4204  ;;  %4224 = vrcp.f32 %v1909_v13  ;;  %v1911_v23 = vadd.f32 1.0, %v4203_v17  ;;  %v3048_v19 = vadd.f32 -3.1415927, %v646_v5 }
 0x1e5   : > { %v4207_v27 = vpop.eup %4206  ;;  %2667 = vst [vmem:[%s4713_s21 + $0x618] sm:$0xff] %v4205_v22  ;;  %4226 = vrcp.f32 %v1910_v18 }
 0x1e6   : > { %v4209_v31 = vpop.eup %4208  ;;  %2668 = vst [vmem:[%s4713_s21 + $0x620] sm:$0xff] %v4207_v27  ;;  %4228 = vrcp.f32 %v1911_v23  ;;  %v648_v23 = vmul.f32 %v4661_v1, %v391_v12  ;;  %v3303_v27 = vmul.f32 -1.442695, %v3047_v11  ;;  %v3304_v37 = vmul.f32 -1.442695, %v3048_v19 }
 0x1e7   : > { %v4211_v35 = vpop.eup %4210  ;;  %2669 = vst [vmem:[%s4713_s21 + $0x628] sm:$0xff] %v4209_v31  ;;  %4230 = vpow2.f32 %v3290_v62 }
 0x1e8   : > { %v4213_v39 = vpop.eup %4212  ;;  %2670 = vst [vmem:[%s4713_s21 + $0x630] sm:$0xff] %v4211_v35  ;;  %4232 = vpow2.f32 %v3291_v9 }
 0x1e9   : > { %v4215_v42 = vpop.eup %4214  ;;  %2671 = vst [vmem:[%s4713_s21 + $0x638] sm:$0xff] %v4213_v39  ;;  %4234 = vpow2.f32 %v3292_v28  ;;  %v649_v28 = vmul.f32 %v4661_v1, %v392_v16  ;;  %v397_v39 = vld [vmem:[%s4654_s6 + $0x730] sm:$0xff] }
 0x1ea   : > { %v4217_v45 = vpop.eup %4216  ;;  %2672 = vst [vmem:[%s4713_s21 + $0x640] sm:$0xff] %v4215_v42  ;;  %4236 = vpow2.f32 %v3293_v32  ;;  %v3049_v32 = vadd.f32 -3.1415927, %v647_v15  ;;  %v3050_v42 = vadd.f32 -3.1415927, %v648_v23 }
 0x1eb   : > { %v4219_v48 = vpop.eup %4218  ;;  %2673 = vst [vmem:[%s4713_s21 + $0x648] sm:$0xff] %v4217_v45  ;;  %4238 = vpow2.f32 %v3294_v36  ;;  %v3051_v47 = vadd.f32 -3.1415927, %v649_v28 }
 0x1ec   : > { %v4221_v51 = vpop.eup %4220  ;;  %2674 = vst [vmem:[%s4713_s21 + $0x650] sm:$0xff] %v4219_v48  ;;  %4240 = vpow2.f32 %v3295_v40  ;;  %v653_v48 = vmul.f32 %v4661_v1, %v396_v34  ;;  %v403_v34 = vld [vmem:[%s4654_s6 + $0x760] sm:$0xff] }
 0x1ed   : > { %v4223_v53 = vpop.eup %4222  ;;  %2675 = vst [vmem:[%s4713_s21 + $0x658] sm:$0xff] %v4221_v51  ;;  %4242 = vpow2.f32 %v3296_v43  ;;  %v652_v43 = vmul.f32 %v4661_v1, %v395_v29 }
 0x1ee   : > { %v4225_v55 = vpop.eup %4224  ;;  %2676 = vst [vmem:[%s4713_s21 + $0x660] sm:$0xff] %v4223_v53  ;;  %4244 = vpow2.f32 %v3297_v46  ;;  %v654_v53 = vmul.f32 %v4661_v1, %v397_v39 }
 0x1ef   : > { %v4227_v58 = vpop.eup %4226  ;;  %2677 = vst [vmem:[%s4713_s21 + $0x668] sm:$0xff] %v4225_v55  ;;  %4246 = vpow2.f32 %v3298_v49  ;;  %v399_v49 = vld [vmem:[%s4654_s6 + $0x740] sm:$0xff]  ;;  %v3054_v61 = vadd.f32 -3.1415927, %v652_v43  ;;  %v660_v43 = vmul.f32 %v4661_v1, %v403_v34 }
 0x1f0   : > { %v4229_v60 = vpop.eup %4228  ;;  %2678 = vst [vmem:[%s4713_s21 + $0x670] sm:$0xff] %v4227_v58  ;;  %4248 = vpow2.f32 %v3299_v52  ;;  %v3052_v52 = vadd.f32 -3.1415927, %v650_v33  ;;  %v655_v58 = vmul.f32 %v4661_v1, %v398_v44  ;;  %v3056_v6 = vadd.f32 -3.1415927, %v654_v53  ;;  %v405_v44 = vld [vmem:[%s4654_s6 + $0x770] sm:$0xff] }
 0x1f1   : > { %v4231_v62 = vpop.eup %4230  ;;  %2679 = vst [vmem:[%s4713_s21 + $0x678] sm:$0xff] %v4229_v60  ;;  %4250 = vpow2.f32 %v3300_v54  ;;  %v400_v54 = vld [vmem:[%s4654_s6 + $0x748] sm:$0xff]  ;;  %v3306_v60 = vmul.f32 -1.442695, %v3050_v42  ;;  %v3310_v11 = vmul.f32 -1.442695, %v3054_v61 }
 0x1f2   : > { %v4233_v0 = vpop.eup %4232  ;;  %v1912_v2 = vadd.f32 1.0, %v4231_v62  ;;  %4252 = vpow2.f32 %v3301_v56  ;;  %v3305_v56 = vmul.f32 -1.442695, %v3049_v32  ;;  %v656_v62 = vmul.f32 %v4661_v1, %v399_v49 }
 0x1f3   : > { %v4235_v3 = vpop.eup %4234  ;;  %v1913_v4 = vadd.f32 1.0, %v4233_v0  ;;  %4254 = vpow2.f32 %v3302_v59  ;;  %v3307_v0 = vmul.f32 -1.442695, %v3051_v47  ;;  %v3308_v5 = vmul.f32 -1.442695, %v3052_v52  ;;  %v407_v52 = vld [vmem:[%s4654_s6 + $0x780] sm:$0xff] }
 0x1f4   : > { %v4237_v7 = vpop.eup %4236  ;;  %4256 = vrcp.f32 %v1912_v2  ;;  %v1914_v8 = vadd.f32 1.0, %v4235_v3  ;;  %v3055_v2 = vadd.f32 -3.1415927, %v653_v48  ;;  %v657_v3 = vmul.f32 %v4661_v1, %v400_v54  ;;  %v406_v48 = vld [vmem:[%s4654_s6 + $0x778] sm:$0xff] }
 0x1f5   : > { %v4239_v9 = vpop.eup %4238  ;;  %4258 = vrcp.f32 %v1913_v4  ;;  %v1915_v10 = vadd.f32 1.0, %v4237_v7  ;;  %v3058_v12 = vadd.f32 -3.1415927, %v656_v62  ;;  %v663_v61 = vmul.f32 %v4661_v1, %v406_v48  ;;  %v409_v62 = vld [vmem:[%s4654_s6 + $0x790] sm:$0xff] }
 0x1f6   : > { %v4241_v13 = vpop.eup %4240  ;;  %4260 = vrcp.f32 %v1914_v8  ;;  %v1916_v14 = vadd.f32 1.0, %v4239_v9  ;;  %v3309_v8 = vmul.f32 -1.442695, %v3053_v57  ;;  %v3057_v9 = vadd.f32 -3.1415927, %v655_v58  ;;  %v408_v57 = vld [vmem:[%s4654_s6 + $0x788] sm:$0xff] }
 0x1f7   : > { %v4243_v17 = vpop.eup %4242  ;;  %4262 = vrcp.f32 %v1915_v10  ;;  %v1917_v18 = vadd.f32 1.0, %v4241_v13  ;;  %v3059_v15 = vadd.f32 -3.1415927, %v657_v3  ;;  %v664_v3 = vmul.f32 %v4661_v1, %v407_v52 }
 0x1f8   : > { %v4245_v21 = vpop.eup %4244  ;;  %4264 = vrcp.f32 %v1916_v14  ;;  %v1918_v22 = vadd.f32 1.0, %v4243_v17  ;;  %v3311_v14 = vmul.f32 -1.442695, %v3055_v2  ;;  %v3312_v17 = vmul.f32 -1.442695, %v3056_v6 }
 0x1f9   : > { %v4247_v25 = vpop.eup %4246  ;;  %4266 = vrcp.f32 %v1917_v18  ;;  %v1919_v26 = vadd.f32 1.0, %v4245_v21  ;;  %v3313_v19 = vmul.f32 -1.442695, %v3057_v9  ;;  %v3314_v21 = vmul.f32 -1.442695, %v3058_v12  ;;  %v411_v9 = vld [vmem:[%s4654_s6 + $0x7a0] sm:$0xff] }
 0x1fa   : > { %v4249_v30 = vpop.eup %4248  ;;  %4268 = vrcp.f32 %v1918_v22  ;;  %v1920_v31 = vadd.f32 1.0, %v4247_v25  ;;  %v401_v22 = vld [vmem:[%s4654_s6 + $0x750] sm:$0xff]  ;;  %v3315_v24 = vmul.f32 -1.442695, %v3059_v15 }
 0x1fb   : > { %v4251_v35 = vpop.eup %4250  ;;  %4270 = vrcp.f32 %v1919_v26  ;;  %v1921_v36 = vadd.f32 1.0, %v4249_v30  ;;  %v402_v26 = vld [vmem:[%s4654_s6 + $0x758] sm:$0xff]  ;;  %v658_v28 = vmul.f32 %v4661_v1, %v401_v22  ;;  %v3066_v22 = vadd.f32 -3.1415927, %v664_v3 }
 0x1fc   : > { %v4253_v40 = vpop.eup %4252  ;;  %4272 = vrcp.f32 %v1920_v31  ;;  %v1922_v41 = vadd.f32 1.0, %v4251_v35  ;;  %v659_v33 = vmul.f32 %v4661_v1, %v402_v26 }
 0x1fd   : > { %v4255_v45 = vpop.eup %4254  ;;  %4274 = vrcp.f32 %v1921_v36  ;;  %v1923_v46 = vadd.f32 1.0, %v4253_v40  ;;  %v3060_v39 = vadd.f32 -3.1415927, %v658_v28  ;;  %v404_v40 = vld [vmem:[%s4654_s6 + $0x768] sm:$0xff] }
 0x1fe   : > { %v4257_v50 = vpop.eup %4256  ;;  %4276 = vrcp.f32 %v1922_v41  ;;  %v1924_v51 = vadd.f32 1.0, %v4255_v45  ;;  %v3061_v47 = vadd.f32 -3.1415927, %v659_v33 }
 0x1ff   : > { %v4259_v55 = vpop.eup %4258  ;;  %2680 = vst [vmem:[%s4713_s21 + $0x680] sm:$0xff] %v4257_v50  ;;  %4278 = vrcp.f32 %v1923_v46 }
 0x200   : > { %v4261_v59 = vpop.eup %4260  ;;  %2681 = vst [vmem:[%s4713_s21 + $0x688] sm:$0xff] %v4259_v55  ;;  %4280 = vrcp.f32 %v1924_v51  ;;  %v661_v51 = vmul.f32 %v4661_v1, %v404_v40  ;;  %v3316_v55 = vmul.f32 -1.442695, %v3060_v39  ;;  %v3317_v2 = vmul.f32 -1.442695, %v3061_v47 }
 0x201   : > { %v4263_v63 = vpop.eup %4262  ;;  %2682 = vst [vmem:[%s4713_s21 + $0x690] sm:$0xff] %v4261_v59  ;;  %4282 = vpow2.f32 %v3303_v27 }
 0x202   : > { %v4265_v4 = vpop.eup %4264  ;;  %2683 = vst [vmem:[%s4713_s21 + $0x698] sm:$0xff] %v4263_v63  ;;  %4284 = vpow2.f32 %v3304_v37 }
 0x203   : > { %v4267_v7 = vpop.eup %4266  ;;  %2684 = vst [vmem:[%s4713_s21 + $0x6a0] sm:$0xff] %v4265_v4  ;;  %4286 = vpow2.f32 %v3305_v56  ;;  %v662_v56 = vmul.f32 %v4661_v1, %v405_v44  ;;  %v410_v4 = vld [vmem:[%s4654_s6 + $0x798] sm:$0xff] }
 0x204   : > { %v4269_v10 = vpop.eup %4268  ;;  %2685 = vst [vmem:[%s4713_s21 + $0x6a8] sm:$0xff] %v4267_v7  ;;  %4288 = vpow2.f32 %v3306_v60  ;;  %v3062_v60 = vadd.f32 -3.1415927, %v660_v43  ;;  %v3063_v7 = vadd.f32 -3.1415927, %v661_v51 }
 0x205   : > { %v4271_v13 = vpop.eup %4270  ;;  %2686 = vst [vmem:[%s4713_s21 + $0x6b0] sm:$0xff] %v4269_v10  ;;  %4290 = vpow2.f32 %v3307_v0  ;;  %v3064_v12 = vadd.f32 -3.1415927, %v662_v56 }
 0x206   : > { %v4273_v16 = vpop.eup %4272  ;;  %2687 = vst [vmem:[%s4713_s21 + $0x6b8] sm:$0xff] %v4271_v13  ;;  %4292 = vpow2.f32 %v3308_v5  ;;  %v666_v13 = vmul.f32 %v4661_v1, %v409_v62 }
 0x207   : > { %v4275_v18 = vpop.eup %4274  ;;  %2688 = vst [vmem:[%s4713_s21 + $0x6c0] sm:$0xff] %v4273_v16  ;;  %4294 = vpow2.f32 %v3309_v8  ;;  %v665_v8 = vmul.f32 %v4661_v1, %v408_v57 }
 0x208   : > { %v4277_v20 = vpop.eup %4276  ;;  %2689 = vst [vmem:[%s4713_s21 + $0x6c8] sm:$0xff] %v4275_v18  ;;  %4296 = vpow2.f32 %v3310_v11  ;;  %v667_v18 = vmul.f32 %v4661_v1, %v410_v4  ;;  %v417_v4 = vld [vmem:[%s4654_s6 + $0x7d0] sm:$0xff] }
 0x209   : > { %v4279_v23 = vpop.eup %4278  ;;  %2690 = vst [vmem:[%s4713_s21 + $0x6d0] sm:$0xff] %v4277_v20  ;;  %4298 = vpow2.f32 %v3311_v14  ;;  %v412_v14 = vld [vmem:[%s4654_s6 + $0x7a8] sm:$0xff]  ;;  %v3067_v26 = vadd.f32 -3.1415927, %v665_v8  ;;  %v418_v8 = vld [vmem:[%s4654_s6 + $0x7d8] sm:$0xff] }
 0x20a   : > { %v4281_v25 = vpop.eup %4280  ;;  %2691 = vst [vmem:[%s4713_s21 + $0x6d8] sm:$0xff] %v4279_v23  ;;  %4300 = vpow2.f32 %v3312_v17  ;;  %v3065_v17 = vadd.f32 -3.1415927, %v663_v61  ;;  %v668_v23 = vmul.f32 %v4661_v1, %v411_v9  ;;  %v3069_v34 = vadd.f32 -3.1415927, %v667_v18 }
 0x20b   : > { %v4283_v27 = vpop.eup %4282  ;;  %2692 = vst [vmem:[%s4713_s21 + $0x6e0] sm:$0xff] %v4281_v25  ;;  %4302 = vpow2.f32 %v3313_v19  ;;  %v413_v19 = vld [vmem:[%s4654_s6 + $0x7b0] sm:$0xff]  ;;  %v3319_v25 = vmul.f32 -1.442695, %v3063_v7  ;;  %v3323_v39 = vmul.f32 -1.442695, %v3067_v26 }
 0x20c   : > { %v4285_v29 = vpop.eup %4284  ;;  %v1925_v30 = vadd.f32 1.0, %v4283_v27  ;;  %4304 = vpow2.f32 %v3314_v21  ;;  %v3318_v21 = vmul.f32 -1.442695, %v3062_v60  ;;  %v669_v27 = vmul.f32 %v4661_v1, %v412_v14  ;;  %v415_v60 = vld [vmem:[%s4654_s6 + $0x7c0] sm:$0xff]  ;;  %v422_v26 = vld [vmem:[%s4654_s6 + $0x7f8] sm:$0xff] }
 0x20d   : > { %v4287_v31 = vpop.eup %4286  ;;  %v1926_v32 = vadd.f32 1.0, %v4285_v29  ;;  %4306 = vpow2.f32 %v3315_v24  ;;  %v3320_v29 = vmul.f32 -1.442695, %v3064_v12  ;;  %v3321_v33 = vmul.f32 -1.442695, %v3065_v17  ;;  %v419_v12 = vld [vmem:[%s4654_s6 + $0x7e0] sm:$0xff] }
 0x20e   : > { %v4289_v35 = vpop.eup %4288  ;;  %4308 = vrcp.f32 %v1925_v30  ;;  %v1927_v36 = vadd.f32 1.0, %v4287_v31  ;;  %v3068_v30 = vadd.f32 -3.1415927, %v666_v13  ;;  %v670_v31 = vmul.f32 %v4661_v1, %v413_v19 }
 0x20f   : > { %v4291_v37 = vpop.eup %4290  ;;  %4310 = vrcp.f32 %v1926_v32  ;;  %v1928_v38 = vadd.f32 1.0, %v4289_v35  ;;  %v3071_v40 = vadd.f32 -3.1415927, %v669_v27  ;;  %v672_v7 = vmul.f32 %v4661_v1, %v415_v60 }
 0x210   : > { %v4293_v41 = vpop.eup %4292  ;;  %4312 = vrcp.f32 %v1927_v36  ;;  %v1929_v42 = vadd.f32 1.0, %v4291_v37  ;;  %v3322_v36 = vmul.f32 -1.442695, %v3066_v22  ;;  %v3070_v37 = vadd.f32 -3.1415927, %v668_v23 }
 0x211   : > { %v4295_v45 = vpop.eup %4294  ;;  %4314 = vrcp.f32 %v1928_v38  ;;  %v1930_v46 = vadd.f32 1.0, %v4293_v41  ;;  %v3072_v43 = vadd.f32 -3.1415927, %v670_v31 }
 0x212   : > { %v4297_v49 = vpop.eup %4296  ;;  %4316 = vrcp.f32 %v1929_v42  ;;  %v1931_v50 = vadd.f32 1.0, %v4295_v45  ;;  %v3324_v42 = vmul.f32 -1.442695, %v3068_v30  ;;  %v3325_v45 = vmul.f32 -1.442695, %v3069_v34 }
 0x213   : > { %v4299_v53 = vpop.eup %4298  ;;  %4318 = vrcp.f32 %v1930_v46  ;;  %v1932_v54 = vadd.f32 1.0, %v4297_v49  ;;  %v3326_v47 = vmul.f32 -1.442695, %v3070_v37  ;;  %v3327_v49 = vmul.f32 -1.442695, %v3071_v40 }
 0x214   : > { %v4301_v58 = vpop.eup %4300  ;;  %4320 = vrcp.f32 %v1931_v50  ;;  %v1933_v59 = vadd.f32 1.0, %v4299_v53  ;;  %v414_v50 = vld [vmem:[%s4654_s6 + $0x7b8] sm:$0xff]  ;;  %v3328_v52 = vmul.f32 -1.442695, %v3072_v43 }
 0x215   : > { %v4303_v63 = vpop.eup %4302  ;;  %4322 = vrcp.f32 %v1932_v54  ;;  %v1934_v0 = vadd.f32 1.0, %v4301_v58 }
 0x216   : > { %v4305_v5 = vpop.eup %4304  ;;  %4324 = vrcp.f32 %v1933_v59  ;;  %v1935_v6 = vadd.f32 1.0, %v4303_v63  ;;  %v416_v63 = vld [vmem:[%s4654_s6 + $0x7c8] sm:$0xff] }
 0x217   : > { %v4307_v10 = vpop.eup %4306  ;;  %4326 = vrcp.f32 %v1934_v0  ;;  %v1936_v11 = vadd.f32 1.0, %v4305_v5 }
 0x218   : > { %v4309_v15 = vpop.eup %4308  ;;  %4328 = vrcp.f32 %v1935_v6  ;;  %v1937_v16 = vadd.f32 1.0, %v4307_v10 }
 0x219   : > { %v4311_v20 = vpop.eup %4310  ;;  %2693 = vst [vmem:[%s4713_s21 + $0x6e8] sm:$0xff] %v4309_v15  ;;  %4330 = vrcp.f32 %v1936_v11  ;;  %v673_v11 = vmul.f32 %v4661_v1, %v416_v63  ;;  %v674_v15 = vmul.f32 %v4661_v1, %v417_v4 }
 0x21a   : > { %v4313_v24 = vpop.eup %4312  ;;  %2694 = vst [vmem:[%s4713_s21 + $0x6f0] sm:$0xff] %v4311_v20  ;;  %4332 = vrcp.f32 %v1937_v16  ;;  %v420_v16 = vld [vmem:[%s4654_s6 + $0x7e8] sm:$0xff]  ;;  %v675_v20 = vmul.f32 %v4661_v1, %v418_v8 }
 0x21b   : > { %v4315_v28 = vpop.eup %4314  ;;  %2695 = vst [vmem:[%s4713_s21 + $0x6f8] sm:$0xff] %v4313_v24  ;;  %4334 = vpow2.f32 %v3316_v55  ;;  %v671_v55 = vmul.f32 %v4661_v1, %v414_v50  ;;  %v3074_v24 = vadd.f32 -3.1415927, %v672_v7  ;;  %v677_v30 = vmul.f32 %v4661_v1, %v420_v16 }
 0x21c   : > { %v4317_v32 = vpop.eup %4316  ;;  %2696 = vst [vmem:[%s4713_s21 + $0x700] sm:$0xff] %v4315_v28  ;;  %4336 = vpow2.f32 %v3317_v2  ;;  %v3077_v37 = vadd.f32 -3.1415927, %v675_v20 }
 0x21d   : > { %v4319_v35 = vpop.eup %4318  ;;  %2697 = vst [vmem:[%s4713_s21 + $0x708] sm:$0xff] %v4317_v32  ;;  %4338 = vpow2.f32 %v3318_v21  ;;  %v3073_v3 = vadd.f32 -3.1415927, %v671_v55  ;;  %v421_v21 = vld [vmem:[%s4654_s6 + $0x7f0] sm:$0xff] }
 0x21e   : > { %v4321_v38 = vpop.eup %4320  ;;  %2698 = vst [vmem:[%s4713_s21 + $0x710] sm:$0xff] %v4319_v35  ;;  %4340 = vpow2.f32 %v3319_v25  ;;  %v676_v25 = vmul.f32 %v4661_v1, %v419_v12  ;;  %v678_v34 = vmul.f32 %v4661_v1, %v421_v21 }
 0x21f   : > { %v4323_v41 = vpop.eup %4322  ;;  %2699 = vst [vmem:[%s4713_s21 + $0x718] sm:$0xff] %v4321_v38  ;;  %4342 = vpow2.f32 %v3320_v29  ;;  %v3329_v19 = vmul.f32 -1.442695, %v3073_v3  ;;  %v3075_v29 = vadd.f32 -3.1415927, %v673_v11  ;;  %v679_v38 = vmul.f32 %v4661_v1, %v422_v26 }
 0x220   : > { %v4325_v44 = vpop.eup %4324  ;;  %2700 = vst [vmem:[%s4713_s21 + $0x720] sm:$0xff] %v4323_v41  ;;  %4344 = vpow2.f32 %v3321_v33  ;;  %v3076_v33 = vadd.f32 -3.1415927, %v674_v15  ;;  %v3330_v41 = vmul.f32 -1.442695, %v3074_v24 }
 0x221   : > { %v4327_v46 = vpop.eup %4326  ;;  %2701 = vst [vmem:[%s4713_s21 + $0x728] sm:$0xff] %v4325_v44  ;;  %4346 = vpow2.f32 %v3322_v36  ;;  %v3331_v44 = vmul.f32 -1.442695, %v3075_v29  ;;  %v3081_v50 = vadd.f32 -3.1415927, %v679_v38 }
 0x222   : > { %v4329_v48 = vpop.eup %4328  ;;  %2702 = vst [vmem:[%s4713_s21 + $0x730] sm:$0xff] %v4327_v46  ;;  %4348 = vpow2.f32 %v3323_v39 }
 0x223   : > { %v4331_v51 = vpop.eup %4330  ;;  %2703 = vst [vmem:[%s4713_s21 + $0x738] sm:$0xff] %v4329_v48  ;;  %4350 = vpow2.f32 %v3324_v42  ;;  %v3078_v42 = vadd.f32 -3.1415927, %v676_v25  ;;  %v3080_v48 = vadd.f32 -3.1415927, %v678_v34 }
 0x224   : > { %v4333_v53 = vpop.eup %4332  ;;  %2704 = vst [vmem:[%s4713_s21 + $0x740] sm:$0xff] %v4331_v51  ;;  %4352 = vpow2.f32 %v3325_v45  ;;  %v3079_v45 = vadd.f32 -3.1415927, %v677_v30 }
 0x225   : > { %v4335_v54 = vpop.eup %4334  ;;  %2705 = vst [vmem:[%s4713_s21 + $0x748] sm:$0xff] %v4333_v53  ;;  %4354 = vpow2.f32 %v3326_v47  ;;  %v3332_v47 = vmul.f32 -1.442695, %v3076_v33 }
 0x226   : > { %v4337_v56 = vpop.eup %4336  ;;  %v1938_v57 = vadd.f32 1.0, %v4335_v54  ;;  %4356 = vpow2.f32 %v3327_v49  ;;  %v3333_v49 = vmul.f32 -1.442695, %v3077_v37  ;;  %v3335_v54 = vmul.f32 -1.442695, %v3079_v45 }
 0x227   : > { %v4339_v58 = vpop.eup %4338  ;;  %v1939_v59 = vadd.f32 1.0, %v4337_v56  ;;  %4358 = vpow2.f32 %v3328_v52  ;;  %v3334_v52 = vmul.f32 -1.442695, %v3078_v42  ;;  %v3336_v56 = vmul.f32 -1.442695, %v3080_v48 }
 0x228   : > { %v4341_v61 = vpop.eup %4340  ;;  %4360 = vrcp.f32 %v1938_v57  ;;  %v1940_v62 = vadd.f32 1.0, %v4339_v58  ;;  %v3337_v58 = vmul.f32 -1.442695, %v3081_v50 }
 0x229   : > { %v4343_v0 = vpop.eup %4342  ;;  %4362 = vrcp.f32 %v1939_v59  ;;  %v1941_v2 = vadd.f32 1.0, %v4341_v61 }
 0x22a   : > { %v4345_v5 = vpop.eup %4344  ;;  %4364 = vrcp.f32 %v1940_v62  ;;  %v1942_v6 = vadd.f32 1.0, %v4343_v0 }
 0x22b   : > { %v4347_v9 = vpop.eup %4346  ;;  %4366 = vrcp.f32 %v1941_v2  ;;  %v1943_v10 = vadd.f32 1.0, %v4345_v5 }
 0x22c   : > { %v4349_v13 = vpop.eup %4348  ;;  %4368 = vrcp.f32 %v1942_v6  ;;  %v1944_v14 = vadd.f32 1.0, %v4347_v9 }
 0x22d   : > { %v4351_v17 = vpop.eup %4350  ;;  %4370 = vrcp.f32 %v1943_v10  ;;  %v1945_v18 = vadd.f32 1.0, %v4349_v13 }
 0x22e   : > { %v4353_v22 = vpop.eup %4352  ;;  %4372 = vrcp.f32 %v1944_v14  ;;  %v1946_v23 = vadd.f32 1.0, %v4351_v17 }
 0x22f   : > { %v4355_v27 = vpop.eup %4354  ;;  %4374 = vrcp.f32 %v1945_v18  ;;  %v1947_v28 = vadd.f32 1.0, %v4353_v22 }
 0x230   : > { %v4357_v31 = vpop.eup %4356  ;;  %4376 = vrcp.f32 %v1946_v23  ;;  %v1948_v32 = vadd.f32 1.0, %v4355_v27 }
 0x231   : > { %v4359_v35 = vpop.eup %4358  ;;  %4378 = vrcp.f32 %v1947_v28  ;;  %v1949_v36 = vadd.f32 1.0, %v4357_v31 }
 0x232   : > { %v4361_v39 = vpop.eup %4360  ;;  %4380 = vrcp.f32 %v1948_v32  ;;  %v1950_v40 = vadd.f32 1.0, %v4359_v35 }
 0x233   : > { %v4363_v43 = vpop.eup %4362  ;;  %2706 = vst [vmem:[%s4713_s21 + $0x750] sm:$0xff] %v4361_v39  ;;  %4382 = vrcp.f32 %v1949_v36 }
 0x234   : > { %v4365_v46 = vpop.eup %4364  ;;  %2707 = vst [vmem:[%s4713_s21 + $0x758] sm:$0xff] %v4363_v43  ;;  %4384 = vrcp.f32 %v1950_v40 }
 0x235   : > { %v4367_v1 = vpop.eup %4366  ;;  %2708 = vst [vmem:[%s4713_s21 + $0x760] sm:$0xff] %v4365_v46  ;;  %4386 = vpow2.f32 %v3329_v19 }
 0x236   : > { %v4369_v51 = vpop.eup %4368  ;;  %2709 = vst [vmem:[%s4713_s21 + $0x768] sm:$0xff] %v4367_v1  ;;  %4388 = vpow2.f32 %v3330_v41 }
 0x237   : > { %v4371_v53 = vpop.eup %4370  ;;  %2710 = vst [vmem:[%s4713_s21 + $0x770] sm:$0xff] %v4369_v51  ;;  %4390 = vpow2.f32 %v3331_v44 }
 0x238   : > { %v4373_v55 = vpop.eup %4372  ;;  %2711 = vst [vmem:[%s4713_s21 + $0x778] sm:$0xff] %v4371_v53  ;;  %4392 = vpow2.f32 %v3332_v47 }
 0x239   : > { %v4375_v57 = vpop.eup %4374  ;;  %2712 = vst [vmem:[%s4713_s21 + $0x780] sm:$0xff] %v4373_v55  ;;  %4394 = vpow2.f32 %v3333_v49 }
 0x23a   : > { %v4377_v59 = vpop.eup %4376  ;;  %2713 = vst [vmem:[%s4713_s21 + $0x788] sm:$0xff] %v4375_v57  ;;  %4396 = vpow2.f32 %v3334_v52 }
 0x23b   : > { %v4379_v60 = vpop.eup %4378  ;;  %2714 = vst [vmem:[%s4713_s21 + $0x790] sm:$0xff] %v4377_v59  ;;  %4398 = vpow2.f32 %v3335_v54 }
 0x23c   : > { %v4381_v61 = vpop.eup %4380  ;;  %2715 = vst [vmem:[%s4713_s21 + $0x798] sm:$0xff] %v4379_v60  ;;  %4400 = vpow2.f32 %v3336_v56 }
 0x23d   : > { %v4383_v62 = vpop.eup %4382  ;;  %2716 = vst [vmem:[%s4713_s21 + $0x7a0] sm:$0xff] %v4381_v61  ;;  %4402 = vpow2.f32 %v3337_v58 }
 0x23e   : > { %v4385_v63 = vpop.eup %4384  ;;  %2717 = vst [vmem:[%s4713_s21 + $0x7a8] sm:$0xff] %v4383_v62 }
 0x23f   : > { %v4387_v0 = vpop.eup %4386  ;;  %2718 = vst [vmem:[%s4713_s21 + $0x7b0] sm:$0xff] %v4385_v63 }
 0x240   : > { %v4389_v2 = vpop.eup %4388  ;;  %v1951_v3 = vadd.f32 1.0, %v4387_v0 }
 0x241   : > { %v4391_v4 = vpop.eup %4390  ;;  %v1952_v5 = vadd.f32 1.0, %v4389_v2 }
 0x242   : > { %v4393_v6 = vpop.eup %4392  ;;  %4404 = vrcp.f32 %v1951_v3  ;;  %v1953_v7 = vadd.f32 1.0, %v4391_v4 }
 0x243   : > { %v4395_v8 = vpop.eup %4394  ;;  %4406 = vrcp.f32 %v1952_v5  ;;  %v1954_v9 = vadd.f32 1.0, %v4393_v6 }
 0x244   : > { %v4397_v10 = vpop.eup %4396  ;;  %4408 = vrcp.f32 %v1953_v7  ;;  %v1955_v11 = vadd.f32 1.0, %v4395_v8 }
 0x245   : > { %v4399_v12 = vpop.eup %4398  ;;  %4410 = vrcp.f32 %v1954_v9  ;;  %v1956_v13 = vadd.f32 1.0, %v4397_v10 }
 0x246   : > { %v4401_v14 = vpop.eup %4400  ;;  %4412 = vrcp.f32 %v1955_v11  ;;  %v1957_v15 = vadd.f32 1.0, %v4399_v12 }
 0x247   : > { %v4403_v16 = vpop.eup %4402  ;;  %4414 = vrcp.f32 %v1956_v13  ;;  %v1958_v17 = vadd.f32 1.0, %v4401_v14 }
 0x248   : > { %4416 = vrcp.f32 %v1957_v15  ;;  %v1959_v18 = vadd.f32 1.0, %v4403_v16 }
 0x249   : > { %4418 = vrcp.f32 %v1958_v17 }
 0x24a   : > { %4420 = vrcp.f32 %v1959_v18 }
 0x24c   : > { %v4405_v19 = vpop.eup %4404 }
 0x24d   : > { %v4407_v20 = vpop.eup %4406  ;;  %2719 = vst [vmem:[%s4713_s21 + $0x7b8] sm:$0xff] %v4405_v19 }
 0x24e   : > { %v4409_v21 = vpop.eup %4408  ;;  %2720 = vst [vmem:[%s4713_s21 + $0x7c0] sm:$0xff] %v4407_v20 }
 0x24f   : > { %v4411_v22 = vpop.eup %4410  ;;  %2721 = vst [vmem:[%s4713_s21 + $0x7c8] sm:$0xff] %v4409_v21 }
 0x250   : > { %v4413_v23 = vpop.eup %4412  ;;  %2722 = vst [vmem:[%s4713_s21 + $0x7d0] sm:$0xff] %v4411_v22 }
 0x251   : > { %v4415_v24 = vpop.eup %4414  ;;  %2723 = vst [vmem:[%s4713_s21 + $0x7d8] sm:$0xff] %v4413_v23 }
 0x252   : > { %v4417_v25 = vpop.eup %4416  ;;  %2724 = vst [vmem:[%s4713_s21 + $0x7e0] sm:$0xff] %v4415_v24 }
 0x253   : > { %v4419_v26 = vpop.eup %4418  ;;  %2725 = vst [vmem:[%s4713_s21 + $0x7e8] sm:$0xff] %v4417_v25 }
 0x254   : > { %v4421_v27 = vpop.eup %4420  ;;  %2726 = vst [vmem:[%s4713_s21 + $0x7f0] sm:$0xff] %v4419_v26 }
 0x255   : > { %2727 = vst [vmem:[%s4713_s21 + $0x7f8] sm:$0xff] %v4421_v27 }
 0x256   : > { %4465 = shalt.err (!%p4462_p2)
}
 0x257   : > { %s4466_s18 = scalar_lea.hbm %s5436_s8, 32768  ;;  %s4470_s25 = scalar_lea.hbm %s5487_s2, 65536 }
 0x258   : > { %p4467_p4 = scmp.ne.s32.totalorder %s5436_s8, %s4466_s18  ;;  %p4471_p9 = scmp.lt.u32.totalorder %s5436_s8, %s5487_s2 }
 0x259   : > { %p4472_p1 = scmp.lt.u32.totalorder %s4470_s25, %s4466_s18  ;;  %p4474_p6 = scmp.lt.u32.totalorder %s4466_s18, %s5436_s8 }
 0x25a   : > { %p4468_p5 = pnand %p4467_p4, %p5494_p11 }
 0x25b   : > { %p4473_p3 = por %p4472_p1, %p4471_p9 }
 0x25c   : > { %p4469_p7 = pneg %p4468_p5 }
 0x25d   : > { %p4475_p12 = por %p4474_p6, %p4473_p3 }
 0x25f   : > { %p4476_p13 = pnand %p4475_p12, %p4469_p7 }
 0x261   : > { %4479 = shalt.err (!%p4476_p13)
}
 0x262   : > { %s4524_s30 = smov 1024   ;;  %s4525_s6 = smov 64  }
 0x263   : > { %3350 = dma.vmem_to_hbm [thread:$0]  (%p5494_p11), %s5438_s4, 32768, %s5436_s8, %s2729_s0, %s4524_s30, %s4524_s30, %s4525_s6  }
 0x264 PF: > { %s2758_s29 = sand.u32 1, %s4506_s11   ;;  %p5495_p8 = scmp.ne.s32.totalorder %s5492_s23, 0 }
 0x265   : > { %p5496_p10 = scmp.ge.s32.totalorder %s4518_s14, 2  ;;  %s2759_s21 = scalar_lea.sflag [#allocation5], %s2758_s29 }
 0x267   : > { %p3357_p0 = pnand %p5496_p10, %p5495_p8 }
 0x269   : > { %4501 = dma.done.wait (!%p3357_p0), %s2759_s21, 32768  }
 0x26a   : > { %4503 = vsyncadd (!%p3357_p0), %s2759_s21, 4294934528  ;;  %p16_p2 = scmp.ge.s32.totalorder %s4569_s16, 4   ;;  %s5497_s11 = smov %s4510_s12 }
 0x26b   : > { %s5498_s12 = smov %s4514_s13  ;;  %s5499_s13 = smov %s4581_s19 }
 0x26c   : > { %s5500_s14 = smov %s4569_s16  ;;  %18 = sbr.rel (!%p16_p2) target bundleno = 7 (0x7), region = 73 }
 0x273   :  { %2764 = vsyncpa [#allocation4], 1 }
 0x274   :  { %2766 = vsyncpa [#allocation4 + $0x1], 1 }
 0x275   :  { %2767 = vsyncpa [#allocation5], 1 }
 0x276   :  { %2769 = vsyncpa [#allocation5 + $0x1], 1 }

</bundles_post_ra>
